<compile_context>
chip_gen: v7x
topology: tpu7x:2x2x1
jax: 0.10.0
libtpu: 0.0.40
codegen_flags: <defaults>
</compile_context>

<pallas_src>
import math

import jax
import jax.numpy as jnp
from jax.experimental import pallas as pl
from jax.experimental.pallas import tpu as pltpu

BATCH = 2
SEQ_LEN = 8
INPUT_SIZE = 4
HIDDEN = 32
NUM_LAYERS = 2          # fixed by this implementation
N_FORECASTS = 5


def _round_up(n, m):
    return ((n + m - 1) // m) * m


# Slab layouts (row offsets).  All section starts are multiples of 8 so that
# in-kernel row slices are sublane-tile aligned.
def _wslab_layout(input_size, hidden_size):
    I, H = input_size, hidden_size
    enc0 = 0                          # rows enc0 : enc0+I+H   -> [wih0.T; whh0.T]
    enc1 = _round_up(I + H, 8)        # rows enc1 : enc1+2H    -> [wih1.T; whh1.T]
    dec0 = enc1 + 2 * H               # rows dec0 : dec0+2H    -> [wfc.T@dwih0.T; dwhh0.T]
    dec1 = dec0 + 2 * H               # rows dec1 : dec1+2H    -> [dwih1.T; dwhh1.T]
    misc = dec1 + 2 * H               # one (8, 4H) block: dwih0_row + 5 fused biases
    total = misc + 8
    return dict(enc0=enc0, enc1=enc1, dec0=dec0, dec1=dec1, misc=misc, total=total)


def _aslab_layout(input_size, hidden_size):
    I, H = input_size, hidden_size
    wae = 0                           # (H, H)  wattn[:, :H].T
    waf = H                           # (H, H)  wattn[:, H:].T
    wiah = 2 * H                      # (H, I)  wia[:, :H].T  (cols 0:I)
    misc = 3 * H                      # (8, H): battn / v / wfc / bfc rows
    wiax = misc + 8                   # (I, I)  wia[:, H:].T  (cols 0:I)
    bia = wiax + I                    # (1, I)
    total = _round_up(bia + 1, 8)
    return dict(wae=wae, waf=waf, wiah=wiah, misc=misc, wiax=wiax, bia=bia,
                total=total)


# ----------------------------------------------------------------------------
# Pallas kernel
# ----------------------------------------------------------------------------
def _forecast_kernel(x_ref, wslab_ref, aslab_ref, out_ref, ctx_ref):
    # x_ref:     (S*B, I)   step-major flattened input (row = t*B + b)
    # wslab_ref: (WR, 4H)   stacked LSTM weight/bias slab (see _wslab_layout)
    # aslab_ref: (AR, H)    attention / small-weight slab (see _aslab_layout)
    # out_ref:   (B, N)     forecasts
    # ctx_ref:   (B, H)     temporal-attention context
    f32 = jnp.float32
    B, N = out_ref.shape
    H = ctx_ref.shape[1]
    SB, I = x_ref.shape
    S = SB // B
    wl = _wslab_layout(I, H)
    al = _aslab_layout(I, H)

    # Zero-cost ref views on the big (.., 4H) weight sections; actual loads
    # happen at each use site inside the unrolled loops (keeps vreg pressure
    # low; reloads are hidden under the dependent MXU chain).
    wE0 = wslab_ref.at[wl["enc0"]:wl["enc0"] + I + H, :]       # [wih0.T; whh0.T]
    wE1 = wslab_ref.at[wl["enc1"]:wl["enc1"] + 2 * H, :]       # [wih1.T; whh1.T]
    wD0 = wslab_ref.at[wl["dec0"]:wl["dec0"] + 2 * H, :]       # [fold;   dwhh0.T]
    wD0h = wslab_ref.at[wl["dec0"] + H:wl["dec0"] + 2 * H, :]  # dwhh0.T only
    wD1 = wslab_ref.at[wl["dec1"]:wl["dec1"] + 2 * H, :]       # [dwih1.T; dwhh1.T]

    misc = wslab_ref[wl["misc"]:wl["misc"] + 8, :]             # one (8, 4H) vreg block
    dwih0_row = misc[0:1, :]
    b_enc0 = misc[1:2, :]
    b_enc1 = misc[2:3, :]
    b_dec0 = misc[3:4, :]
    b_dec0f = misc[4:5, :]           # b_dec0 + bfc * dwih0_row  (fc fold)
    b_dec1 = misc[5:6, :]

    wae = aslab_ref[al["wae"]:al["wae"] + H, :]                # (H, H)
    waf = aslab_ref[al["waf"]:al["waf"] + H, :]                # (H, H)
    wia_h = aslab_ref[al["wiah"]:al["wiah"] + H, :][:, 0:I]    # (H, I)
    amisc = aslab_ref[al["misc"]:al["misc"] + 8, :]            # (8, H)
    battn = amisc[0:1, :]
    v_row = amisc[1:2, :]
    wfc_row = amisc[2:3, :]
    bfc = amisc[3:4, 0:1]                                      # (1, 1)
    wia_x = aslab_ref[al["wiax"]:al["wiax"] + I, :][:, 0:I]    # (I, I)
    bia = aslab_ref[al["bia"]:al["bia"] + 1, :][:, 0:I]        # (1, I)

    # Fused LSTM cell: one matmul on [x, h]; 2 full-width EUP pushes per cell
    # (sigmoid/tanh over the whole (B,4H) vreg instead of 4 masked slices).
    def lstm_from_gates(gates, c):
        sg = jax.nn.sigmoid(gates)
        th = jnp.tanh(gates)
        c_new = sg[:, H:2 * H] * c + sg[:, 0:H] * th[:, 2 * H:3 * H]
        h_new = sg[:, 3 * H:4 * H] * jnp.tanh(c_new)
        return h_new, c_new

    def lstm_cell(inp_h, w_view, b, c):
        gates = jnp.dot(inp_h, w_view[...], preferred_element_type=f32) + b
        return lstm_from_gates(gates, c)

    x2d = x_ref[...].astype(f32)                               # (S*B, I)
    # state-independent feature projection, hoisted out of the recurrence
    xp = jnp.dot(x2d, wia_x, preferred_element_type=f32) + bia  # (S*B, I)

    zeros = jnp.zeros((B, H), f32)
    h0, c0, h1, c1 = zeros, zeros, zeros, zeros

    # ---------------- encoder: per-step feature attention + 2 fused cells ----
    enc_hs = []
    for t in range(S):
        xt = x2d[t * B:(t + 1) * B, :]
        e = jnp.dot(h1, wia_h, preferred_element_type=f32) + xp[t * B:(t + 1) * B, :]
        e = e - jnp.max(e, axis=1, keepdims=True)
        a = jnp.exp(e)
        a = a / jnp.sum(a, axis=1, keepdims=True)
        xt_att = a * xt
        h0, c0 = lstm_cell(jnp.concatenate([xt_att, h0], axis=1), wE0, b_enc0, c0)
        h1, c1 = lstm_cell(jnp.concatenate([h0, h1], axis=1), wE1, b_enc1, c1)
        enc_hs.append(h1)

    # ---------------- temporal attention (batched; off the decoder chain) ----
    # (computed for parity with the torch forward; `context` never feeds the
    #  decoder there either)
    enc_all = jnp.concatenate(enc_hs, axis=0)                  # (S*B, H) step-major
    fproj = jnp.dot(h1, waf, preferred_element_type=f32) + battn
    energy = jnp.tanh(jnp.dot(enc_all, wae, preferred_element_type=f32)
                      + jnp.concatenate([fproj] * S, axis=0))
    scores = []
    for t in range(S):
        en_t = energy[t * B:(t + 1) * B, :]
        scores.append(jnp.sum(en_t * v_row, axis=1, keepdims=True))   # VPU + reduce
    sc = jnp.concatenate(scores, axis=1)                       # (B, S)
    sc = sc - jnp.max(sc, axis=1, keepdims=True)
    w = jnp.exp(sc)
    w = w / jnp.sum(w, axis=1, keepdims=True)
    ctx = jnp.zeros((B, H), f32)
    for t in range(S):
        ctx = ctx + w[:, t:t + 1] * enc_hs[t]
    ctx_ref[...] = ctx

    # ---------------- autoregressive 2-layer decoder --------------------------
    # fc_decoder is folded into layer-0's input weight, so `pred` is off the
    # recurrence path (only needed for the output).
    dh0, dc0, dh1, dc1 = h0, c0, h1, c1
    dec_in0 = x2d[(S - 1) * B:S * B, 0:1]                      # (B,1) last-step feat 0
    gx0_first = dec_in0 * dwih0_row + b_dec0                   # state-independent
    preds = []
    for t in range(N):
        if t == 0:
            gates0 = gx0_first + jnp.dot(dh0, wD0h[...], preferred_element_type=f32)
        else:
            gin0 = jnp.concatenate([dh1, dh0], axis=1)         # [prev dh1, prev dh0]
            gates0 = jnp.dot(gin0, wD0[...], preferred_element_type=f32) + b_dec0f
        dh0, dc0 = lstm_from_gates(gates0, dc0)
        dh1, dc1 = lstm_cell(jnp.concatenate([dh0, dh1], axis=1), wD1, b_dec1, dc1)
        preds.append(jnp.sum(dh1 * wfc_row, axis=1, keepdims=True) + bfc)
    out_ref[...] = jnp.concatenate(preds, axis=1)              # (B, N)


# ----------------------------------------------------------------------------
# Parameter construction (deterministic, PyTorch-style uniform init)
# ----------------------------------------------------------------------------
def init_params(key, input_size, hidden_size):
    H, I = hidden_size, input_size

    def uni(k, shape, bound):
        return jax.random.uniform(k, shape, jnp.float32, -bound, bound)

    keys = jax.random.split(key, 24)
    kIA = 1.0 / math.sqrt(H + I)
    kH = 1.0 / math.sqrt(H)
    kA = 1.0 / math.sqrt(2 * H)
    p = {
        # input_attn: Linear(H+I -> I)
        "wia": uni(keys[0], (I, H + I), kIA), "bia": uni(keys[1], (I,), kIA),
        # encoder LSTMCells
        "wih0": uni(keys[2], (4 * H, I), kH), "whh0": uni(keys[3], (4 * H, H), kH),
        "bih0": uni(keys[4], (4 * H,), kH), "bhh0": uni(keys[5], (4 * H,), kH),
        "wih1": uni(keys[6], (4 * H, H), kH), "whh1": uni(keys[7], (4 * H, H), kH),
        "bih1": uni(keys[8], (4 * H,), kH), "bhh1": uni(keys[9], (4 * H,), kH),
        # temporal attention
        "wattn": uni(keys[10], (H, 2 * H), kA), "battn": uni(keys[11], (H,), kA),
        "v": uni(keys[12], (1, H), kH),
        # decoder nn.LSTM (input_size=1, 2 layers)
        "dwih0": uni(keys[13], (4 * H, 1), kH), "dwhh0": uni(keys[14], (4 * H, H), kH),
        "dbih0": uni(keys[15], (4 * H,), kH), "dbhh0": uni(keys[16], (4 * H,), kH),
        "dwih1": uni(keys[17], (4 * H, H), kH), "dwhh1": uni(keys[18], (4 * H, H), kH),
        "dbih1": uni(keys[19], (4 * H,), kH), "dbhh1": uni(keys[20], (4 * H,), kH),
        # fc_decoder: Linear(H -> 1)
        "wfc": uni(keys[21], (1, H), kH), "bfc": uni(keys[22], (1,), kH),
    }
    return p


# ----------------------------------------------------------------------------
# Wrapper: pack parameters into two lane-aligned slabs and call the kernel
# ----------------------------------------------------------------------------
def pack_params(p, input_size, hidden_size):
    I, H = input_size, hidden_size
    G = 4 * H
    f32 = jnp.float32
    wl = _wslab_layout(I, H)
    al = _aslab_layout(I, H)

    wslab = jnp.zeros((wl["total"], G), f32)
    wslab = wslab.at[wl["enc0"]:wl["enc0"] + I, :].set(p["wih0"].T)
    wslab = wslab.at[wl["enc0"] + I:wl["enc0"] + I + H, :].set(p["whh0"].T)
    wslab = wslab.at[wl["enc1"]:wl["enc1"] + H, :].set(p["wih1"].T)
    wslab = wslab.at[wl["enc1"] + H:wl["enc1"] + 2 * H, :].set(p["whh1"].T)
    wfold = p["wfc"].T @ p["dwih0"].T                          # (H, 4H) fc fold
    wslab = wslab.at[wl["dec0"]:wl["dec0"] + H, :].set(wfold)
    wslab = wslab.at[wl["dec0"] + H:wl["dec0"] + 2 * H, :].set(p["dwhh0"].T)
    wslab = wslab.at[wl["dec1"]:wl["dec1"] + H, :].set(p["dwih1"].T)
    wslab = wslab.at[wl["dec1"] + H:wl["dec1"] + 2 * H, :].set(p["dwhh1"].T)
    m = wl["misc"]
    dwih0_row = p["dwih0"][:, 0]                               # (4H,)
    b_dec0 = p["dbih0"] + p["dbhh0"]
    wslab = wslab.at[m + 0, :].set(dwih0_row)
    wslab = wslab.at[m + 1, :].set(p["bih0"] + p["bhh0"])
    wslab = wslab.at[m + 2, :].set(p["bih1"] + p["bhh1"])
    wslab = wslab.at[m + 3, :].set(b_dec0)
    wslab = wslab.at[m + 4, :].set(b_dec0 + p["bfc"][0] * dwih0_row)
    wslab = wslab.at[m + 5, :].set(p["dbih1"] + p["dbhh1"])

    aslab = jnp.zeros((al["total"], H), f32)
    aslab = aslab.at[al["wae"]:al["wae"] + H, :].set(p["wattn"][:, :H].T)
    aslab = aslab.at[al["waf"]:al["waf"] + H, :].set(p["wattn"][:, H:].T)
    aslab = aslab.at[al["wiah"]:al["wiah"] + H, 0:I].set(p["wia"][:, :H].T)
    am = al["misc"]
    aslab = aslab.at[am + 0, :].set(p["battn"])
    aslab = aslab.at[am + 1, :].set(p["v"][0])
    aslab = aslab.at[am + 2, :].set(p["wfc"][0])
    aslab = aslab.at[am + 3, :].set(jnp.full((H,), p["bfc"][0], f32))
    aslab = aslab.at[al["wiax"]:al["wiax"] + I, 0:I].set(p["wia"][:, H:].T)
    aslab = aslab.at[al["bia"], 0:I].set(p["bia"])
    return wslab, aslab


def forecast_forward(x, p, n_forecasts=N_FORECASTS):
    B, S, I = x.shape
    H = p["whh0"].shape[1]
    wslab, aslab = pack_params(p, I, H)
    x_sb = jnp.transpose(x, (1, 0, 2)).reshape(S * B, I)       # step-major rows
    vmem = pl.BlockSpec(memory_space=pltpu.MemorySpace.VMEM)
    out, ctx = pl.pallas_call(
        _forecast_kernel,
        out_shape=(
            jax.ShapeDtypeStruct((B, n_forecasts), jnp.float32),
            jax.ShapeDtypeStruct((B, H), jnp.float32),
        ),
        in_specs=[vmem, vmem, vmem],
        out_specs=(vmem, vmem),
    )(x_sb, wslab, aslab)
    return out[:, :, None], ctx                                # (B, n_forecasts, 1), (B, H)


# ----------------------------------------------------------------------------
# Pure-JAX reference (mirrors the torch forward, inference mode / y=None)
# ----------------------------------------------------------------------------
def reference_forward(x, p, n_forecasts=N_FORECASTS):
    B, S, I = x.shape
    H = p["whh0"].shape[1]

    def cell(xin, h, c, wih, whh, bih, bhh):
        g = xin @ wih.T + bih + h @ whh.T + bhh
        i = jax.nn.sigmoid(g[:, :H]); f = jax.nn.sigmoid(g[:, H:2 * H])
        gg = jnp.tanh(g[:, 2 * H:3 * H]); o = jax.nn.sigmoid(g[:, 3 * H:])
        c = f * c + i * gg
        return o * jnp.tanh(c), c

    z = jnp.zeros((B, H), jnp.float32)
    h0, c0, h1, c1 = z, z, z, z
    enc = []
    for t in range(S):
        xt = x[:, t, :]
        e = jnp.concatenate([h1, xt], axis=1) @ p["wia"].T + p["bia"]
        xt_att = jax.nn.softmax(e, axis=1) * xt
        h0, c0 = cell(xt_att, h0, c0, p["wih0"], p["whh0"], p["bih0"], p["bhh0"])
        h1, c1 = cell(h0, h1, c1, p["wih1"], p["whh1"], p["bih1"], p["bhh1"])
        enc.append(h1)
    enc_out = jnp.stack(enc, axis=1)              # (B, S, H)
    final_exp = jnp.broadcast_to(h1[:, None, :], (B, S, H))
    energy = jnp.tanh(jnp.concatenate([enc_out, final_exp], axis=2) @ p["wattn"].T
                      + p["battn"])
    scores = (energy @ p["v"].T)[:, :, 0]
    weights = jax.nn.softmax(scores, axis=1)
    context = jnp.einsum("bs,bsh->bh", weights, enc_out)

    dh0, dc0, dh1, dc1 = h0, c0, h1, c1
    dec_in = x[:, S - 1, 0:1]
    preds = []
    for _ in range(n_forecasts):
        dh0, dc0 = cell(dec_in, dh0, dc0, p["dwih0"], p["dwhh0"], p["dbih0"], p["dbhh0"])
        dh1, dc1 = cell(dh0, dh1, dc1, p["dwih1"], p["dwhh1"], p["dbih1"], p["dbhh1"])
        pred = dh1 @ p["wfc"].T + p["bfc"]
        preds.append(pred)
        dec_in = pred
    return jnp.stack(preds, axis=1), context      # (B, n_forecasts, 1), (B, H)


if __name__ == "__main__":
    key = jax.random.PRNGKey(0)
    kx, kp = jax.random.split(key)
    x = jax.random.normal(kx, (BATCH, SEQ_LEN, INPUT_SIZE), jnp.float32)
    params = init_params(kp, INPUT_SIZE, HIDDEN)

    out, ctx = forecast_forward(x, params)
    out = jax.block_until_ready(out)
    ctx = jax.block_until_ready(ctx)

    ref_out, ref_ctx = reference_forward(x, params)
    assert out.shape == (BATCH, N_FORECASTS, 1)
    assert jnp.allclose(out, ref_out, rtol=1e-2, atol=1e-2), "forecast mismatch"
    assert jnp.allclose(ctx, ref_ctx, rtol=1e-2, atol=1e-2), "context mismatch"

    print("KERNEL_OK")
</pallas_src>

<mosaic_0001>
module attributes {stable_mosaic.version = 11 : i64} {
  func.func @_forecast_kernel(%arg0: memref<16x4xf32, #tpu.memory_space<vmem>>, %arg1: memref<240x128xf32, #tpu.memory_space<vmem>>, %arg2: memref<112x32xf32, #tpu.memory_space<vmem>>, %arg3: memref<2x5xf32, #tpu.memory_space<vmem>>, %arg4: memref<2x32xf32, #tpu.memory_space<vmem>>) attributes {dimension_semantics = [], scalar_prefetch = 0 : i64, scratch_operands = 0 : i64, tpu.core_type = #tpu.core_type<tc>} {
    %c232 = arith.constant 232 : index
    %c0 = arith.constant 0 : index
    %0 = vector.load %arg1[%c232, %c0] : memref<240x128xf32, #tpu.memory_space<vmem>>, vector<8x128xf32>
    %1 = vector.extract_strided_slice %0 {offsets = [0, 0], sizes = [1, 128], strides = [1, 1]} : vector<8x128xf32> to vector<1x128xf32>
    %2 = vector.extract_strided_slice %0 {offsets = [1, 0], sizes = [1, 128], strides = [1, 1]} : vector<8x128xf32> to vector<1x128xf32>
    %3 = vector.extract_strided_slice %0 {offsets = [2, 0], sizes = [1, 128], strides = [1, 1]} : vector<8x128xf32> to vector<1x128xf32>
    %4 = vector.extract_strided_slice %0 {offsets = [3, 0], sizes = [1, 128], strides = [1, 1]} : vector<8x128xf32> to vector<1x128xf32>
    %5 = vector.extract_strided_slice %0 {offsets = [4, 0], sizes = [1, 128], strides = [1, 1]} : vector<8x128xf32> to vector<1x128xf32>
    %6 = vector.extract_strided_slice %0 {offsets = [5, 0], sizes = [1, 128], strides = [1, 1]} : vector<8x128xf32> to vector<1x128xf32>
    %c0_0 = arith.constant 0 : index
    %c0_1 = arith.constant 0 : index
    %7 = vector.load %arg2[%c0_0, %c0_1] : memref<112x32xf32, #tpu.memory_space<vmem>>, vector<32x32xf32>
    %c32 = arith.constant 32 : index
    %c0_2 = arith.constant 0 : index
    %8 = vector.load %arg2[%c32, %c0_2] : memref<112x32xf32, #tpu.memory_space<vmem>>, vector<32x32xf32>
    %c64 = arith.constant 64 : index
    %c0_3 = arith.constant 0 : index
    %9 = vector.load %arg2[%c64, %c0_3] : memref<112x32xf32, #tpu.memory_space<vmem>>, vector<32x32xf32>
    %10 = vector.extract_strided_slice %9 {offsets = [0, 0], sizes = [32, 4], strides = [1, 1]} : vector<32x32xf32> to vector<32x4xf32>
    %c96 = arith.constant 96 : index
    %c0_4 = arith.constant 0 : index
    %11 = vector.load %arg2[%c96, %c0_4] : memref<112x32xf32, #tpu.memory_space<vmem>>, vector<8x32xf32>
    %12 = vector.extract_strided_slice %11 {offsets = [0, 0], sizes = [1, 32], strides = [1, 1]} : vector<8x32xf32> to vector<1x32xf32>
    %13 = vector.extract_strided_slice %11 {offsets = [1, 0], sizes = [1, 32], strides = [1, 1]} : vector<8x32xf32> to vector<1x32xf32>
    %14 = vector.extract_strided_slice %11 {offsets = [2, 0], sizes = [1, 32], strides = [1, 1]} : vector<8x32xf32> to vector<1x32xf32>
    %15 = vector.extract_strided_slice %11 {offsets = [3, 0], sizes = [1, 1], strides = [1, 1]} : vector<8x32xf32> to vector<1x1xf32>
    %c104 = arith.constant 104 : index
    %c0_5 = arith.constant 0 : index
    %16 = vector.load %arg2[%c104, %c0_5] : memref<112x32xf32, #tpu.memory_space<vmem>>, vector<4x32xf32>
    %17 = vector.extract_strided_slice %16 {offsets = [0, 0], sizes = [4, 4], strides = [1, 1]} : vector<4x32xf32> to vector<4x4xf32>
    %c108 = arith.constant 108 : index
    %c0_6 = arith.constant 0 : index
    %18 = vector.load %arg2[%c108, %c0_6] : memref<112x32xf32, #tpu.memory_space<vmem>>, vector<1x32xf32>
    %19 = vector.extract_strided_slice %18 {offsets = [0, 0], sizes = [1, 4], strides = [1, 1]} : vector<1x32xf32> to vector<1x4xf32>
    %c0_7 = arith.constant 0 : index
    %c0_8 = arith.constant 0 : index
    %20 = vector.load %arg0[%c0_7, %c0_8] : memref<16x4xf32, #tpu.memory_space<vmem>>, vector<16x4xf32>
    %cst = arith.constant dense<0.000000e+00> : vector<16x4xf32>
    %21 = tpu.matmul %20, %17, %cst {dimension_numbers = #tpu.dot_dimension_numbers<[1], [0], [0], [1], [0, 0, 1, 1], [], []>} : vector<16x4xf32>, vector<4x4xf32>, vector<16x4xf32> -> vector<16x4xf32>
    %22 = vector.broadcast %19 : vector<1x4xf32> to vector<16x4xf32>
    %23 = arith.addf %21, %22 : vector<16x4xf32>
    %cst_9 = arith.constant 0.000000e+00 : f32
    %24 = vector.broadcast %cst_9 : f32 to vector<2x32xf32>
    %25 = vector.extract_strided_slice %20 {offsets = [0, 0], sizes = [2, 4], strides = [1, 1]} : vector<16x4xf32> to vector<2x4xf32>
    %cst_10 = arith.constant dense<0.000000e+00> : vector<2x4xf32>
    %26 = tpu.matmul %24, %10, %cst_10 {dimension_numbers = #tpu.dot_dimension_numbers<[1], [0], [0], [1], [0, 0, 1, 1], [], []>} : vector<2x32xf32>, vector<32x4xf32>, vector<2x4xf32> -> vector<2x4xf32>
    %27 = vector.extract_strided_slice %23 {offsets = [0, 0], sizes = [2, 4], strides = [1, 1]} : vector<16x4xf32> to vector<2x4xf32>
    %28 = arith.addf %26, %27 : vector<2x4xf32>
    %cst_11 = arith.constant dense<0xFF800000> : vector<2xf32>
    %29 = vector.multi_reduction <maximumf>, %28, %cst_11 [1] : vector<2x4xf32> to vector<2xf32>
    %30 = vector.shape_cast %29 : vector<2xf32> to vector<2x1xf32>
    %31 = vector.broadcast %30 : vector<2x1xf32> to vector<2x4xf32>
    %32 = arith.subf %28, %31 : vector<2x4xf32>
    %33 = math.exp %32 : vector<2x4xf32>
    %cst_12 = arith.constant dense<0.000000e+00> : vector<2xf32>
    %34 = vector.multi_reduction <add>, %33, %cst_12 [1] : vector<2x4xf32> to vector<2xf32>
    %35 = vector.shape_cast %34 : vector<2xf32> to vector<2x1xf32>
    %36 = vector.broadcast %35 : vector<2x1xf32> to vector<2x4xf32>
    %37 = arith.divf %33, %36 : vector<2x4xf32>
    %38 = arith.mulf %37, %25 : vector<2x4xf32>
    %39 = tpu.concatenate %38, %24 in 1 : vector<2x4xf32>, vector<2x32xf32> -> vector<2x36xf32>
    %c0_13 = arith.constant 0 : index
    %c0_14 = arith.constant 0 : index
    %40 = vector.load %arg1[%c0_13, %c0_14] : memref<240x128xf32, #tpu.memory_space<vmem>>, vector<36x128xf32>
    %cst_15 = arith.constant dense<0.000000e+00> : vector<2x128xf32>
    %41 = tpu.matmul %39, %40, %cst_15 {dimension_numbers = #tpu.dot_dimension_numbers<[1], [0], [0], [1], [0, 0, 1, 1], [], []>} : vector<2x36xf32>, vector<36x128xf32>, vector<2x128xf32> -> vector<2x128xf32>
    %42 = vector.broadcast %2 : vector<1x128xf32> to vector<2x128xf32>
    %43 = arith.addf %41, %42 : vector<2x128xf32>
    %44 = arith.negf %43 : vector<2x128xf32>
    %45 = math.exp %44 : vector<2x128xf32>
    %cst_16 = arith.constant 1.000000e+00 : f32
    %46 = vector.broadcast %cst_16 : f32 to vector<2x128xf32>
    %47 = arith.addf %46, %45 : vector<2x128xf32>
    %48 = arith.divf %46, %47 : vector<2x128xf32>
    %49 = math.tanh %43 : vector<2x128xf32>
    %50 = vector.extract_strided_slice %48 {offsets = [0, 32], sizes = [2, 32], strides = [1, 1]} : vector<2x128xf32> to vector<2x32xf32>
    %51 = arith.mulf %50, %24 : vector<2x32xf32>
    %52 = vector.extract_strided_slice %48 {offsets = [0, 0], sizes = [2, 32], strides = [1, 1]} : vector<2x128xf32> to vector<2x32xf32>
    %53 = vector.extract_strided_slice %49 {offsets = [0, 64], sizes = [2, 32], strides = [1, 1]} : vector<2x128xf32> to vector<2x32xf32>
    %54 = arith.mulf %52, %53 : vector<2x32xf32>
    %55 = arith.addf %51, %54 : vector<2x32xf32>
    %56 = vector.extract_strided_slice %48 {offsets = [0, 96], sizes = [2, 32], strides = [1, 1]} : vector<2x128xf32> to vector<2x32xf32>
    %57 = math.tanh %55 : vector<2x32xf32>
    %58 = arith.mulf %56, %57 : vector<2x32xf32>
    %59 = tpu.concatenate %58, %24 in 1 : vector<2x32xf32>, vector<2x32xf32> -> vector<2x64xf32>
    %c40 = arith.constant 40 : index
    %c0_17 = arith.constant 0 : index
    %60 = vector.load %arg1[%c40, %c0_17] : memref<240x128xf32, #tpu.memory_space<vmem>>, vector<64x128xf32>
    %cst_18 = arith.constant dense<0.000000e+00> : vector<2x128xf32>
    %61 = tpu.matmul %59, %60, %cst_18 {dimension_numbers = #tpu.dot_dimension_numbers<[1], [0], [0], [1], [0, 0, 1, 1], [], []>} : vector<2x64xf32>, vector<64x128xf32>, vector<2x128xf32> -> vector<2x128xf32>
    %62 = vector.broadcast %3 : vector<1x128xf32> to vector<2x128xf32>
    %63 = arith.addf %61, %62 : vector<2x128xf32>
    %64 = arith.negf %63 : vector<2x128xf32>
    %65 = math.exp %64 : vector<2x128xf32>
    %cst_19 = arith.constant 1.000000e+00 : f32
    %66 = vector.broadcast %cst_19 : f32 to vector<2x128xf32>
    %67 = arith.addf %66, %65 : vector<2x128xf32>
    %68 = arith.divf %66, %67 : vector<2x128xf32>
    %69 = math.tanh %63 : vector<2x128xf32>
    %70 = vector.extract_strided_slice %68 {offsets = [0, 32], sizes = [2, 32], strides = [1, 1]} : vector<2x128xf32> to vector<2x32xf32>
    %71 = arith.mulf %70, %24 : vector<2x32xf32>
    %72 = vector.extract_strided_slice %68 {offsets = [0, 0], sizes = [2, 32], strides = [1, 1]} : vector<2x128xf32> to vector<2x32xf32>
    %73 = vector.extract_strided_slice %69 {offsets = [0, 64], sizes = [2, 32], strides = [1, 1]} : vector<2x128xf32> to vector<2x32xf32>
    %74 = arith.mulf %72, %73 : vector<2x32xf32>
    %75 = arith.addf %71, %74 : vector<2x32xf32>
    %76 = vector.extract_strided_slice %68 {offsets = [0, 96], sizes = [2, 32], strides = [1, 1]} : vector<2x128xf32> to vector<2x32xf32>
    %77 = math.tanh %75 : vector<2x32xf32>
    %78 = arith.mulf %76, %77 : vector<2x32xf32>
    %79 = vector.extract_strided_slice %20 {offsets = [2, 0], sizes = [2, 4], strides = [1, 1]} : vector<16x4xf32> to vector<2x4xf32>
    %cst_20 = arith.constant dense<0.000000e+00> : vector<2x4xf32>
    %80 = tpu.matmul %78, %10, %cst_20 {dimension_numbers = #tpu.dot_dimension_numbers<[1], [0], [0], [1], [0, 0, 1, 1], [], []>} : vector<2x32xf32>, vector<32x4xf32>, vector<2x4xf32> -> vector<2x4xf32>
    %81 = vector.extract_strided_slice %23 {offsets = [2, 0], sizes = [2, 4], strides = [1, 1]} : vector<16x4xf32> to vector<2x4xf32>
    %82 = arith.addf %80, %81 : vector<2x4xf32>
    %cst_21 = arith.constant dense<0xFF800000> : vector<2xf32>
    %83 = vector.multi_reduction <maximumf>, %82, %cst_21 [1] : vector<2x4xf32> to vector<2xf32>
    %84 = vector.shape_cast %83 : vector<2xf32> to vector<2x1xf32>
    %85 = vector.broadcast %84 : vector<2x1xf32> to vector<2x4xf32>
    %86 = arith.subf %82, %85 : vector<2x4xf32>
    %87 = math.exp %86 : vector<2x4xf32>
    %cst_22 = arith.constant dense<0.000000e+00> : vector<2xf32>
    %88 = vector.multi_reduction <add>, %87, %cst_22 [1] : vector<2x4xf32> to vector<2xf32>
    %89 = vector.shape_cast %88 : vector<2xf32> to vector<2x1xf32>
    %90 = vector.broadcast %89 : vector<2x1xf32> to vector<2x4xf32>
    %91 = arith.divf %87, %90 : vector<2x4xf32>
    %92 = arith.mulf %91, %79 : vector<2x4xf32>
    %93 = tpu.concatenate %92, %58 in 1 : vector<2x4xf32>, vector<2x32xf32> -> vector<2x36xf32>
    %c0_23 = arith.constant 0 : index
    %c0_24 = arith.constant 0 : index
    %94 = vector.load %arg1[%c0_23, %c0_24] : memref<240x128xf32, #tpu.memory_space<vmem>>, vector<36x128xf32>
    %cst_25 = arith.constant dense<0.000000e+00> : vector<2x128xf32>
    %95 = tpu.matmul %93, %94, %cst_25 {dimension_numbers = #tpu.dot_dimension_numbers<[1], [0], [0], [1], [0, 0, 1, 1], [], []>} : vector<2x36xf32>, vector<36x128xf32>, vector<2x128xf32> -> vector<2x128xf32>
    %96 = vector.broadcast %2 : vector<1x128xf32> to vector<2x128xf32>
    %97 = arith.addf %95, %96 : vector<2x128xf32>
    %98 = arith.negf %97 : vector<2x128xf32>
    %99 = math.exp %98 : vector<2x128xf32>
    %cst_26 = arith.constant 1.000000e+00 : f32
    %100 = vector.broadcast %cst_26 : f32 to vector<2x128xf32>
    %101 = arith.addf %100, %99 : vector<2x128xf32>
    %102 = arith.divf %100, %101 : vector<2x128xf32>
    %103 = math.tanh %97 : vector<2x128xf32>
    %104 = vector.extract_strided_slice %102 {offsets = [0, 32], sizes = [2, 32], strides = [1, 1]} : vector<2x128xf32> to vector<2x32xf32>
    %105 = arith.mulf %104, %55 : vector<2x32xf32>
    %106 = vector.extract_strided_slice %102 {offsets = [0, 0], sizes = [2, 32], strides = [1, 1]} : vector<2x128xf32> to vector<2x32xf32>
    %107 = vector.extract_strided_slice %103 {offsets = [0, 64], sizes = [2, 32], strides = [1, 1]} : vector<2x128xf32> to vector<2x32xf32>
    %108 = arith.mulf %106, %107 : vector<2x32xf32>
    %109 = arith.addf %105, %108 : vector<2x32xf32>
    %110 = vector.extract_strided_slice %102 {offsets = [0, 96], sizes = [2, 32], strides = [1, 1]} : vector<2x128xf32> to vector<2x32xf32>
    %111 = math.tanh %109 : vector<2x32xf32>
    %112 = arith.mulf %110, %111 : vector<2x32xf32>
    %113 = tpu.concatenate %112, %78 in 1 : vector<2x32xf32>, vector<2x32xf32> -> vector<2x64xf32>
    %c40_27 = arith.constant 40 : index
    %c0_28 = arith.constant 0 : index
    %114 = vector.load %arg1[%c40_27, %c0_28] : memref<240x128xf32, #tpu.memory_space<vmem>>, vector<64x128xf32>
    %cst_29 = arith.constant dense<0.000000e+00> : vector<2x128xf32>
    %115 = tpu.matmul %113, %114, %cst_29 {dimension_numbers = #tpu.dot_dimension_numbers<[1], [0], [0], [1], [0, 0, 1, 1], [], []>} : vector<2x64xf32>, vector<64x128xf32>, vector<2x128xf32> -> vector<2x128xf32>
    %116 = vector.broadcast %3 : vector<1x128xf32> to vector<2x128xf32>
    %117 = arith.addf %115, %116 : vector<2x128xf32>
    %118 = arith.negf %117 : vector<2x128xf32>
    %119 = math.exp %118 : vector<2x128xf32>
    %cst_30 = arith.constant 1.000000e+00 : f32
    %120 = vector.broadcast %cst_30 : f32 to vector<2x128xf32>
    %121 = arith.addf %120, %119 : vector<2x128xf32>
    %122 = arith.divf %120, %121 : vector<2x128xf32>
    %123 = math.tanh %117 : vector<2x128xf32>
    %124 = vector.extract_strided_slice %122 {offsets = [0, 32], sizes = [2, 32], strides = [1, 1]} : vector<2x128xf32> to vector<2x32xf32>
    %125 = arith.mulf %124, %75 : vector<2x32xf32>
    %126 = vector.extract_strided_slice %122 {offsets = [0, 0], sizes = [2, 32], strides = [1, 1]} : vector<2x128xf32> to vector<2x32xf32>
    %127 = vector.extract_strided_slice %123 {offsets = [0, 64], sizes = [2, 32], strides = [1, 1]} : vector<2x128xf32> to vector<2x32xf32>
    %128 = arith.mulf %126, %127 : vector<2x32xf32>
    %129 = arith.addf %125, %128 : vector<2x32xf32>
    %130 = vector.extract_strided_slice %122 {offsets = [0, 96], sizes = [2, 32], strides = [1, 1]} : vector<2x128xf32> to vector<2x32xf32>
    %131 = math.tanh %129 : vector<2x32xf32>
    %132 = arith.mulf %130, %131 : vector<2x32xf32>
    %133 = vector.extract_strided_slice %20 {offsets = [4, 0], sizes = [2, 4], strides = [1, 1]} : vector<16x4xf32> to vector<2x4xf32>
    %cst_31 = arith.constant dense<0.000000e+00> : vector<2x4xf32>
    %134 = tpu.matmul %132, %10, %cst_31 {dimension_numbers = #tpu.dot_dimension_numbers<[1], [0], [0], [1], [0, 0, 1, 1], [], []>} : vector<2x32xf32>, vector<32x4xf32>, vector<2x4xf32> -> vector<2x4xf32>
    %135 = vector.extract_strided_slice %23 {offsets = [4, 0], sizes = [2, 4], strides = [1, 1]} : vector<16x4xf32> to vector<2x4xf32>
    %136 = arith.addf %134, %135 : vector<2x4xf32>
    %cst_32 = arith.constant dense<0xFF800000> : vector<2xf32>
    %137 = vector.multi_reduction <maximumf>, %136, %cst_32 [1] : vector<2x4xf32> to vector<2xf32>
    %138 = vector.shape_cast %137 : vector<2xf32> to vector<2x1xf32>
    %139 = vector.broadcast %138 : vector<2x1xf32> to vector<2x4xf32>
    %140 = arith.subf %136, %139 : vector<2x4xf32>
    %141 = math.exp %140 : vector<2x4xf32>
    %cst_33 = arith.constant dense<0.000000e+00> : vector<2xf32>
    %142 = vector.multi_reduction <add>, %141, %cst_33 [1] : vector<2x4xf32> to vector<2xf32>
    %143 = vector.shape_cast %142 : vector<2xf32> to vector<2x1xf32>
    %144 = vector.broadcast %143 : vector<2x1xf32> to vector<2x4xf32>
    %145 = arith.divf %141, %144 : vector<2x4xf32>
    %146 = arith.mulf %145, %133 : vector<2x4xf32>
    %147 = tpu.concatenate %146, %112 in 1 : vector<2x4xf32>, vector<2x32xf32> -> vector<2x36xf32>
    %c0_34 = arith.constant 0 : index
    %c0_35 = arith.constant 0 : index
    %148 = vector.load %arg1[%c0_34, %c0_35] : memref<240x128xf32, #tpu.memory_space<vmem>>, vector<36x128xf32>
    %cst_36 = arith.constant dense<0.000000e+00> : vector<2x128xf32>
    %149 = tpu.matmul %147, %148, %cst_36 {dimension_numbers = #tpu.dot_dimension_numbers<[1], [0], [0], [1], [0, 0, 1, 1], [], []>} : vector<2x36xf32>, vector<36x128xf32>, vector<2x128xf32> -> vector<2x128xf32>
    %150 = vector.broadcast %2 : vector<1x128xf32> to vector<2x128xf32>
    %151 = arith.addf %149, %150 : vector<2x128xf32>
    %152 = arith.negf %151 : vector<2x128xf32>
    %153 = math.exp %152 : vector<2x128xf32>
    %cst_37 = arith.constant 1.000000e+00 : f32
    %154 = vector.broadcast %cst_37 : f32 to vector<2x128xf32>
    %155 = arith.addf %154, %153 : vector<2x128xf32>
    %156 = arith.divf %154, %155 : vector<2x128xf32>
    %157 = math.tanh %151 : vector<2x128xf32>
    %158 = vector.extract_strided_slice %156 {offsets = [0, 32], sizes = [2, 32], strides = [1, 1]} : vector<2x128xf32> to vector<2x32xf32>
    %159 = arith.mulf %158, %109 : vector<2x32xf32>
    %160 = vector.extract_strided_slice %156 {offsets = [0, 0], sizes = [2, 32], strides = [1, 1]} : vector<2x128xf32> to vector<2x32xf32>
    %161 = vector.extract_strided_slice %157 {offsets = [0, 64], sizes = [2, 32], strides = [1, 1]} : vector<2x128xf32> to vector<2x32xf32>
    %162 = arith.mulf %160, %161 : vector<2x32xf32>
    %163 = arith.addf %159, %162 : vector<2x32xf32>
    %164 = vector.extract_strided_slice %156 {offsets = [0, 96], sizes = [2, 32], strides = [1, 1]} : vector<2x128xf32> to vector<2x32xf32>
    %165 = math.tanh %163 : vector<2x32xf32>
    %166 = arith.mulf %164, %165 : vector<2x32xf32>
    %167 = tpu.concatenate %166, %132 in 1 : vector<2x32xf32>, vector<2x32xf32> -> vector<2x64xf32>
    %c40_38 = arith.constant 40 : index
    %c0_39 = arith.constant 0 : index
    %168 = vector.load %arg1[%c40_38, %c0_39] : memref<240x128xf32, #tpu.memory_space<vmem>>, vector<64x128xf32>
    %cst_40 = arith.constant dense<0.000000e+00> : vector<2x128xf32>
    %169 = tpu.matmul %167, %168, %cst_40 {dimension_numbers = #tpu.dot_dimension_numbers<[1], [0], [0], [1], [0, 0, 1, 1], [], []>} : vector<2x64xf32>, vector<64x128xf32>, vector<2x128xf32> -> vector<2x128xf32>
    %170 = vector.broadcast %3 : vector<1x128xf32> to vector<2x128xf32>
    %171 = arith.addf %169, %170 : vector<2x128xf32>
    %172 = arith.negf %171 : vector<2x128xf32>
    %173 = math.exp %172 : vector<2x128xf32>
    %cst_41 = arith.constant 1.000000e+00 : f32
    %174 = vector.broadcast %cst_41 : f32 to vector<2x128xf32>
    %175 = arith.addf %174, %173 : vector<2x128xf32>
    %176 = arith.divf %174, %175 : vector<2x128xf32>
    %177 = math.tanh %171 : vector<2x128xf32>
    %178 = vector.extract_strided_slice %176 {offsets = [0, 32], sizes = [2, 32], strides = [1, 1]} : vector<2x128xf32> to vector<2x32xf32>
    %179 = arith.mulf %178, %129 : vector<2x32xf32>
    %180 = vector.extract_strided_slice %176 {offsets = [0, 0], sizes = [2, 32], strides = [1, 1]} : vector<2x128xf32> to vector<2x32xf32>
    %181 = vector.extract_strided_slice %177 {offsets = [0, 64], sizes = [2, 32], strides = [1, 1]} : vector<2x128xf32> to vector<2x32xf32>
    %182 = arith.mulf %180, %181 : vector<2x32xf32>
    %183 = arith.addf %179, %182 : vector<2x32xf32>
    %184 = vector.extract_strided_slice %176 {offsets = [0, 96], sizes = [2, 32], strides = [1, 1]} : vector<2x128xf32> to vector<2x32xf32>
    %185 = math.tanh %183 : vector<2x32xf32>
    %186 = arith.mulf %184, %185 : vector<2x32xf32>
    %187 = vector.extract_strided_slice %20 {offsets = [6, 0], sizes = [2, 4], strides = [1, 1]} : vector<16x4xf32> to vector<2x4xf32>
    %cst_42 = arith.constant dense<0.000000e+00> : vector<2x4xf32>
    %188 = tpu.matmul %186, %10, %cst_42 {dimension_numbers = #tpu.dot_dimension_numbers<[1], [0], [0], [1], [0, 0, 1, 1], [], []>} : vector<2x32xf32>, vector<32x4xf32>, vector<2x4xf32> -> vector<2x4xf32>
    %189 = vector.extract_strided_slice %23 {offsets = [6, 0], sizes = [2, 4], strides = [1, 1]} : vector<16x4xf32> to vector<2x4xf32>
    %190 = arith.addf %188, %189 : vector<2x4xf32>
    %cst_43 = arith.constant dense<0xFF800000> : vector<2xf32>
    %191 = vector.multi_reduction <maximumf>, %190, %cst_43 [1] : vector<2x4xf32> to vector<2xf32>
    %192 = vector.shape_cast %191 : vector<2xf32> to vector<2x1xf32>
    %193 = vector.broadcast %192 : vector<2x1xf32> to vector<2x4xf32>
    %194 = arith.subf %190, %193 : vector<2x4xf32>
    %195 = math.exp %194 : vector<2x4xf32>
    %cst_44 = arith.constant dense<0.000000e+00> : vector<2xf32>
    %196 = vector.multi_reduction <add>, %195, %cst_44 [1] : vector<2x4xf32> to vector<2xf32>
    %197 = vector.shape_cast %196 : vector<2xf32> to vector<2x1xf32>
    %198 = vector.broadcast %197 : vector<2x1xf32> to vector<2x4xf32>
    %199 = arith.divf %195, %198 : vector<2x4xf32>
    %200 = arith.mulf %199, %187 : vector<2x4xf32>
    %201 = tpu.concatenate %200, %166 in 1 : vector<2x4xf32>, vector<2x32xf32> -> vector<2x36xf32>
    %c0_45 = arith.constant 0 : index
    %c0_46 = arith.constant 0 : index
    %202 = vector.load %arg1[%c0_45, %c0_46] : memref<240x128xf32, #tpu.memory_space<vmem>>, vector<36x128xf32>
    %cst_47 = arith.constant dense<0.000000e+00> : vector<2x128xf32>
    %203 = tpu.matmul %201, %202, %cst_47 {dimension_numbers = #tpu.dot_dimension_numbers<[1], [0], [0], [1], [0, 0, 1, 1], [], []>} : vector<2x36xf32>, vector<36x128xf32>, vector<2x128xf32> -> vector<2x128xf32>
    %204 = vector.broadcast %2 : vector<1x128xf32> to vector<2x128xf32>
    %205 = arith.addf %203, %204 : vector<2x128xf32>
    %206 = arith.negf %205 : vector<2x128xf32>
    %207 = math.exp %206 : vector<2x128xf32>
    %cst_48 = arith.constant 1.000000e+00 : f32
    %208 = vector.broadcast %cst_48 : f32 to vector<2x128xf32>
    %209 = arith.addf %208, %207 : vector<2x128xf32>
    %210 = arith.divf %208, %209 : vector<2x128xf32>
    %211 = math.tanh %205 : vector<2x128xf32>
    %212 = vector.extract_strided_slice %210 {offsets = [0, 32], sizes = [2, 32], strides = [1, 1]} : vector<2x128xf32> to vector<2x32xf32>
    %213 = arith.mulf %212, %163 : vector<2x32xf32>
    %214 = vector.extract_strided_slice %210 {offsets = [0, 0], sizes = [2, 32], strides = [1, 1]} : vector<2x128xf32> to vector<2x32xf32>
    %215 = vector.extract_strided_slice %211 {offsets = [0, 64], sizes = [2, 32], strides = [1, 1]} : vector<2x128xf32> to vector<2x32xf32>
    %216 = arith.mulf %214, %215 : vector<2x32xf32>
    %217 = arith.addf %213, %216 : vector<2x32xf32>
    %218 = vector.extract_strided_slice %210 {offsets = [0, 96], sizes = [2, 32], strides = [1, 1]} : vector<2x128xf32> to vector<2x32xf32>
    %219 = math.tanh %217 : vector<2x32xf32>
    %220 = arith.mulf %218, %219 : vector<2x32xf32>
    %221 = tpu.concatenate %220, %186 in 1 : vector<2x32xf32>, vector<2x32xf32> -> vector<2x64xf32>
    %c40_49 = arith.constant 40 : index
    %c0_50 = arith.constant 0 : index
    %222 = vector.load %arg1[%c40_49, %c0_50] : memref<240x128xf32, #tpu.memory_space<vmem>>, vector<64x128xf32>
    %cst_51 = arith.constant dense<0.000000e+00> : vector<2x128xf32>
    %223 = tpu.matmul %221, %222, %cst_51 {dimension_numbers = #tpu.dot_dimension_numbers<[1], [0], [0], [1], [0, 0, 1, 1], [], []>} : vector<2x64xf32>, vector<64x128xf32>, vector<2x128xf32> -> vector<2x128xf32>
    %224 = vector.broadcast %3 : vector<1x128xf32> to vector<2x128xf32>
    %225 = arith.addf %223, %224 : vector<2x128xf32>
    %226 = arith.negf %225 : vector<2x128xf32>
    %227 = math.exp %226 : vector<2x128xf32>
    %cst_52 = arith.constant 1.000000e+00 : f32
    %228 = vector.broadcast %cst_52 : f32 to vector<2x128xf32>
    %229 = arith.addf %228, %227 : vector<2x128xf32>
    %230 = arith.divf %228, %229 : vector<2x128xf32>
    %231 = math.tanh %225 : vector<2x128xf32>
    %232 = vector.extract_strided_slice %230 {offsets = [0, 32], sizes = [2, 32], strides = [1, 1]} : vector<2x128xf32> to vector<2x32xf32>
    %233 = arith.mulf %232, %183 : vector<2x32xf32>
    %234 = vector.extract_strided_slice %230 {offsets = [0, 0], sizes = [2, 32], strides = [1, 1]} : vector<2x128xf32> to vector<2x32xf32>
    %235 = vector.extract_strided_slice %231 {offsets = [0, 64], sizes = [2, 32], strides = [1, 1]} : vector<2x128xf32> to vector<2x32xf32>
    %236 = arith.mulf %234, %235 : vector<2x32xf32>
    %237 = arith.addf %233, %236 : vector<2x32xf32>
    %238 = vector.extract_strided_slice %230 {offsets = [0, 96], sizes = [2, 32], strides = [1, 1]} : vector<2x128xf32> to vector<2x32xf32>
    %239 = math.tanh %237 : vector<2x32xf32>
    %240 = arith.mulf %238, %239 : vector<2x32xf32>
    %241 = vector.extract_strided_slice %20 {offsets = [8, 0], sizes = [2, 4], strides = [1, 1]} : vector<16x4xf32> to vector<2x4xf32>
    %cst_53 = arith.constant dense<0.000000e+00> : vector<2x4xf32>
    %242 = tpu.matmul %240, %10, %cst_53 {dimension_numbers = #tpu.dot_dimension_numbers<[1], [0], [0], [1], [0, 0, 1, 1], [], []>} : vector<2x32xf32>, vector<32x4xf32>, vector<2x4xf32> -> vector<2x4xf32>
    %243 = vector.extract_strided_slice %23 {offsets = [8, 0], sizes = [2, 4], strides = [1, 1]} : vector<16x4xf32> to vector<2x4xf32>
    %244 = arith.addf %242, %243 : vector<2x4xf32>
    %cst_54 = arith.constant dense<0xFF800000> : vector<2xf32>
    %245 = vector.multi_reduction <maximumf>, %244, %cst_54 [1] : vector<2x4xf32> to vector<2xf32>
    %246 = vector.shape_cast %245 : vector<2xf32> to vector<2x1xf32>
    %247 = vector.broadcast %246 : vector<2x1xf32> to vector<2x4xf32>
    %248 = arith.subf %244, %247 : vector<2x4xf32>
    %249 = math.exp %248 : vector<2x4xf32>
    %cst_55 = arith.constant dense<0.000000e+00> : vector<2xf32>
    %250 = vector.multi_reduction <add>, %249, %cst_55 [1] : vector<2x4xf32> to vector<2xf32>
    %251 = vector.shape_cast %250 : vector<2xf32> to vector<2x1xf32>
    %252 = vector.broadcast %251 : vector<2x1xf32> to vector<2x4xf32>
    %253 = arith.divf %249, %252 : vector<2x4xf32>
    %254 = arith.mulf %253, %241 : vector<2x4xf32>
    %255 = tpu.concatenate %254, %220 in 1 : vector<2x4xf32>, vector<2x32xf32> -> vector<2x36xf32>
    %c0_56 = arith.constant 0 : index
    %c0_57 = arith.constant 0 : index
    %256 = vector.load %arg1[%c0_56, %c0_57] : memref<240x128xf32, #tpu.memory_space<vmem>>, vector<36x128xf32>
    %cst_58 = arith.constant dense<0.000000e+00> : vector<2x128xf32>
    %257 = tpu.matmul %255, %256, %cst_58 {dimension_numbers = #tpu.dot_dimension_numbers<[1], [0], [0], [1], [0, 0, 1, 1], [], []>} : vector<2x36xf32>, vector<36x128xf32>, vector<2x128xf32> -> vector<2x128xf32>
    %258 = vector.broadcast %2 : vector<1x128xf32> to vector<2x128xf32>
    %259 = arith.addf %257, %258 : vector<2x128xf32>
    %260 = arith.negf %259 : vector<2x128xf32>
    %261 = math.exp %260 : vector<2x128xf32>
    %cst_59 = arith.constant 1.000000e+00 : f32
    %262 = vector.broadcast %cst_59 : f32 to vector<2x128xf32>
    %263 = arith.addf %262, %261 : vector<2x128xf32>
    %264 = arith.divf %262, %263 : vector<2x128xf32>
    %265 = math.tanh %259 : vector<2x128xf32>
    %266 = vector.extract_strided_slice %264 {offsets = [0, 32], sizes = [2, 32], strides = [1, 1]} : vector<2x128xf32> to vector<2x32xf32>
    %267 = arith.mulf %266, %217 : vector<2x32xf32>
    %268 = vector.extract_strided_slice %264 {offsets = [0, 0], sizes = [2, 32], strides = [1, 1]} : vector<2x128xf32> to vector<2x32xf32>
    %269 = vector.extract_strided_slice %265 {offsets = [0, 64], sizes = [2, 32], strides = [1, 1]} : vector<2x128xf32> to vector<2x32xf32>
    %270 = arith.mulf %268, %269 : vector<2x32xf32>
    %271 = arith.addf %267, %270 : vector<2x32xf32>
    %272 = vector.extract_strided_slice %264 {offsets = [0, 96], sizes = [2, 32], strides = [1, 1]} : vector<2x128xf32> to vector<2x32xf32>
    %273 = math.tanh %271 : vector<2x32xf32>
    %274 = arith.mulf %272, %273 : vector<2x32xf32>
    %275 = tpu.concatenate %274, %240 in 1 : vector<2x32xf32>, vector<2x32xf32> -> vector<2x64xf32>
    %c40_60 = arith.constant 40 : index
    %c0_61 = arith.constant 0 : index
    %276 = vector.load %arg1[%c40_60, %c0_61] : memref<240x128xf32, #tpu.memory_space<vmem>>, vector<64x128xf32>
    %cst_62 = arith.constant dense<0.000000e+00> : vector<2x128xf32>
    %277 = tpu.matmul %275, %276, %cst_62 {dimension_numbers = #tpu.dot_dimension_numbers<[1], [0], [0], [1], [0, 0, 1, 1], [], []>} : vector<2x64xf32>, vector<64x128xf32>, vector<2x128xf32> -> vector<2x128xf32>
    %278 = vector.broadcast %3 : vector<1x128xf32> to vector<2x128xf32>
    %279 = arith.addf %277, %278 : vector<2x128xf32>
    %280 = arith.negf %279 : vector<2x128xf32>
    %281 = math.exp %280 : vector<2x128xf32>
    %cst_63 = arith.constant 1.000000e+00 : f32
    %282 = vector.broadcast %cst_63 : f32 to vector<2x128xf32>
    %283 = arith.addf %282, %281 : vector<2x128xf32>
    %284 = arith.divf %282, %283 : vector<2x128xf32>
    %285 = math.tanh %279 : vector<2x128xf32>
    %286 = vector.extract_strided_slice %284 {offsets = [0, 32], sizes = [2, 32], strides = [1, 1]} : vector<2x128xf32> to vector<2x32xf32>
    %287 = arith.mulf %286, %237 : vector<2x32xf32>
    %288 = vector.extract_strided_slice %284 {offsets = [0, 0], sizes = [2, 32], strides = [1, 1]} : vector<2x128xf32> to vector<2x32xf32>
    %289 = vector.extract_strided_slice %285 {offsets = [0, 64], sizes = [2, 32], strides = [1, 1]} : vector<2x128xf32> to vector<2x32xf32>
    %290 = arith.mulf %288, %289 : vector<2x32xf32>
    %291 = arith.addf %287, %290 : vector<2x32xf32>
    %292 = vector.extract_strided_slice %284 {offsets = [0, 96], sizes = [2, 32], strides = [1, 1]} : vector<2x128xf32> to vector<2x32xf32>
    %293 = math.tanh %291 : vector<2x32xf32>
    %294 = arith.mulf %292, %293 : vector<2x32xf32>
    %295 = vector.extract_strided_slice %20 {offsets = [10, 0], sizes = [2, 4], strides = [1, 1]} : vector<16x4xf32> to vector<2x4xf32>
    %cst_64 = arith.constant dense<0.000000e+00> : vector<2x4xf32>
    %296 = tpu.matmul %294, %10, %cst_64 {dimension_numbers = #tpu.dot_dimension_numbers<[1], [0], [0], [1], [0, 0, 1, 1], [], []>} : vector<2x32xf32>, vector<32x4xf32>, vector<2x4xf32> -> vector<2x4xf32>
    %297 = vector.extract_strided_slice %23 {offsets = [10, 0], sizes = [2, 4], strides = [1, 1]} : vector<16x4xf32> to vector<2x4xf32>
    %298 = arith.addf %296, %297 : vector<2x4xf32>
    %cst_65 = arith.constant dense<0xFF800000> : vector<2xf32>
    %299 = vector.multi_reduction <maximumf>, %298, %cst_65 [1] : vector<2x4xf32> to vector<2xf32>
    %300 = vector.shape_cast %299 : vector<2xf32> to vector<2x1xf32>
    %301 = vector.broadcast %300 : vector<2x1xf32> to vector<2x4xf32>
    %302 = arith.subf %298, %301 : vector<2x4xf32>
    %303 = math.exp %302 : vector<2x4xf32>
    %cst_66 = arith.constant dense<0.000000e+00> : vector<2xf32>
    %304 = vector.multi_reduction <add>, %303, %cst_66 [1] : vector<2x4xf32> to vector<2xf32>
    %305 = vector.shape_cast %304 : vector<2xf32> to vector<2x1xf32>
    %306 = vector.broadcast %305 : vector<2x1xf32> to vector<2x4xf32>
    %307 = arith.divf %303, %306 : vector<2x4xf32>
    %308 = arith.mulf %307, %295 : vector<2x4xf32>
    %309 = tpu.concatenate %308, %274 in 1 : vector<2x4xf32>, vector<2x32xf32> -> vector<2x36xf32>
    %c0_67 = arith.constant 0 : index
    %c0_68 = arith.constant 0 : index
    %310 = vector.load %arg1[%c0_67, %c0_68] : memref<240x128xf32, #tpu.memory_space<vmem>>, vector<36x128xf32>
    %cst_69 = arith.constant dense<0.000000e+00> : vector<2x128xf32>
    %311 = tpu.matmul %309, %310, %cst_69 {dimension_numbers = #tpu.dot_dimension_numbers<[1], [0], [0], [1], [0, 0, 1, 1], [], []>} : vector<2x36xf32>, vector<36x128xf32>, vector<2x128xf32> -> vector<2x128xf32>
    %312 = vector.broadcast %2 : vector<1x128xf32> to vector<2x128xf32>
    %313 = arith.addf %311, %312 : vector<2x128xf32>
    %314 = arith.negf %313 : vector<2x128xf32>
    %315 = math.exp %314 : vector<2x128xf32>
    %cst_70 = arith.constant 1.000000e+00 : f32
    %316 = vector.broadcast %cst_70 : f32 to vector<2x128xf32>
    %317 = arith.addf %316, %315 : vector<2x128xf32>
    %318 = arith.divf %316, %317 : vector<2x128xf32>
    %319 = math.tanh %313 : vector<2x128xf32>
    %320 = vector.extract_strided_slice %318 {offsets = [0, 32], sizes = [2, 32], strides = [1, 1]} : vector<2x128xf32> to vector<2x32xf32>
    %321 = arith.mulf %320, %271 : vector<2x32xf32>
    %322 = vector.extract_strided_slice %318 {offsets = [0, 0], sizes = [2, 32], strides = [1, 1]} : vector<2x128xf32> to vector<2x32xf32>
    %323 = vector.extract_strided_slice %319 {offsets = [0, 64], sizes = [2, 32], strides = [1, 1]} : vector<2x128xf32> to vector<2x32xf32>
    %324 = arith.mulf %322, %323 : vector<2x32xf32>
    %325 = arith.addf %321, %324 : vector<2x32xf32>
    %326 = vector.extract_strided_slice %318 {offsets = [0, 96], sizes = [2, 32], strides = [1, 1]} : vector<2x128xf32> to vector<2x32xf32>
    %327 = math.tanh %325 : vector<2x32xf32>
    %328 = arith.mulf %326, %327 : vector<2x32xf32>
    %329 = tpu.concatenate %328, %294 in 1 : vector<2x32xf32>, vector<2x32xf32> -> vector<2x64xf32>
    %c40_71 = arith.constant 40 : index
    %c0_72 = arith.constant 0 : index
    %330 = vector.load %arg1[%c40_71, %c0_72] : memref<240x128xf32, #tpu.memory_space<vmem>>, vector<64x128xf32>
    %cst_73 = arith.constant dense<0.000000e+00> : vector<2x128xf32>
    %331 = tpu.matmul %329, %330, %cst_73 {dimension_numbers = #tpu.dot_dimension_numbers<[1], [0], [0], [1], [0, 0, 1, 1], [], []>} : vector<2x64xf32>, vector<64x128xf32>, vector<2x128xf32> -> vector<2x128xf32>
    %332 = vector.broadcast %3 : vector<1x128xf32> to vector<2x128xf32>
    %333 = arith.addf %331, %332 : vector<2x128xf32>
    %334 = arith.negf %333 : vector<2x128xf32>
    %335 = math.exp %334 : vector<2x128xf32>
    %cst_74 = arith.constant 1.000000e+00 : f32
    %336 = vector.broadcast %cst_74 : f32 to vector<2x128xf32>
    %337 = arith.addf %336, %335 : vector<2x128xf32>
    %338 = arith.divf %336, %337 : vector<2x128xf32>
    %339 = math.tanh %333 : vector<2x128xf32>
    %340 = vector.extract_strided_slice %338 {offsets = [0, 32], sizes = [2, 32], strides = [1, 1]} : vector<2x128xf32> to vector<2x32xf32>
    %341 = arith.mulf %340, %291 : vector<2x32xf32>
    %342 = vector.extract_strided_slice %338 {offsets = [0, 0], sizes = [2, 32], strides = [1, 1]} : vector<2x128xf32> to vector<2x32xf32>
    %343 = vector.extract_strided_slice %339 {offsets = [0, 64], sizes = [2, 32], strides = [1, 1]} : vector<2x128xf32> to vector<2x32xf32>
    %344 = arith.mulf %342, %343 : vector<2x32xf32>
    %345 = arith.addf %341, %344 : vector<2x32xf32>
    %346 = vector.extract_strided_slice %338 {offsets = [0, 96], sizes = [2, 32], strides = [1, 1]} : vector<2x128xf32> to vector<2x32xf32>
    %347 = math.tanh %345 : vector<2x32xf32>
    %348 = arith.mulf %346, %347 : vector<2x32xf32>
    %349 = vector.extract_strided_slice %20 {offsets = [12, 0], sizes = [2, 4], strides = [1, 1]} : vector<16x4xf32> to vector<2x4xf32>
    %cst_75 = arith.constant dense<0.000000e+00> : vector<2x4xf32>
    %350 = tpu.matmul %348, %10, %cst_75 {dimension_numbers = #tpu.dot_dimension_numbers<[1], [0], [0], [1], [0, 0, 1, 1], [], []>} : vector<2x32xf32>, vector<32x4xf32>, vector<2x4xf32> -> vector<2x4xf32>
    %351 = vector.extract_strided_slice %23 {offsets = [12, 0], sizes = [2, 4], strides = [1, 1]} : vector<16x4xf32> to vector<2x4xf32>
    %352 = arith.addf %350, %351 : vector<2x4xf32>
    %cst_76 = arith.constant dense<0xFF800000> : vector<2xf32>
    %353 = vector.multi_reduction <maximumf>, %352, %cst_76 [1] : vector<2x4xf32> to vector<2xf32>
    %354 = vector.shape_cast %353 : vector<2xf32> to vector<2x1xf32>
    %355 = vector.broadcast %354 : vector<2x1xf32> to vector<2x4xf32>
    %356 = arith.subf %352, %355 : vector<2x4xf32>
    %357 = math.exp %356 : vector<2x4xf32>
    %cst_77 = arith.constant dense<0.000000e+00> : vector<2xf32>
    %358 = vector.multi_reduction <add>, %357, %cst_77 [1] : vector<2x4xf32> to vector<2xf32>
    %359 = vector.shape_cast %358 : vector<2xf32> to vector<2x1xf32>
    %360 = vector.broadcast %359 : vector<2x1xf32> to vector<2x4xf32>
    %361 = arith.divf %357, %360 : vector<2x4xf32>
    %362 = arith.mulf %361, %349 : vector<2x4xf32>
    %363 = tpu.concatenate %362, %328 in 1 : vector<2x4xf32>, vector<2x32xf32> -> vector<2x36xf32>
    %c0_78 = arith.constant 0 : index
    %c0_79 = arith.constant 0 : index
    %364 = vector.load %arg1[%c0_78, %c0_79] : memref<240x128xf32, #tpu.memory_space<vmem>>, vector<36x128xf32>
    %cst_80 = arith.constant dense<0.000000e+00> : vector<2x128xf32>
    %365 = tpu.matmul %363, %364, %cst_80 {dimension_numbers = #tpu.dot_dimension_numbers<[1], [0], [0], [1], [0, 0, 1, 1], [], []>} : vector<2x36xf32>, vector<36x128xf32>, vector<2x128xf32> -> vector<2x128xf32>
    %366 = vector.broadcast %2 : vector<1x128xf32> to vector<2x128xf32>
    %367 = arith.addf %365, %366 : vector<2x128xf32>
    %368 = arith.negf %367 : vector<2x128xf32>
    %369 = math.exp %368 : vector<2x128xf32>
    %cst_81 = arith.constant 1.000000e+00 : f32
    %370 = vector.broadcast %cst_81 : f32 to vector<2x128xf32>
    %371 = arith.addf %370, %369 : vector<2x128xf32>
    %372 = arith.divf %370, %371 : vector<2x128xf32>
    %373 = math.tanh %367 : vector<2x128xf32>
    %374 = vector.extract_strided_slice %372 {offsets = [0, 32], sizes = [2, 32], strides = [1, 1]} : vector<2x128xf32> to vector<2x32xf32>
    %375 = arith.mulf %374, %325 : vector<2x32xf32>
    %376 = vector.extract_strided_slice %372 {offsets = [0, 0], sizes = [2, 32], strides = [1, 1]} : vector<2x128xf32> to vector<2x32xf32>
    %377 = vector.extract_strided_slice %373 {offsets = [0, 64], sizes = [2, 32], strides = [1, 1]} : vector<2x128xf32> to vector<2x32xf32>
    %378 = arith.mulf %376, %377 : vector<2x32xf32>
    %379 = arith.addf %375, %378 : vector<2x32xf32>
    %380 = vector.extract_strided_slice %372 {offsets = [0, 96], sizes = [2, 32], strides = [1, 1]} : vector<2x128xf32> to vector<2x32xf32>
    %381 = math.tanh %379 : vector<2x32xf32>
    %382 = arith.mulf %380, %381 : vector<2x32xf32>
    %383 = tpu.concatenate %382, %348 in 1 : vector<2x32xf32>, vector<2x32xf32> -> vector<2x64xf32>
    %c40_82 = arith.constant 40 : index
    %c0_83 = arith.constant 0 : index
    %384 = vector.load %arg1[%c40_82, %c0_83] : memref<240x128xf32, #tpu.memory_space<vmem>>, vector<64x128xf32>
    %cst_84 = arith.constant dense<0.000000e+00> : vector<2x128xf32>
    %385 = tpu.matmul %383, %384, %cst_84 {dimension_numbers = #tpu.dot_dimension_numbers<[1], [0], [0], [1], [0, 0, 1, 1], [], []>} : vector<2x64xf32>, vector<64x128xf32>, vector<2x128xf32> -> vector<2x128xf32>
    %386 = vector.broadcast %3 : vector<1x128xf32> to vector<2x128xf32>
    %387 = arith.addf %385, %386 : vector<2x128xf32>
    %388 = arith.negf %387 : vector<2x128xf32>
    %389 = math.exp %388 : vector<2x128xf32>
    %cst_85 = arith.constant 1.000000e+00 : f32
    %390 = vector.broadcast %cst_85 : f32 to vector<2x128xf32>
    %391 = arith.addf %390, %389 : vector<2x128xf32>
    %392 = arith.divf %390, %391 : vector<2x128xf32>
    %393 = math.tanh %387 : vector<2x128xf32>
    %394 = vector.extract_strided_slice %392 {offsets = [0, 32], sizes = [2, 32], strides = [1, 1]} : vector<2x128xf32> to vector<2x32xf32>
    %395 = arith.mulf %394, %345 : vector<2x32xf32>
    %396 = vector.extract_strided_slice %392 {offsets = [0, 0], sizes = [2, 32], strides = [1, 1]} : vector<2x128xf32> to vector<2x32xf32>
    %397 = vector.extract_strided_slice %393 {offsets = [0, 64], sizes = [2, 32], strides = [1, 1]} : vector<2x128xf32> to vector<2x32xf32>
    %398 = arith.mulf %396, %397 : vector<2x32xf32>
    %399 = arith.addf %395, %398 : vector<2x32xf32>
    %400 = vector.extract_strided_slice %392 {offsets = [0, 96], sizes = [2, 32], strides = [1, 1]} : vector<2x128xf32> to vector<2x32xf32>
    %401 = math.tanh %399 : vector<2x32xf32>
    %402 = arith.mulf %400, %401 : vector<2x32xf32>
    %403 = vector.extract_strided_slice %20 {offsets = [14, 0], sizes = [2, 4], strides = [1, 1]} : vector<16x4xf32> to vector<2x4xf32>
    %cst_86 = arith.constant dense<0.000000e+00> : vector<2x4xf32>
    %404 = tpu.matmul %402, %10, %cst_86 {dimension_numbers = #tpu.dot_dimension_numbers<[1], [0], [0], [1], [0, 0, 1, 1], [], []>} : vector<2x32xf32>, vector<32x4xf32>, vector<2x4xf32> -> vector<2x4xf32>
    %405 = vector.extract_strided_slice %23 {offsets = [14, 0], sizes = [2, 4], strides = [1, 1]} : vector<16x4xf32> to vector<2x4xf32>
    %406 = arith.addf %404, %405 : vector<2x4xf32>
    %cst_87 = arith.constant dense<0xFF800000> : vector<2xf32>
    %407 = vector.multi_reduction <maximumf>, %406, %cst_87 [1] : vector<2x4xf32> to vector<2xf32>
    %408 = vector.shape_cast %407 : vector<2xf32> to vector<2x1xf32>
    %409 = vector.broadcast %408 : vector<2x1xf32> to vector<2x4xf32>
    %410 = arith.subf %406, %409 : vector<2x4xf32>
    %411 = math.exp %410 : vector<2x4xf32>
    %cst_88 = arith.constant dense<0.000000e+00> : vector<2xf32>
    %412 = vector.multi_reduction <add>, %411, %cst_88 [1] : vector<2x4xf32> to vector<2xf32>
    %413 = vector.shape_cast %412 : vector<2xf32> to vector<2x1xf32>
    %414 = vector.broadcast %413 : vector<2x1xf32> to vector<2x4xf32>
    %415 = arith.divf %411, %414 : vector<2x4xf32>
    %416 = arith.mulf %415, %403 : vector<2x4xf32>
    %417 = tpu.concatenate %416, %382 in 1 : vector<2x4xf32>, vector<2x32xf32> -> vector<2x36xf32>
    %c0_89 = arith.constant 0 : index
    %c0_90 = arith.constant 0 : index
    %418 = vector.load %arg1[%c0_89, %c0_90] : memref<240x128xf32, #tpu.memory_space<vmem>>, vector<36x128xf32>
    %cst_91 = arith.constant dense<0.000000e+00> : vector<2x128xf32>
    %419 = tpu.matmul %417, %418, %cst_91 {dimension_numbers = #tpu.dot_dimension_numbers<[1], [0], [0], [1], [0, 0, 1, 1], [], []>} : vector<2x36xf32>, vector<36x128xf32>, vector<2x128xf32> -> vector<2x128xf32>
    %420 = vector.broadcast %2 : vector<1x128xf32> to vector<2x128xf32>
    %421 = arith.addf %419, %420 : vector<2x128xf32>
    %422 = arith.negf %421 : vector<2x128xf32>
    %423 = math.exp %422 : vector<2x128xf32>
    %cst_92 = arith.constant 1.000000e+00 : f32
    %424 = vector.broadcast %cst_92 : f32 to vector<2x128xf32>
    %425 = arith.addf %424, %423 : vector<2x128xf32>
    %426 = arith.divf %424, %425 : vector<2x128xf32>
    %427 = math.tanh %421 : vector<2x128xf32>
    %428 = vector.extract_strided_slice %426 {offsets = [0, 32], sizes = [2, 32], strides = [1, 1]} : vector<2x128xf32> to vector<2x32xf32>
    %429 = arith.mulf %428, %379 : vector<2x32xf32>
    %430 = vector.extract_strided_slice %426 {offsets = [0, 0], sizes = [2, 32], strides = [1, 1]} : vector<2x128xf32> to vector<2x32xf32>
    %431 = vector.extract_strided_slice %427 {offsets = [0, 64], sizes = [2, 32], strides = [1, 1]} : vector<2x128xf32> to vector<2x32xf32>
    %432 = arith.mulf %430, %431 : vector<2x32xf32>
    %433 = arith.addf %429, %432 : vector<2x32xf32>
    %434 = vector.extract_strided_slice %426 {offsets = [0, 96], sizes = [2, 32], strides = [1, 1]} : vector<2x128xf32> to vector<2x32xf32>
    %435 = math.tanh %433 : vector<2x32xf32>
    %436 = arith.mulf %434, %435 : vector<2x32xf32>
    %437 = tpu.concatenate %436, %402 in 1 : vector<2x32xf32>, vector<2x32xf32> -> vector<2x64xf32>
    %c40_93 = arith.constant 40 : index
    %c0_94 = arith.constant 0 : index
    %438 = vector.load %arg1[%c40_93, %c0_94] : memref<240x128xf32, #tpu.memory_space<vmem>>, vector<64x128xf32>
    %cst_95 = arith.constant dense<0.000000e+00> : vector<2x128xf32>
    %439 = tpu.matmul %437, %438, %cst_95 {dimension_numbers = #tpu.dot_dimension_numbers<[1], [0], [0], [1], [0, 0, 1, 1], [], []>} : vector<2x64xf32>, vector<64x128xf32>, vector<2x128xf32> -> vector<2x128xf32>
    %440 = vector.broadcast %3 : vector<1x128xf32> to vector<2x128xf32>
    %441 = arith.addf %439, %440 : vector<2x128xf32>
    %442 = arith.negf %441 : vector<2x128xf32>
    %443 = math.exp %442 : vector<2x128xf32>
    %cst_96 = arith.constant 1.000000e+00 : f32
    %444 = vector.broadcast %cst_96 : f32 to vector<2x128xf32>
    %445 = arith.addf %444, %443 : vector<2x128xf32>
    %446 = arith.divf %444, %445 : vector<2x128xf32>
    %447 = math.tanh %441 : vector<2x128xf32>
    %448 = vector.extract_strided_slice %446 {offsets = [0, 32], sizes = [2, 32], strides = [1, 1]} : vector<2x128xf32> to vector<2x32xf32>
    %449 = arith.mulf %448, %399 : vector<2x32xf32>
    %450 = vector.extract_strided_slice %446 {offsets = [0, 0], sizes = [2, 32], strides = [1, 1]} : vector<2x128xf32> to vector<2x32xf32>
    %451 = vector.extract_strided_slice %447 {offsets = [0, 64], sizes = [2, 32], strides = [1, 1]} : vector<2x128xf32> to vector<2x32xf32>
    %452 = arith.mulf %450, %451 : vector<2x32xf32>
    %453 = arith.addf %449, %452 : vector<2x32xf32>
    %454 = vector.extract_strided_slice %446 {offsets = [0, 96], sizes = [2, 32], strides = [1, 1]} : vector<2x128xf32> to vector<2x32xf32>
    %455 = math.tanh %453 : vector<2x32xf32>
    %456 = arith.mulf %454, %455 : vector<2x32xf32>
    %457 = tpu.concatenate %78, %132, %186, %240, %294, %348, %402, %456 in 0 : vector<2x32xf32>, vector<2x32xf32>, vector<2x32xf32>, vector<2x32xf32>, vector<2x32xf32>, vector<2x32xf32>, vector<2x32xf32>, vector<2x32xf32> -> vector<16x32xf32>
    %cst_97 = arith.constant dense<0.000000e+00> : vector<2x32xf32>
    %458 = tpu.matmul %456, %8, %cst_97 {dimension_numbers = #tpu.dot_dimension_numbers<[1], [0], [0], [1], [0, 0, 1, 1], [], []>} : vector<2x32xf32>, vector<32x32xf32>, vector<2x32xf32> -> vector<2x32xf32>
    %459 = vector.broadcast %12 : vector<1x32xf32> to vector<2x32xf32>
    %460 = arith.addf %458, %459 : vector<2x32xf32>
    %cst_98 = arith.constant dense<0.000000e+00> : vector<16x32xf32>
    %461 = tpu.matmul %457, %7, %cst_98 {dimension_numbers = #tpu.dot_dimension_numbers<[1], [0], [0], [1], [0, 0, 1, 1], [], []>} : vector<16x32xf32>, vector<32x32xf32>, vector<16x32xf32> -> vector<16x32xf32>
    %462 = tpu.concatenate %460, %460, %460, %460, %460, %460, %460, %460 in 0 : vector<2x32xf32>, vector<2x32xf32>, vector<2x32xf32>, vector<2x32xf32>, vector<2x32xf32>, vector<2x32xf32>, vector<2x32xf32>, vector<2x32xf32> -> vector<16x32xf32>
    %463 = arith.addf %461, %462 : vector<16x32xf32>
    %464 = math.tanh %463 : vector<16x32xf32>
    %465 = vector.extract_strided_slice %464 {offsets = [0, 0], sizes = [2, 32], strides = [1, 1]} : vector<16x32xf32> to vector<2x32xf32>
    %466 = vector.broadcast %13 : vector<1x32xf32> to vector<2x32xf32>
    %467 = arith.mulf %465, %466 : vector<2x32xf32>
    %cst_99 = arith.constant dense<0.000000e+00> : vector<2xf32>
    %468 = vector.multi_reduction <add>, %467, %cst_99 [1] : vector<2x32xf32> to vector<2xf32>
    %469 = vector.shape_cast %468 : vector<2xf32> to vector<2x1xf32>
    %470 = vector.extract_strided_slice %464 {offsets = [2, 0], sizes = [2, 32], strides = [1, 1]} : vector<16x32xf32> to vector<2x32xf32>
    %471 = vector.broadcast %13 : vector<1x32xf32> to vector<2x32xf32>
    %472 = arith.mulf %470, %471 : vector<2x32xf32>
    %cst_100 = arith.constant dense<0.000000e+00> : vector<2xf32>
    %473 = vector.multi_reduction <add>, %472, %cst_100 [1] : vector<2x32xf32> to vector<2xf32>
    %474 = vector.shape_cast %473 : vector<2xf32> to vector<2x1xf32>
    %475 = vector.extract_strided_slice %464 {offsets = [4, 0], sizes = [2, 32], strides = [1, 1]} : vector<16x32xf32> to vector<2x32xf32>
    %476 = vector.broadcast %13 : vector<1x32xf32> to vector<2x32xf32>
    %477 = arith.mulf %475, %476 : vector<2x32xf32>
    %cst_101 = arith.constant dense<0.000000e+00> : vector<2xf32>
    %478 = vector.multi_reduction <add>, %477, %cst_101 [1] : vector<2x32xf32> to vector<2xf32>
    %479 = vector.shape_cast %478 : vector<2xf32> to vector<2x1xf32>
    %480 = vector.extract_strided_slice %464 {offsets = [6, 0], sizes = [2, 32], strides = [1, 1]} : vector<16x32xf32> to vector<2x32xf32>
    %481 = vector.broadcast %13 : vector<1x32xf32> to vector<2x32xf32>
    %482 = arith.mulf %480, %481 : vector<2x32xf32>
    %cst_102 = arith.constant dense<0.000000e+00> : vector<2xf32>
    %483 = vector.multi_reduction <add>, %482, %cst_102 [1] : vector<2x32xf32> to vector<2xf32>
    %484 = vector.shape_cast %483 : vector<2xf32> to vector<2x1xf32>
    %485 = vector.extract_strided_slice %464 {offsets = [8, 0], sizes = [2, 32], strides = [1, 1]} : vector<16x32xf32> to vector<2x32xf32>
    %486 = vector.broadcast %13 : vector<1x32xf32> to vector<2x32xf32>
    %487 = arith.mulf %485, %486 : vector<2x32xf32>
    %cst_103 = arith.constant dense<0.000000e+00> : vector<2xf32>
    %488 = vector.multi_reduction <add>, %487, %cst_103 [1] : vector<2x32xf32> to vector<2xf32>
    %489 = vector.shape_cast %488 : vector<2xf32> to vector<2x1xf32>
    %490 = vector.extract_strided_slice %464 {offsets = [10, 0], sizes = [2, 32], strides = [1, 1]} : vector<16x32xf32> to vector<2x32xf32>
    %491 = vector.broadcast %13 : vector<1x32xf32> to vector<2x32xf32>
    %492 = arith.mulf %490, %491 : vector<2x32xf32>
    %cst_104 = arith.constant dense<0.000000e+00> : vector<2xf32>
    %493 = vector.multi_reduction <add>, %492, %cst_104 [1] : vector<2x32xf32> to vector<2xf32>
    %494 = vector.shape_cast %493 : vector<2xf32> to vector<2x1xf32>
    %495 = vector.extract_strided_slice %464 {offsets = [12, 0], sizes = [2, 32], strides = [1, 1]} : vector<16x32xf32> to vector<2x32xf32>
    %496 = vector.broadcast %13 : vector<1x32xf32> to vector<2x32xf32>
    %497 = arith.mulf %495, %496 : vector<2x32xf32>
    %cst_105 = arith.constant dense<0.000000e+00> : vector<2xf32>
    %498 = vector.multi_reduction <add>, %497, %cst_105 [1] : vector<2x32xf32> to vector<2xf32>
    %499 = vector.shape_cast %498 : vector<2xf32> to vector<2x1xf32>
    %500 = vector.extract_strided_slice %464 {offsets = [14, 0], sizes = [2, 32], strides = [1, 1]} : vector<16x32xf32> to vector<2x32xf32>
    %501 = vector.broadcast %13 : vector<1x32xf32> to vector<2x32xf32>
    %502 = arith.mulf %500, %501 : vector<2x32xf32>
    %cst_106 = arith.constant dense<0.000000e+00> : vector<2xf32>
    %503 = vector.multi_reduction <add>, %502, %cst_106 [1] : vector<2x32xf32> to vector<2xf32>
    %504 = vector.shape_cast %503 : vector<2xf32> to vector<2x1xf32>
    %505 = tpu.concatenate %469, %474, %479, %484, %489, %494, %499, %504 in 1 : vector<2x1xf32>, vector<2x1xf32>, vector<2x1xf32>, vector<2x1xf32>, vector<2x1xf32>, vector<2x1xf32>, vector<2x1xf32>, vector<2x1xf32> -> vector<2x8xf32>
    %cst_107 = arith.constant dense<0xFF800000> : vector<2xf32>
    %506 = vector.multi_reduction <maximumf>, %505, %cst_107 [1] : vector<2x8xf32> to vector<2xf32>
    %507 = vector.shape_cast %506 : vector<2xf32> to vector<2x1xf32>
    %508 = vector.broadcast %507 : vector<2x1xf32> to vector<2x8xf32>
    %509 = arith.subf %505, %508 : vector<2x8xf32>
    %510 = math.exp %509 : vector<2x8xf32>
    %cst_108 = arith.constant dense<0.000000e+00> : vector<2xf32>
    %511 = vector.multi_reduction <add>, %510, %cst_108 [1] : vector<2x8xf32> to vector<2xf32>
    %512 = vector.shape_cast %511 : vector<2xf32> to vector<2x1xf32>
    %513 = vector.broadcast %512 : vector<2x1xf32> to vector<2x8xf32>
    %514 = arith.divf %510, %513 : vector<2x8xf32>
    %cst_109 = arith.constant 0.000000e+00 : f32
    %515 = vector.broadcast %cst_109 : f32 to vector<2x32xf32>
    %516 = vector.extract_strided_slice %514 {offsets = [0, 0], sizes = [2, 1], strides = [1, 1]} : vector<2x8xf32> to vector<2x1xf32>
    %517 = vector.broadcast %516 : vector<2x1xf32> to vector<2x32xf32>
    %518 = arith.mulf %517, %78 : vector<2x32xf32>
    %519 = arith.addf %515, %518 : vector<2x32xf32>
    %520 = vector.extract_strided_slice %514 {offsets = [0, 1], sizes = [2, 1], strides = [1, 1]} : vector<2x8xf32> to vector<2x1xf32>
    %521 = vector.broadcast %520 : vector<2x1xf32> to vector<2x32xf32>
    %522 = arith.mulf %521, %132 : vector<2x32xf32>
    %523 = arith.addf %519, %522 : vector<2x32xf32>
    %524 = vector.extract_strided_slice %514 {offsets = [0, 2], sizes = [2, 1], strides = [1, 1]} : vector<2x8xf32> to vector<2x1xf32>
    %525 = vector.broadcast %524 : vector<2x1xf32> to vector<2x32xf32>
    %526 = arith.mulf %525, %186 : vector<2x32xf32>
    %527 = arith.addf %523, %526 : vector<2x32xf32>
    %528 = vector.extract_strided_slice %514 {offsets = [0, 3], sizes = [2, 1], strides = [1, 1]} : vector<2x8xf32> to vector<2x1xf32>
    %529 = vector.broadcast %528 : vector<2x1xf32> to vector<2x32xf32>
    %530 = arith.mulf %529, %240 : vector<2x32xf32>
    %531 = arith.addf %527, %530 : vector<2x32xf32>
    %532 = vector.extract_strided_slice %514 {offsets = [0, 4], sizes = [2, 1], strides = [1, 1]} : vector<2x8xf32> to vector<2x1xf32>
    %533 = vector.broadcast %532 : vector<2x1xf32> to vector<2x32xf32>
    %534 = arith.mulf %533, %294 : vector<2x32xf32>
    %535 = arith.addf %531, %534 : vector<2x32xf32>
    %536 = vector.extract_strided_slice %514 {offsets = [0, 5], sizes = [2, 1], strides = [1, 1]} : vector<2x8xf32> to vector<2x1xf32>
    %537 = vector.broadcast %536 : vector<2x1xf32> to vector<2x32xf32>
    %538 = arith.mulf %537, %348 : vector<2x32xf32>
    %539 = arith.addf %535, %538 : vector<2x32xf32>
    %540 = vector.extract_strided_slice %514 {offsets = [0, 6], sizes = [2, 1], strides = [1, 1]} : vector<2x8xf32> to vector<2x1xf32>
    %541 = vector.broadcast %540 : vector<2x1xf32> to vector<2x32xf32>
    %542 = arith.mulf %541, %402 : vector<2x32xf32>
    %543 = arith.addf %539, %542 : vector<2x32xf32>
    %544 = vector.extract_strided_slice %514 {offsets = [0, 7], sizes = [2, 1], strides = [1, 1]} : vector<2x8xf32> to vector<2x1xf32>
    %545 = vector.broadcast %544 : vector<2x1xf32> to vector<2x32xf32>
    %546 = arith.mulf %545, %456 : vector<2x32xf32>
    %547 = arith.addf %543, %546 : vector<2x32xf32>
    %c0_110 = arith.constant 0 : index
    %c0_111 = arith.constant 0 : index
    %548 = vector.load %arg4[%c0_110, %c0_111] : memref<2x32xf32, #tpu.memory_space<vmem>>, vector<2x32xf32>
    tpu.vector_store %arg4[%c0_110, %c0_111], %547 {strides = array<i32>} : memref<2x32xf32, #tpu.memory_space<vmem>>, vector<2x32xf32>,
    %549 = vector.extract_strided_slice %20 {offsets = [14, 0], sizes = [2, 1], strides = [1, 1]} : vector<16x4xf32> to vector<2x1xf32>
    %550 = vector.broadcast %549 : vector<2x1xf32> to vector<2x128xf32>
    %551 = vector.broadcast %1 : vector<1x128xf32> to vector<2x128xf32>
    %552 = arith.mulf %550, %551 : vector<2x128xf32>
    %553 = vector.broadcast %4 : vector<1x128xf32> to vector<2x128xf32>
    %554 = arith.addf %552, %553 : vector<2x128xf32>
    %c136 = arith.constant 136 : index
    %c0_112 = arith.constant 0 : index
    %555 = vector.load %arg1[%c136, %c0_112] : memref<240x128xf32, #tpu.memory_space<vmem>>, vector<32x128xf32>
    %cst_113 = arith.constant dense<0.000000e+00> : vector<2x128xf32>
    %556 = tpu.matmul %436, %555, %cst_113 {dimension_numbers = #tpu.dot_dimension_numbers<[1], [0], [0], [1], [0, 0, 1, 1], [], []>} : vector<2x32xf32>, vector<32x128xf32>, vector<2x128xf32> -> vector<2x128xf32>
    %557 = arith.addf %554, %556 : vector<2x128xf32>
    %558 = arith.negf %557 : vector<2x128xf32>
    %559 = math.exp %558 : vector<2x128xf32>
    %cst_114 = arith.constant 1.000000e+00 : f32
    %560 = vector.broadcast %cst_114 : f32 to vector<2x128xf32>
    %561 = arith.addf %560, %559 : vector<2x128xf32>
    %562 = arith.divf %560, %561 : vector<2x128xf32>
    %563 = math.tanh %557 : vector<2x128xf32>
    %564 = vector.extract_strided_slice %562 {offsets = [0, 32], sizes = [2, 32], strides = [1, 1]} : vector<2x128xf32> to vector<2x32xf32>
    %565 = arith.mulf %564, %433 : vector<2x32xf32>
    %566 = vector.extract_strided_slice %562 {offsets = [0, 0], sizes = [2, 32], strides = [1, 1]} : vector<2x128xf32> to vector<2x32xf32>
    %567 = vector.extract_strided_slice %563 {offsets = [0, 64], sizes = [2, 32], strides = [1, 1]} : vector<2x128xf32> to vector<2x32xf32>
    %568 = arith.mulf %566, %567 : vector<2x32xf32>
    %569 = arith.addf %565, %568 : vector<2x32xf32>
    %570 = vector.extract_strided_slice %562 {offsets = [0, 96], sizes = [2, 32], strides = [1, 1]} : vector<2x128xf32> to vector<2x32xf32>
    %571 = math.tanh %569 : vector<2x32xf32>
    %572 = arith.mulf %570, %571 : vector<2x32xf32>
    %573 = tpu.concatenate %572, %456 in 1 : vector<2x32xf32>, vector<2x32xf32> -> vector<2x64xf32>
    %c168 = arith.constant 168 : index
    %c0_115 = arith.constant 0 : index
    %574 = vector.load %arg1[%c168, %c0_115] : memref<240x128xf32, #tpu.memory_space<vmem>>, vector<64x128xf32>
    %cst_116 = arith.constant dense<0.000000e+00> : vector<2x128xf32>
    %575 = tpu.matmul %573, %574, %cst_116 {dimension_numbers = #tpu.dot_dimension_numbers<[1], [0], [0], [1], [0, 0, 1, 1], [], []>} : vector<2x64xf32>, vector<64x128xf32>, vector<2x128xf32> -> vector<2x128xf32>
    %576 = vector.broadcast %6 : vector<1x128xf32> to vector<2x128xf32>
    %577 = arith.addf %575, %576 : vector<2x128xf32>
    %578 = arith.negf %577 : vector<2x128xf32>
    %579 = math.exp %578 : vector<2x128xf32>
    %cst_117 = arith.constant 1.000000e+00 : f32
    %580 = vector.broadcast %cst_117 : f32 to vector<2x128xf32>
    %581 = arith.addf %580, %579 : vector<2x128xf32>
    %582 = arith.divf %580, %581 : vector<2x128xf32>
    %583 = math.tanh %577 : vector<2x128xf32>
    %584 = vector.extract_strided_slice %582 {offsets = [0, 32], sizes = [2, 32], strides = [1, 1]} : vector<2x128xf32> to vector<2x32xf32>
    %585 = arith.mulf %584, %453 : vector<2x32xf32>
    %586 = vector.extract_strided_slice %582 {offsets = [0, 0], sizes = [2, 32], strides = [1, 1]} : vector<2x128xf32> to vector<2x32xf32>
    %587 = vector.extract_strided_slice %583 {offsets = [0, 64], sizes = [2, 32], strides = [1, 1]} : vector<2x128xf32> to vector<2x32xf32>
    %588 = arith.mulf %586, %587 : vector<2x32xf32>
    %589 = arith.addf %585, %588 : vector<2x32xf32>
    %590 = vector.extract_strided_slice %582 {offsets = [0, 96], sizes = [2, 32], strides = [1, 1]} : vector<2x128xf32> to vector<2x32xf32>
    %591 = math.tanh %589 : vector<2x32xf32>
    %592 = arith.mulf %590, %591 : vector<2x32xf32>
    %593 = vector.broadcast %14 : vector<1x32xf32> to vector<2x32xf32>
    %594 = arith.mulf %592, %593 : vector<2x32xf32>
    %cst_118 = arith.constant dense<0.000000e+00> : vector<2xf32>
    %595 = vector.multi_reduction <add>, %594, %cst_118 [1] : vector<2x32xf32> to vector<2xf32>
    %596 = vector.shape_cast %595 : vector<2xf32> to vector<2x1xf32>
    %597 = vector.broadcast %15 : vector<1x1xf32> to vector<2x1xf32>
    %598 = arith.addf %596, %597 : vector<2x1xf32>
    %599 = tpu.concatenate %592, %572 in 1 : vector<2x32xf32>, vector<2x32xf32> -> vector<2x64xf32>
    %c104_119 = arith.constant 104 : index
    %c0_120 = arith.constant 0 : index
    %600 = vector.load %arg1[%c104_119, %c0_120] : memref<240x128xf32, #tpu.memory_space<vmem>>, vector<64x128xf32>
    %cst_121 = arith.constant dense<0.000000e+00> : vector<2x128xf32>
    %601 = tpu.matmul %599, %600, %cst_121 {dimension_numbers = #tpu.dot_dimension_numbers<[1], [0], [0], [1], [0, 0, 1, 1], [], []>} : vector<2x64xf32>, vector<64x128xf32>, vector<2x128xf32> -> vector<2x128xf32>
    %602 = vector.broadcast %5 : vector<1x128xf32> to vector<2x128xf32>
    %603 = arith.addf %601, %602 : vector<2x128xf32>
    %604 = arith.negf %603 : vector<2x128xf32>
    %605 = math.exp %604 : vector<2x128xf32>
    %cst_122 = arith.constant 1.000000e+00 : f32
    %606 = vector.broadcast %cst_122 : f32 to vector<2x128xf32>
    %607 = arith.addf %606, %605 : vector<2x128xf32>
    %608 = arith.divf %606, %607 : vector<2x128xf32>
    %609 = math.tanh %603 : vector<2x128xf32>
    %610 = vector.extract_strided_slice %608 {offsets = [0, 32], sizes = [2, 32], strides = [1, 1]} : vector<2x128xf32> to vector<2x32xf32>
    %611 = arith.mulf %610, %569 : vector<2x32xf32>
    %612 = vector.extract_strided_slice %608 {offsets = [0, 0], sizes = [2, 32], strides = [1, 1]} : vector<2x128xf32> to vector<2x32xf32>
    %613 = vector.extract_strided_slice %609 {offsets = [0, 64], sizes = [2, 32], strides = [1, 1]} : vector<2x128xf32> to vector<2x32xf32>
    %614 = arith.mulf %612, %613 : vector<2x32xf32>
    %615 = arith.addf %611, %614 : vector<2x32xf32>
    %616 = vector.extract_strided_slice %608 {offsets = [0, 96], sizes = [2, 32], strides = [1, 1]} : vector<2x128xf32> to vector<2x32xf32>
    %617 = math.tanh %615 : vector<2x32xf32>
    %618 = arith.mulf %616, %617 : vector<2x32xf32>
    %619 = tpu.concatenate %618, %592 in 1 : vector<2x32xf32>, vector<2x32xf32> -> vector<2x64xf32>
    %c168_123 = arith.constant 168 : index
    %c0_124 = arith.constant 0 : index
    %620 = vector.load %arg1[%c168_123, %c0_124] : memref<240x128xf32, #tpu.memory_space<vmem>>, vector<64x128xf32>
    %cst_125 = arith.constant dense<0.000000e+00> : vector<2x128xf32>
    %621 = tpu.matmul %619, %620, %cst_125 {dimension_numbers = #tpu.dot_dimension_numbers<[1], [0], [0], [1], [0, 0, 1, 1], [], []>} : vector<2x64xf32>, vector<64x128xf32>, vector<2x128xf32> -> vector<2x128xf32>
    %622 = vector.broadcast %6 : vector<1x128xf32> to vector<2x128xf32>
    %623 = arith.addf %621, %622 : vector<2x128xf32>
    %624 = arith.negf %623 : vector<2x128xf32>
    %625 = math.exp %624 : vector<2x128xf32>
    %cst_126 = arith.constant 1.000000e+00 : f32
    %626 = vector.broadcast %cst_126 : f32 to vector<2x128xf32>
    %627 = arith.addf %626, %625 : vector<2x128xf32>
    %628 = arith.divf %626, %627 : vector<2x128xf32>
    %629 = math.tanh %623 : vector<2x128xf32>
    %630 = vector.extract_strided_slice %628 {offsets = [0, 32], sizes = [2, 32], strides = [1, 1]} : vector<2x128xf32> to vector<2x32xf32>
    %631 = arith.mulf %630, %589 : vector<2x32xf32>
    %632 = vector.extract_strided_slice %628 {offsets = [0, 0], sizes = [2, 32], strides = [1, 1]} : vector<2x128xf32> to vector<2x32xf32>
    %633 = vector.extract_strided_slice %629 {offsets = [0, 64], sizes = [2, 32], strides = [1, 1]} : vector<2x128xf32> to vector<2x32xf32>
    %634 = arith.mulf %632, %633 : vector<2x32xf32>
    %635 = arith.addf %631, %634 : vector<2x32xf32>
    %636 = vector.extract_strided_slice %628 {offsets = [0, 96], sizes = [2, 32], strides = [1, 1]} : vector<2x128xf32> to vector<2x32xf32>
    %637 = math.tanh %635 : vector<2x32xf32>
    %638 = arith.mulf %636, %637 : vector<2x32xf32>
    %639 = vector.broadcast %14 : vector<1x32xf32> to vector<2x32xf32>
    %640 = arith.mulf %638, %639 : vector<2x32xf32>
    %cst_127 = arith.constant dense<0.000000e+00> : vector<2xf32>
    %641 = vector.multi_reduction <add>, %640, %cst_127 [1] : vector<2x32xf32> to vector<2xf32>
    %642 = vector.shape_cast %641 : vector<2xf32> to vector<2x1xf32>
    %643 = vector.broadcast %15 : vector<1x1xf32> to vector<2x1xf32>
    %644 = arith.addf %642, %643 : vector<2x1xf32>
    %645 = tpu.concatenate %638, %618 in 1 : vector<2x32xf32>, vector<2x32xf32> -> vector<2x64xf32>
    %c104_128 = arith.constant 104 : index
    %c0_129 = arith.constant 0 : index
    %646 = vector.load %arg1[%c104_128, %c0_129] : memref<240x128xf32, #tpu.memory_space<vmem>>, vector<64x128xf32>
    %cst_130 = arith.constant dense<0.000000e+00> : vector<2x128xf32>
    %647 = tpu.matmul %645, %646, %cst_130 {dimension_numbers = #tpu.dot_dimension_numbers<[1], [0], [0], [1], [0, 0, 1, 1], [], []>} : vector<2x64xf32>, vector<64x128xf32>, vector<2x128xf32> -> vector<2x128xf32>
    %648 = vector.broadcast %5 : vector<1x128xf32> to vector<2x128xf32>
    %649 = arith.addf %647, %648 : vector<2x128xf32>
    %650 = arith.negf %649 : vector<2x128xf32>
    %651 = math.exp %650 : vector<2x128xf32>
    %cst_131 = arith.constant 1.000000e+00 : f32
    %652 = vector.broadcast %cst_131 : f32 to vector<2x128xf32>
    %653 = arith.addf %652, %651 : vector<2x128xf32>
    %654 = arith.divf %652, %653 : vector<2x128xf32>
    %655 = math.tanh %649 : vector<2x128xf32>
    %656 = vector.extract_strided_slice %654 {offsets = [0, 32], sizes = [2, 32], strides = [1, 1]} : vector<2x128xf32> to vector<2x32xf32>
    %657 = arith.mulf %656, %615 : vector<2x32xf32>
    %658 = vector.extract_strided_slice %654 {offsets = [0, 0], sizes = [2, 32], strides = [1, 1]} : vector<2x128xf32> to vector<2x32xf32>
    %659 = vector.extract_strided_slice %655 {offsets = [0, 64], sizes = [2, 32], strides = [1, 1]} : vector<2x128xf32> to vector<2x32xf32>
    %660 = arith.mulf %658, %659 : vector<2x32xf32>
    %661 = arith.addf %657, %660 : vector<2x32xf32>
    %662 = vector.extract_strided_slice %654 {offsets = [0, 96], sizes = [2, 32], strides = [1, 1]} : vector<2x128xf32> to vector<2x32xf32>
    %663 = math.tanh %661 : vector<2x32xf32>
    %664 = arith.mulf %662, %663 : vector<2x32xf32>
    %665 = tpu.concatenate %664, %638 in 1 : vector<2x32xf32>, vector<2x32xf32> -> vector<2x64xf32>
    %c168_132 = arith.constant 168 : index
    %c0_133 = arith.constant 0 : index
    %666 = vector.load %arg1[%c168_132, %c0_133] : memref<240x128xf32, #tpu.memory_space<vmem>>, vector<64x128xf32>
    %cst_134 = arith.constant dense<0.000000e+00> : vector<2x128xf32>
    %667 = tpu.matmul %665, %666, %cst_134 {dimension_numbers = #tpu.dot_dimension_numbers<[1], [0], [0], [1], [0, 0, 1, 1], [], []>} : vector<2x64xf32>, vector<64x128xf32>, vector<2x128xf32> -> vector<2x128xf32>
    %668 = vector.broadcast %6 : vector<1x128xf32> to vector<2x128xf32>
    %669 = arith.addf %667, %668 : vector<2x128xf32>
    %670 = arith.negf %669 : vector<2x128xf32>
    %671 = math.exp %670 : vector<2x128xf32>
    %cst_135 = arith.constant 1.000000e+00 : f32
    %672 = vector.broadcast %cst_135 : f32 to vector<2x128xf32>
    %673 = arith.addf %672, %671 : vector<2x128xf32>
    %674 = arith.divf %672, %673 : vector<2x128xf32>
    %675 = math.tanh %669 : vector<2x128xf32>
    %676 = vector.extract_strided_slice %674 {offsets = [0, 32], sizes = [2, 32], strides = [1, 1]} : vector<2x128xf32> to vector<2x32xf32>
    %677 = arith.mulf %676, %635 : vector<2x32xf32>
    %678 = vector.extract_strided_slice %674 {offsets = [0, 0], sizes = [2, 32], strides = [1, 1]} : vector<2x128xf32> to vector<2x32xf32>
    %679 = vector.extract_strided_slice %675 {offsets = [0, 64], sizes = [2, 32], strides = [1, 1]} : vector<2x128xf32> to vector<2x32xf32>
    %680 = arith.mulf %678, %679 : vector<2x32xf32>
    %681 = arith.addf %677, %680 : vector<2x32xf32>
    %682 = vector.extract_strided_slice %674 {offsets = [0, 96], sizes = [2, 32], strides = [1, 1]} : vector<2x128xf32> to vector<2x32xf32>
    %683 = math.tanh %681 : vector<2x32xf32>
    %684 = arith.mulf %682, %683 : vector<2x32xf32>
    %685 = vector.broadcast %14 : vector<1x32xf32> to vector<2x32xf32>
    %686 = arith.mulf %684, %685 : vector<2x32xf32>
    %cst_136 = arith.constant dense<0.000000e+00> : vector<2xf32>
    %687 = vector.multi_reduction <add>, %686, %cst_136 [1] : vector<2x32xf32> to vector<2xf32>
    %688 = vector.shape_cast %687 : vector<2xf32> to vector<2x1xf32>
    %689 = vector.broadcast %15 : vector<1x1xf32> to vector<2x1xf32>
    %690 = arith.addf %688, %689 : vector<2x1xf32>
    %691 = tpu.concatenate %684, %664 in 1 : vector<2x32xf32>, vector<2x32xf32> -> vector<2x64xf32>
    %c104_137 = arith.constant 104 : index
    %c0_138 = arith.constant 0 : index
    %692 = vector.load %arg1[%c104_137, %c0_138] : memref<240x128xf32, #tpu.memory_space<vmem>>, vector<64x128xf32>
    %cst_139 = arith.constant dense<0.000000e+00> : vector<2x128xf32>
    %693 = tpu.matmul %691, %692, %cst_139 {dimension_numbers = #tpu.dot_dimension_numbers<[1], [0], [0], [1], [0, 0, 1, 1], [], []>} : vector<2x64xf32>, vector<64x128xf32>, vector<2x128xf32> -> vector<2x128xf32>
    %694 = vector.broadcast %5 : vector<1x128xf32> to vector<2x128xf32>
    %695 = arith.addf %693, %694 : vector<2x128xf32>
    %696 = arith.negf %695 : vector<2x128xf32>
    %697 = math.exp %696 : vector<2x128xf32>
    %cst_140 = arith.constant 1.000000e+00 : f32
    %698 = vector.broadcast %cst_140 : f32 to vector<2x128xf32>
    %699 = arith.addf %698, %697 : vector<2x128xf32>
    %700 = arith.divf %698, %699 : vector<2x128xf32>
    %701 = math.tanh %695 : vector<2x128xf32>
    %702 = vector.extract_strided_slice %700 {offsets = [0, 32], sizes = [2, 32], strides = [1, 1]} : vector<2x128xf32> to vector<2x32xf32>
    %703 = arith.mulf %702, %661 : vector<2x32xf32>
    %704 = vector.extract_strided_slice %700 {offsets = [0, 0], sizes = [2, 32], strides = [1, 1]} : vector<2x128xf32> to vector<2x32xf32>
    %705 = vector.extract_strided_slice %701 {offsets = [0, 64], sizes = [2, 32], strides = [1, 1]} : vector<2x128xf32> to vector<2x32xf32>
    %706 = arith.mulf %704, %705 : vector<2x32xf32>
    %707 = arith.addf %703, %706 : vector<2x32xf32>
    %708 = vector.extract_strided_slice %700 {offsets = [0, 96], sizes = [2, 32], strides = [1, 1]} : vector<2x128xf32> to vector<2x32xf32>
    %709 = math.tanh %707 : vector<2x32xf32>
    %710 = arith.mulf %708, %709 : vector<2x32xf32>
    %711 = tpu.concatenate %710, %684 in 1 : vector<2x32xf32>, vector<2x32xf32> -> vector<2x64xf32>
    %c168_141 = arith.constant 168 : index
    %c0_142 = arith.constant 0 : index
    %712 = vector.load %arg1[%c168_141, %c0_142] : memref<240x128xf32, #tpu.memory_space<vmem>>, vector<64x128xf32>
    %cst_143 = arith.constant dense<0.000000e+00> : vector<2x128xf32>
    %713 = tpu.matmul %711, %712, %cst_143 {dimension_numbers = #tpu.dot_dimension_numbers<[1], [0], [0], [1], [0, 0, 1, 1], [], []>} : vector<2x64xf32>, vector<64x128xf32>, vector<2x128xf32> -> vector<2x128xf32>
    %714 = vector.broadcast %6 : vector<1x128xf32> to vector<2x128xf32>
    %715 = arith.addf %713, %714 : vector<2x128xf32>
    %716 = arith.negf %715 : vector<2x128xf32>
    %717 = math.exp %716 : vector<2x128xf32>
    %cst_144 = arith.constant 1.000000e+00 : f32
    %718 = vector.broadcast %cst_144 : f32 to vector<2x128xf32>
    %719 = arith.addf %718, %717 : vector<2x128xf32>
    %720 = arith.divf %718, %719 : vector<2x128xf32>
    %721 = math.tanh %715 : vector<2x128xf32>
    %722 = vector.extract_strided_slice %720 {offsets = [0, 32], sizes = [2, 32], strides = [1, 1]} : vector<2x128xf32> to vector<2x32xf32>
    %723 = arith.mulf %722, %681 : vector<2x32xf32>
    %724 = vector.extract_strided_slice %720 {offsets = [0, 0], sizes = [2, 32], strides = [1, 1]} : vector<2x128xf32> to vector<2x32xf32>
    %725 = vector.extract_strided_slice %721 {offsets = [0, 64], sizes = [2, 32], strides = [1, 1]} : vector<2x128xf32> to vector<2x32xf32>
    %726 = arith.mulf %724, %725 : vector<2x32xf32>
    %727 = arith.addf %723, %726 : vector<2x32xf32>
    %728 = vector.extract_strided_slice %720 {offsets = [0, 96], sizes = [2, 32], strides = [1, 1]} : vector<2x128xf32> to vector<2x32xf32>
    %729 = math.tanh %727 : vector<2x32xf32>
    %730 = arith.mulf %728, %729 : vector<2x32xf32>
    %731 = vector.broadcast %14 : vector<1x32xf32> to vector<2x32xf32>
    %732 = arith.mulf %730, %731 : vector<2x32xf32>
    %cst_145 = arith.constant dense<0.000000e+00> : vector<2xf32>
    %733 = vector.multi_reduction <add>, %732, %cst_145 [1] : vector<2x32xf32> to vector<2xf32>
    %734 = vector.shape_cast %733 : vector<2xf32> to vector<2x1xf32>
    %735 = vector.broadcast %15 : vector<1x1xf32> to vector<2x1xf32>
    %736 = arith.addf %734, %735 : vector<2x1xf32>
    %737 = tpu.concatenate %730, %710 in 1 : vector<2x32xf32>, vector<2x32xf32> -> vector<2x64xf32>
    %c104_146 = arith.constant 104 : index
    %c0_147 = arith.constant 0 : index
    %738 = vector.load %arg1[%c104_146, %c0_147] : memref<240x128xf32, #tpu.memory_space<vmem>>, vector<64x128xf32>
    %cst_148 = arith.constant dense<0.000000e+00> : vector<2x128xf32>
    %739 = tpu.matmul %737, %738, %cst_148 {dimension_numbers = #tpu.dot_dimension_numbers<[1], [0], [0], [1], [0, 0, 1, 1], [], []>} : vector<2x64xf32>, vector<64x128xf32>, vector<2x128xf32> -> vector<2x128xf32>
    %740 = vector.broadcast %5 : vector<1x128xf32> to vector<2x128xf32>
    %741 = arith.addf %739, %740 : vector<2x128xf32>
    %742 = arith.negf %741 : vector<2x128xf32>
    %743 = math.exp %742 : vector<2x128xf32>
    %cst_149 = arith.constant 1.000000e+00 : f32
    %744 = vector.broadcast %cst_149 : f32 to vector<2x128xf32>
    %745 = arith.addf %744, %743 : vector<2x128xf32>
    %746 = arith.divf %744, %745 : vector<2x128xf32>
    %747 = math.tanh %741 : vector<2x128xf32>
    %748 = vector.extract_strided_slice %746 {offsets = [0, 32], sizes = [2, 32], strides = [1, 1]} : vector<2x128xf32> to vector<2x32xf32>
    %749 = arith.mulf %748, %707 : vector<2x32xf32>
    %750 = vector.extract_strided_slice %746 {offsets = [0, 0], sizes = [2, 32], strides = [1, 1]} : vector<2x128xf32> to vector<2x32xf32>
    %751 = vector.extract_strided_slice %747 {offsets = [0, 64], sizes = [2, 32], strides = [1, 1]} : vector<2x128xf32> to vector<2x32xf32>
    %752 = arith.mulf %750, %751 : vector<2x32xf32>
    %753 = arith.addf %749, %752 : vector<2x32xf32>
    %754 = vector.extract_strided_slice %746 {offsets = [0, 96], sizes = [2, 32], strides = [1, 1]} : vector<2x128xf32> to vector<2x32xf32>
    %755 = math.tanh %753 : vector<2x32xf32>
    %756 = arith.mulf %754, %755 : vector<2x32xf32>
    %757 = tpu.concatenate %756, %730 in 1 : vector<2x32xf32>, vector<2x32xf32> -> vector<2x64xf32>
    %c168_150 = arith.constant 168 : index
    %c0_151 = arith.constant 0 : index
    %758 = vector.load %arg1[%c168_150, %c0_151] : memref<240x128xf32, #tpu.memory_space<vmem>>, vector<64x128xf32>
    %cst_152 = arith.constant dense<0.000000e+00> : vector<2x128xf32>
    %759 = tpu.matmul %757, %758, %cst_152 {dimension_numbers = #tpu.dot_dimension_numbers<[1], [0], [0], [1], [0, 0, 1, 1], [], []>} : vector<2x64xf32>, vector<64x128xf32>, vector<2x128xf32> -> vector<2x128xf32>
    %760 = vector.broadcast %6 : vector<1x128xf32> to vector<2x128xf32>
    %761 = arith.addf %759, %760 : vector<2x128xf32>
    %762 = arith.negf %761 : vector<2x128xf32>
    %763 = math.exp %762 : vector<2x128xf32>
    %cst_153 = arith.constant 1.000000e+00 : f32
    %764 = vector.broadcast %cst_153 : f32 to vector<2x128xf32>
    %765 = arith.addf %764, %763 : vector<2x128xf32>
    %766 = arith.divf %764, %765 : vector<2x128xf32>
    %767 = math.tanh %761 : vector<2x128xf32>
    %768 = vector.extract_strided_slice %766 {offsets = [0, 32], sizes = [2, 32], strides = [1, 1]} : vector<2x128xf32> to vector<2x32xf32>
    %769 = arith.mulf %768, %727 : vector<2x32xf32>
    %770 = vector.extract_strided_slice %766 {offsets = [0, 0], sizes = [2, 32], strides = [1, 1]} : vector<2x128xf32> to vector<2x32xf32>
    %771 = vector.extract_strided_slice %767 {offsets = [0, 64], sizes = [2, 32], strides = [1, 1]} : vector<2x128xf32> to vector<2x32xf32>
    %772 = arith.mulf %770, %771 : vector<2x32xf32>
    %773 = arith.addf %769, %772 : vector<2x32xf32>
    %774 = vector.extract_strided_slice %766 {offsets = [0, 96], sizes = [2, 32], strides = [1, 1]} : vector<2x128xf32> to vector<2x32xf32>
    %775 = math.tanh %773 : vector<2x32xf32>
    %776 = arith.mulf %774, %775 : vector<2x32xf32>
    %777 = vector.broadcast %14 : vector<1x32xf32> to vector<2x32xf32>
    %778 = arith.mulf %776, %777 : vector<2x32xf32>
    %cst_154 = arith.constant dense<0.000000e+00> : vector<2xf32>
    %779 = vector.multi_reduction <add>, %778, %cst_154 [1] : vector<2x32xf32> to vector<2xf32>
    %780 = vector.shape_cast %779 : vector<2xf32> to vector<2x1xf32>
    %781 = vector.broadcast %15 : vector<1x1xf32> to vector<2x1xf32>
    %782 = arith.addf %780, %781 : vector<2x1xf32>
    %783 = tpu.concatenate %598, %644, %690, %736, %782 in 1 : vector<2x1xf32>, vector<2x1xf32>, vector<2x1xf32>, vector<2x1xf32>, vector<2x1xf32> -> vector<2x5xf32>
    %c0_155 = arith.constant 0 : index
    %c0_156 = arith.constant 0 : index
    %784 = vector.load %arg3[%c0_155, %c0_156] : memref<2x5xf32, #tpu.memory_space<vmem>>, vector<2x5xf32>
    tpu.vector_store %arg3[%c0_155, %c0_156], %783 {strides = array<i32>} : memref<2x5xf32, #tpu.memory_space<vmem>>, vector<2x5xf32>,
    return
  }
}

</mosaic_0001>

<bundles_post_ra>
// kernel: tpu_custom_call.1
= control target key start
LH: loop header
LB: loop body
LE: loop exit
PB: predicated region body
PF: predicated region fallthrough
CT: control target
= control target key end

     0   :  { %10 = vsyncpa [#allocation3], 0  ;;  %s6638_s0 = inlined_call_operand.vmem [shape: f32[16,4], index: 0, kind: input, shape index: {}]   ;;  %s6639_s1 = inlined_call_operand.hbm [shape: f32[240,128], index: 1, kind: input, shape index: {}]   ;;  %s6640_s2 = inlined_call_operand.vmem [shape: f32[112,32], index: 2, kind: input, shape index: {}]   ;;  %s6641_s3 = inlined_call_operand.hbm [shape: f32[2,5], index: 3, kind: output, shape index: {0}]   ;;  %s6642_s4 = inlined_call_operand.hbm [shape: f32[2,32], index: 4, kind: output, shape index: {1}]  }
   0x1   :  { %11 = vsyncpa [#allocation4], 0 }
   0x2   :  { %12 = vsyncpa [#allocation7], 0  ;;  %s5619_s15 = smov [#allocation2]   ;;  %s5547_s19 = scalar_lea.hbm %s6639_s1, 3840 }
   0x3   :  { %s20_s16 = sshll.u32 %s5619_s15, 4  ;;  %p5548_p0 = scmp.ne.s32.totalorder %s6639_s1, %s5547_s19  ;;  %s21_s16 = int_to_ptr.vmem [resolvable:$true] %s20_s16 }
   0x4   :  { %p5551_p1 = scmp.lt.u32.totalorder %s5547_s19, %s6639_s1 }
   0x6   :  { %p5553_p2 = pnand %p5551_p1, %p5548_p0 }
   0x8   :  { %5556 = shalt.err (!%p5553_p2)
}
   0x9   :  { %s5557_s24 = scalar_lea.vmem %s21_s16, 3840  ;;  %p5562_p4 = scmp.lt.s32.totalorder %s21_s16, %s21_s16 }
   0xa   :  { %p5558_p3 = scmp.ne.s32.totalorder %s21_s16, %s5557_s24  ;;  %p5563_p5 = scmp.lt.s32.totalorder %s5557_s24, %s5557_s24 }
   0xc   :  { %p5564_p6 = por %p5563_p5, %p5562_p4 }
   0xe   :  { %p5565_p7 = pnand %p5564_p6, %p5558_p3 }
  0x10   :  { %5568 = shalt.err (!%p5565_p7)
}
  0x11   :  { %s5620_s25 = smov 128   ;;  %s5621_s26 = smov 8  }
  0x12   :  { %26 = dma.hbm_to_vmem [thread:$0]  %s6639_s1, 3840, %s21_s16, [#allocation3], %s5620_s25, %s5620_s25, %s5621_s26  }
  0x13   :  { %5613 = dma.done.wait [#allocation3], 3840  }
  0x14   :  { %5614 = vsyncadd [#allocation3], 4294963456  ;;  %v5622_v0 = vmov 0.0|0.0   ;;  %vm5623_vm0 = vmmov 0   ;;  %v5624_v1 = vmov 0.0   ;;  %vm61_vm1 = vcmask 1043456  }
  0x15   :  { %4955 = vmatprep.subr.bf16.mxu1 %v5622_v0  ;;  %4435 = vmatprep.mubr.msk.f32.mxu1 %vm5623_vm0, %v5624_v1  ;;  %vm54_vm2 = vcmask 31744   ;;  %v46_v2 = vld [vmem:[%s6640_s2 + $0x68] sm:$0xf]  ;;  %v5689_v3 = vld [vmem:[%s6638_s0] sm:$0xff]  ;;  %v43_v7 = vld [vmem:[%s6640_s2 + $0x50] sm:$0xff]  ;;  %vm214_vm3 = vcmask 25600   ;;  %v233_v37 = vlaneseq }
  0x16   :  { %v5694_v4 = vld [vmem:[%s6638_s0 + $0x8] sm:$0xff]  ;;  %4390 = vmatprep.subr.msk.mxu0 %vm61_vm1, %v46_v2  ;;  %4392 = vmatprep.mubr.msk.f32.mxu0 %vm54_vm2, %v5689_v3  ;;  %v41_v5 = vld [vmem:[%s6640_s2 + $0x40] sm:$0xff]  ;;  %v44_v9 = vld [vmem:[%s6640_s2 + $0x58] sm:$0xff]  ;;  %vm237_vm4 = vcmask 293888   ;;  %s5625_s18 = smov 64   ;;  %s5626_s19 = smov 32  }
  0x17   :  { %v42_v6 = vld [vmem:[%s6640_s2 + $0x48] sm:$0xff]  ;;  %4391 = vmatpush3.msk.msra.mxu0 %vm61_vm1, %v46_v2  ;;  %v5718_v10 = vpack.c.bf16 %v44_v9, %v43_v7  ;;  %v228_v25 = vld [vmem:[#allocation2] sm:$0xff]  ;;  %v230_v27 = vld [vmem:[#allocation2 + $0x10] sm:$0xff]  ;;  %v5760_v38 = vshrl.u32 %v233_v37, 7  ;;  %vm140_vm5 = vcmask 261120   ;;  %vm355_vm6 = vcmask 523264  }
  0x18   :  { %v5709_v8 = vpack.c.bf16 %v42_v6, %v41_v5  ;;  %4393 = vmatmul.mubr.msk.f32.vlgmr.msra.gmra.mrb[0].mxu0 %vm54_vm2, %v5694_v4  ;;  %4943 = vmatprep.subr.bf16.mxu0 %v5622_v0  ;;  %v4056_v11 = vld [vmem:[%s6640_s2 + $0x6c] ss:$0 sm:$0xff]  ;;  %v231_v29 = vld [vmem:[#allocation2 + $0x18] sm:$0xff]  ;;  %v5746_v31 = vld [vmem:[#allocation2 + $0x20] sm:$0xf]  ;;  %s5627_s20 = smov 36  }
  0x19   :  { %4403 = vmatprep.mubr.msk.f32.mxu0 %vm5623_vm0, %v5624_v1  ;;  %v229_v26 = vld [vmem:[#allocation2 + $0x8] sm:$0xff]  ;;  %v5741_v30 = vpack.c.bf16 %v231_v29, %v230_v27  ;;  %v235_v39 = vsub.s32 1, %v5760_v38  ;;  %v344_v56 = vld [vmem:[#allocation2 + $0x30] sm:$0xff]  ;;  %v345_v57 = vld [vmem:[#allocation2 + $0x38] sm:$0xff]  ;;  %vm2543_vm7 = vcmask 1041408   ;;  %vm2546_vm8 = vcmask 1045504  }
  0x1a   :  { %4945 = vmatpush3.bf16.msra.mxu0 %v5709_v8  ;;  %v5738_v28 = vpack.c.bf16 %v229_v26, %v228_v25  ;;  %v5763_v40 = vld [vmem:[#allocation2 + $0xe8] sm:$0xff]  ;;  %v346_v59 = vld [vmem:[#allocation2 + $0x40] sm:$0xff]  ;;  %v348_v62 = vld [vmem:[#allocation2 + $0x50] sm:$0xff]  ;;  %vm2735_vm9 = vcmask 257026   ;;  %vm2739_vm10 = vcmask 259076   ;;  %vm2731_vm11 = vcmask 254976  }
  0x1b   :  { %4946 = vmatprep.subr.bf16.mxu0 %v5622_v0  ;;  %v5768_v41 = vrot.slane %v5763_v40, %v235_v39  ;;  %v343_v55 = vld [vmem:[#allocation2 + $0x28] sm:$0xff]  ;;  %v5779_v60 = vpack.c.bf16 %v346_v59, %v345_v57  ;;  %v349_v2 = vld [vmem:[#allocation2 + $0x58] sm:$0xff]  ;;  %v350_v5 = vld [vmem:[#allocation2 + $0x60] sm:$0xff]  ;;  %vm2743_vm12 = vcmask 261126   ;;  %vm2778_vm13 = vcmask 7168   ;;  %s5637_s13 = smov 1  }
  0x1c   :  { %v5776_v58 = vpack.c.bf16 %v344_v56, %v343_v55  ;;  %v347_v61 = vld [vmem:[#allocation2 + $0x48] sm:$0xff]  ;;  %v5788_v7 = vpack.c.bf16 %v350_v5, %v349_v2  ;;  %vm2780_vm14 = vcmask 15360   ;;  %vm2782_vm15 = vcmask 23552   ;;  %s5638_s14 = smov 2   ;;  %s5639_s15 = smov 3  }
  0x1d   :  { %v5783_v63 = vpack.c.bf16 %v348_v62, %v347_v61  ;;  %s5640_s16 = smov 4   ;;  %s5641_s17 = smov [#allocation5]  }
  0x1e   :  { %4948 = vmatpush3.bf16.msra.mxu0 %v5718_v10  ;;  %4957 = vmatpush3.bf16.msra.mxu1 %v5776_v58 }
  0x1f   :  { %4949 = vmatprep.subr.bf16.mxu0 %v5622_v0  ;;  %4958 = vmatprep.subr.bf16.mxu1 %v5622_v0 }
  0x21   :  { %4404 = vmatmul.mubr.f32.vlgmr.msra.gmra.mrb[2].mxu0 %v5624_v1 }
  0x22   :  { %4416 = vmatprep.mubr.msk.f32.mxu0 %vm5623_vm0, %v5624_v1  ;;  %4951 = vmatpush3.bf16.msra.mxu0 %v5738_v28 }
  0x23   :  { %4952 = vmatprep.subr.bf16.mxu0 %v5622_v0  ;;  %4960 = vmatpush3.bf16.msra.mxu1 %v5779_v60 }
  0x24   :  { %4961 = vmatprep.subr.bf16.mxu1 %v5622_v0 }
  0x26   :  { %4954 = vmatpush3.bf16.msra.mxu0 %v5741_v30 }
  0x27   :  { %4414 = vmatprep.subr.mxu0 %v5624_v1  ;;  %4963 = vmatpush3.bf16.msra.mxu1 %v5783_v63 }
  0x28   :  { %4964 = vmatprep.subr.bf16.mxu1 %v5622_v0 }
  0x2a   :  { %4415 = vmatpush3.msk.msra.mxu0 %vm61_vm1, %v5746_v31 }
  0x2b   :  { %4967 = vmatprep.subr.bf16.mxu0 %v5622_v0  ;;  %4966 = vmatpush3.bf16.msra.mxu1 %v5788_v7 }
  0x2c   :  { %4979 = vmatprep.subr.bf16.mxu1 %v5622_v0 }
  0xeb   :  { %v4394_v12 = vpop.f32.mrb[0].mxu0 }
  0xec   :  { %v5731_v13 = vadd.f32 %v4394_v12, %v4056_v11  ;;  %v131_v14 = vpop.f32.mrb[1].mxu0 }
  0xed   :  { %v5733_v15 = vadd.f32 %v4056_v11, %v131_v14 }
  0xf4   :  { %v210_v16 = vpop.f32.mrb[2].mxu0 }
  0xf5   :  { %v211_v17 = vadd.f32 %v210_v16, %v5733_v15  ;;  %v4405_v18 = vpop.f32.mrb[3].mxu0  ;;  %v353_v16 = vsub.s32 2, %v5760_v38 }
  0xf7   :  { %v215_v19 = vsel %vm214_vm3, %v211_v17, -inf }
  0xf8   :  { %216 = vmax.xlane.f32.xlu0 %v215_v19 }
 0x185   :  { %v217_v20 = vpop.xlane.xlu0 %216 }
 0x186   :  { %v218_v21 = vsub.f32 %v211_v17, %v217_v20  ;;  %v5813_v17 = vrot.slane %v5763_v40, %v353_v16  ;;  %v457_v40 = vrot.slane %v5733_v15, 2 }
 0x188   :  { %v219_v22 = vmul.f32 1.442695, %v218_v21 }
 0x18a   :  { %5296 = vpow2.f32 %v219_v22 }
 0x194   :  { %v5297_v23 = vpop.eup %5296 }
 0x195   :  { %v221_v24 = vsel %vm214_vm3, %v5297_v23, 0.0 }
 0x196   :  { %222 = vadd.xlane.f32.xlu0 %v221_v24 }
 0x223   :  { %v223_v32 = vpop.xlane.xlu0 %222 }
 0x224   :  { %5298 = vrcp.f32 %v223_v32 }
 0x22e   :  { %v5299_v33 = vpop.eup %5298 }
 0x22f   :  { %v225_v34 = vmul.f32 %v5299_v33, %v5297_v23 }
 0x231   :  { %v226_v35 = vmul.f32 %v225_v34, %v5689_v3 }
 0x233   :  { %v227_v36 = vsel %vm54_vm2, %v226_v35, 0.0 }
 0x234   :  { %4417 = vmatmul.mubr.msk.f32.vlgmr.msra.gmra.mrb[4].mxu0 %vm237_vm4, %v227_v36 }
 0x235   :  { %4969 = vmatpush3.bf16.msra.mxu0 %v5709_v8  ;;  %4446 = vmatprep.mubr.msk.f32.mxu0 %vm5623_vm0, %v5624_v1 }
 0x236   :  { %4970 = vmatprep.subr.bf16.mxu0 %v5622_v0 }
 0x239   :  { %4972 = vmatpush3.bf16.msra.mxu0 %v5718_v10 }
 0x23a   :  { %4973 = vmatprep.subr.bf16.mxu0 %v5622_v0 }
 0x307   :  { %v310_v42 = vpop.f32.mrb[4].mxu0 }
 0x308   :  { %v311_v43 = vadd.f32 %v310_v42, %v5768_v41  ;;  %v4418_v44 = vpop.f32.mrb[5].mxu0 }
 0x30a   :  { %5300 = vtanh.f32 %v311_v43  ;;  %v4062_v46 = vmul.f32 -1.442695, %v311_v43 }
 0x30c   :  { %5302 = vpow2.f32 %v4062_v46 }
 0x314   :  { %v5301_v45 = vpop.eup %5300 }
 0x315   :  { %323 = vrot.lane.b32.xlu1 %v5301_v45, %s5625_s18 }
 0x316   :  { %v5303_v47 = vpop.eup %5302 }
 0x317   :  { %v317_v48 = vadd.f32 1.0, %v5303_v47 }
 0x319   :  { %5304 = vrcp.f32 %v317_v48 }
 0x323   :  { %v5305_v49 = vpop.eup %5304 }
 0x324   :  { %v321_v52 = vmul.f32 0.0, %v5305_v49 }
 0x387   :  { %v324_v50 = vpop.permute.xlu1 %323 }
 0x388   :  { %v326_v51 = vmul.f32 %v5305_v49, %v324_v50 }
 0x38a   :  { %328 = vrot.lane.b32.xlu1 %v326_v51, %s5626_s19 }
 0x3fc   :  { %v329_v53 = vpop.permute.xlu1 %328 }
 0x3fd   :  { %v5773_v54 = vadd.f32 %v329_v53, %v321_v52  ;;  %v542_v52 = vrot.slane %v5689_v3, 2 }
 0x3ff   :  { %5306 = vtanh.f32 %v5773_v54 }
 0x409   :  { %v5307_v6 = vpop.eup %5306 }
 0x40a   :  { %334 = vrot.lane.b32.xlu0 %v5307_v6, %s5625_s18 }
 0x47c   :  { %v335_v9 = vpop.permute.xlu0 %334 }
 0x47d   :  { %v5793_v11 = vmul.f32 %v5305_v49, %v335_v9 }
 0x47f   :  { %339 = vrot.lane.b32.xlu1 %v5793_v11, %s5626_s19 }
 0x4f1   :  { %v340_v12 = vpop.permute.xlu1 %339 }
 0x4f2   :  { %v342_v14 = vsel %vm140_vm5, %v340_v12, 0.0 }
 0x4f3   :  { %4436 = vmatmul.mubr.msk.f32.vlgmr.msra.gmra.mrb[0].mxu1 %vm355_vm6, %v342_v14 }
 0x4f4   :  { %4981 = vmatpush3.bf16.msra.mxu1 %v5776_v58  ;;  %4478 = vmatprep.mubr.msk.f32.mxu1 %vm5623_vm0, %v5624_v1 }
 0x4f5   :  { %4982 = vmatprep.subr.bf16.mxu1 %v5622_v0 }
 0x4f8   :  { %4984 = vmatpush3.bf16.msra.mxu1 %v5779_v60 }
 0x4f9   :  { %4985 = vmatprep.subr.bf16.mxu1 %v5622_v0 }
 0x4fc   :  { %4987 = vmatpush3.bf16.msra.mxu1 %v5783_v63 }
 0x4fd   :  { %4988 = vmatprep.subr.bf16.mxu1 %v5622_v0 }
 0x500   :  { %4990 = vmatpush3.bf16.msra.mxu1 %v5788_v7 }
 0x501   :  { %5003 = vmatprep.subr.bf16.mxu1 %v5622_v0 }
 0x5c6   :  { %v425_v18 = vpop.f32.mrb[0].mxu1 }
 0x5c7   :  { %v426_v19 = vadd.f32 %v425_v18, %v5813_v17  ;;  %v4437_v20 = vpop.f32.mrb[1].mxu1 }
 0x5c9   :  { %5308 = vtanh.f32 %v426_v19  ;;  %v4064_v22 = vmul.f32 -1.442695, %v426_v19 }
 0x5cb   :  { %5310 = vpow2.f32 %v4064_v22 }
 0x5d3   :  { %v5309_v21 = vpop.eup %5308 }
 0x5d4   :  { %438 = vrot.lane.b32.xlu1 %v5309_v21, %s5625_s18 }
 0x5d5   :  { %v5311_v23 = vpop.eup %5310 }
 0x5d6   :  { %v432_v24 = vadd.f32 1.0, %v5311_v23 }
 0x5d8   :  { %5312 = vrcp.f32 %v432_v24 }
 0x5e2   :  { %v5313_v25 = vpop.eup %5312 }
 0x5e3   :  { %v436_v29 = vmul.f32 0.0, %v5313_v25 }
 0x646   :  { %v439_v26 = vpop.permute.xlu1 %438 }
 0x647   :  { %v441_v27 = vmul.f32 %v5313_v25, %v439_v26 }
 0x649   :  { %443 = vrot.lane.b32.xlu1 %v441_v27, %s5626_s19 }
 0x6bb   :  { %v444_v32 = vpop.permute.xlu1 %443 }
 0x6bc   :  { %v5818_v33 = vadd.f32 %v444_v32, %v436_v29 }
 0x6be   :  { %5314 = vtanh.f32 %v5818_v33 }
 0x6c8   :  { %v5315_v34 = vpop.eup %5314 }
 0x6c9   :  { %449 = vrot.lane.b32.xlu1 %v5315_v34, %s5625_s18 }
 0x73b   :  { %v450_v35 = vpop.permute.xlu1 %449 }
 0x73c   :  { %v5822_v36 = vmul.f32 %v5313_v25, %v450_v35 }
 0x73e   :  { %454 = vrot.lane.b32.xlu1 %v5822_v36, %s5626_s19 }
 0x7b0   :  { %v455_v37 = vpop.permute.xlu1 %454 }
 0x7b1   :  { %4447 = vmatmul.mubr.msk.f32.vlgmr.msra.gmra.mrb[6].mxu0 %vm140_vm5, %v455_v37 }
 0x7b2   :  { %4975 = vmatpush3.bf16.msra.mxu0 %v5738_v28  ;;  %4459 = vmatprep.mubr.msk.f32.mxu0 %vm5623_vm0, %v5624_v1 }
 0x7b3   :  { %4976 = vmatprep.subr.bf16.mxu0 %v5622_v0 }
 0x7b6   :  { %4978 = vmatpush3.bf16.msra.mxu0 %v5741_v30 }
 0x7b7   :  { %4457 = vmatprep.subr.mxu0 %v5624_v1 }
 0x7ba   :  { %4458 = vmatpush3.msk.msra.mxu0 %vm61_vm1, %v5746_v31 }
 0x7bb   :  { %4991 = vmatprep.subr.bf16.mxu0 %v5622_v0 }
 0x884   :  { %v527_v42 = vpop.f32.mrb[6].mxu0 }
 0x885   :  { %v528_v43 = vadd.f32 %v527_v42, %v457_v40  ;;  %v4448_v44 = vpop.f32.mrb[7].mxu0 }
 0x887   :  { %v531_v45 = vsel %vm214_vm3, %v528_v43, -inf }
 0x888   :  { %532 = vmax.xlane.f32.xlu1 %v531_v45 }
 0x915   :  { %v533_v46 = vpop.xlane.xlu1 %532 }
 0x916   :  { %v534_v47 = vsub.f32 %v528_v43, %v533_v46 }
 0x918   :  { %v535_v48 = vmul.f32 1.442695, %v534_v47 }
 0x91a   :  { %5316 = vpow2.f32 %v535_v48 }
 0x924   :  { %v5317_v49 = vpop.eup %5316 }
 0x925   :  { %v537_v50 = vsel %vm214_vm3, %v5317_v49, 0.0 }
 0x926   :  { %538 = vadd.xlane.f32.xlu0 %v537_v50 }
 0x93c   :  { %545 = vrot.lane.b32.xlu0 %v5793_v11, %s5627_s20 }
 0x9b3   :  { %v539_v51 = vpop.xlane.xlu0 %538 }
 0x9b4   :  { %5318 = vrcp.f32 %v539_v51 }
 0x9b7   :  { %v546_v57 = vpop.permute.xlu0 %545 }
 0x9be   :  { %v5319_v53 = vpop.eup %5318 }
 0x9bf   :  { %v541_v55 = vmul.f32 %v5319_v53, %v5317_v49 }
 0x9c1   :  { %v544_v56 = vmul.f32 %v542_v52, %v541_v55 }
 0x9c3   :  { %v548_v59 = vsel %vm54_vm2, %v544_v56, %v546_v57 }
 0x9c4   :  { %4460 = vmatmul.mubr.msk.f32.vlgmr.msra.gmra.mrb[8].mxu0 %vm237_vm4, %v548_v59 }
 0x9c5   :  { %4993 = vmatpush3.bf16.msra.mxu0 %v5709_v8  ;;  %4489 = vmatprep.mubr.msk.f32.mxu0 %vm5623_vm0, %v5624_v1 }
 0x9c6   :  { %4994 = vmatprep.subr.bf16.mxu0 %v5622_v0 }
 0x9c9   :  { %4996 = vmatpush3.bf16.msra.mxu0 %v5718_v10 }
 0x9ca   :  { %4997 = vmatprep.subr.bf16.mxu0 %v5622_v0 }
 0xa97   :  { %v618_v61 = vpop.f32.mrb[8].mxu0 }
 0xa98   :  { %v619_v62 = vadd.f32 %v618_v61, %v5768_v41  ;;  %v4461_v2 = vpop.f32.mrb[9].mxu0 }
 0xa9a   :  { %5320 = vtanh.f32 %v619_v62  ;;  %v4068_v6 = vmul.f32 -1.442695, %v619_v62 }
 0xa9c   :  { %5322 = vpow2.f32 %v4068_v6  ;;  %v839_v6 = vrot.slane %v5689_v3, 4 }
 0xaa4   :  { %v5321_v5 = vpop.eup %5320 }
 0xaa5   :  { %631 = vrot.lane.b32.xlu1 %v5321_v5, %s5625_s18 }
 0xaa6   :  { %v5323_v9 = vpop.eup %5322 }
 0xaa7   :  { %v625_v11 = vadd.f32 1.0, %v5323_v9 }
 0xaa9   :  { %5324 = vrcp.f32 %v625_v11 }
 0xab3   :  { %v5325_v12 = vpop.eup %5324 }
 0xab4   :  { %v629_v19 = vmul.f32 %v5325_v12, %v5773_v54 }
 0xb17   :  { %v632_v14 = vpop.permute.xlu1 %631 }
 0xb18   :  { %v634_v18 = vmul.f32 %v5325_v12, %v632_v14 }
 0xb1a   :  { %636 = vrot.lane.b32.xlu1 %v634_v18, %s5626_s19 }
 0xb8c   :  { %v637_v20 = vpop.permute.xlu1 %636 }
 0xb8d   :  { %v5854_v21 = vadd.f32 %v637_v20, %v629_v19 }
 0xb8f   :  { %5326 = vtanh.f32 %v5854_v21 }
 0xb99   :  { %v5327_v22 = vpop.eup %5326 }
 0xb9a   :  { %642 = vrot.lane.b32.xlu0 %v5327_v22, %s5625_s18 }
 0xb9e   :  { %650 = vrot.lane.b32.xlu0 %v5822_v36, %s5625_s18 }
 0xc0c   :  { %v643_v23 = vpop.permute.xlu0 %642 }
 0xc0d   :  { %v645_v24 = vmul.f32 %v5325_v12, %v643_v23 }
 0xc0f   :  { %647 = vrot.lane.b32.xlu1 %v645_v24, %s5626_s19 }
 0xc10   :  { %v651_v25 = vpop.permute.xlu0 %650 }
 0xc81   :  { %v648_v26 = vpop.permute.xlu1 %647 }
 0xc82   :  { %v653_v27 = vsel %vm140_vm5, %v648_v26, %v651_v25 }
 0xc83   :  { %4479 = vmatmul.mubr.msk.f32.vlgmr.msra.gmra.mrb[2].mxu1 %vm355_vm6, %v653_v27 }
 0xc84   :  { %5005 = vmatpush3.bf16.msra.mxu1 %v5776_v58  ;;  %4521 = vmatprep.mubr.msk.f32.mxu1 %vm5623_vm0, %v5624_v1 }
 0xc85   :  { %5006 = vmatprep.subr.bf16.mxu1 %v5622_v0 }
 0xc88   :  { %5008 = vmatpush3.bf16.msra.mxu1 %v5779_v60 }
 0xc89   :  { %5009 = vmatprep.subr.bf16.mxu1 %v5622_v0 }
 0xc8c   :  { %5011 = vmatpush3.bf16.msra.mxu1 %v5783_v63 }
 0xc8d   :  { %5012 = vmatprep.subr.bf16.mxu1 %v5622_v0 }
 0xc90   :  { %5014 = vmatpush3.bf16.msra.mxu1 %v5788_v7 }
 0xc91   :  { %5027 = vmatprep.subr.bf16.mxu1 %v5622_v0 }
 0xd56   :  { %v723_v54 = vpop.f32.mrb[2].mxu1 }
 0xd57   :  { %v724_v29 = vadd.f32 %v723_v54, %v5813_v17  ;;  %v4480_v32 = vpop.f32.mrb[3].mxu1 }
 0xd59   :  { %5328 = vtanh.f32 %v724_v29  ;;  %v4070_v35 = vmul.f32 -1.442695, %v724_v29 }
 0xd5b   :  { %5330 = vpow2.f32 %v4070_v35 }
 0xd63   :  { %v5329_v34 = vpop.eup %5328 }
 0xd64   :  { %736 = vrot.lane.b32.xlu1 %v5329_v34, %s5625_s18 }
 0xd65   :  { %v5331_v37 = vpop.eup %5330 }
 0xd66   :  { %v730_v40 = vadd.f32 1.0, %v5331_v37 }
 0xd68   :  { %5332 = vrcp.f32 %v730_v40 }
 0xd72   :  { %v5333_v42 = vpop.eup %5332 }
 0xd73   :  { %v734_v45 = vmul.f32 %v5333_v42, %v5818_v33  ;;  %v754_v33 = vrot.slane %v5733_v15, 4 }
 0xdd6   :  { %v737_v43 = vpop.permute.xlu1 %736 }
 0xdd7   :  { %v739_v44 = vmul.f32 %v5333_v42, %v737_v43 }
 0xdd9   :  { %741 = vrot.lane.b32.xlu0 %v739_v44, %s5626_s19 }
 0xe4b   :  { %v742_v46 = vpop.permute.xlu0 %741 }
 0xe4c   :  { %v5877_v47 = vadd.f32 %v742_v46, %v734_v45 }
 0xe4e   :  { %5334 = vtanh.f32 %v5877_v47 }
 0xe58   :  { %v5335_v48 = vpop.eup %5334 }
 0xe59   :  { %747 = vrot.lane.b32.xlu1 %v5335_v48, %s5625_s18 }
 0xecb   :  { %v748_v49 = vpop.permute.xlu1 %747 }
 0xecc   :  { %v5881_v50 = vmul.f32 %v5333_v42, %v748_v49 }
 0xece   :  { %752 = vrot.lane.b32.xlu0 %v5881_v50, %s5626_s19 }
 0xf40   :  { %v753_v51 = vpop.permute.xlu0 %752 }
 0xf41   :  { %4490 = vmatmul.mubr.msk.f32.vlgmr.msra.gmra.mrb[10].mxu0 %vm140_vm5, %v753_v51 }
 0xf42   :  { %4999 = vmatpush3.bf16.msra.mxu0 %v5738_v28  ;;  %4502 = vmatprep.mubr.msk.f32.mxu0 %vm5623_vm0, %v5624_v1 }
 0xf43   :  { %5000 = vmatprep.subr.bf16.mxu0 %v5622_v0 }
 0xf46   :  { %5002 = vmatpush3.bf16.msra.mxu0 %v5741_v30 }
 0xf47   :  { %4500 = vmatprep.subr.mxu0 %v5624_v1 }
 0xf4a   :  { %4501 = vmatpush3.msk.msra.mxu0 %vm61_vm1, %v5746_v31 }
 0xf4b   :  { %5015 = vmatprep.subr.bf16.mxu0 %v5622_v0 }
0x1014   :  { %v824_v52 = vpop.f32.mrb[10].mxu0 }
0x1015   :  { %v825_v53 = vadd.f32 %v824_v52, %v754_v33  ;;  %v4491_v55 = vpop.f32.mrb[11].mxu0 }
0x1017   :  { %v828_v56 = vsel %vm214_vm3, %v825_v53, -inf }
0x1018   :  { %829 = vmax.xlane.f32.xlu1 %v828_v56 }
0x10a5   :  { %v830_v57 = vpop.xlane.xlu1 %829 }
0x10a6   :  { %v831_v59 = vsub.f32 %v825_v53, %v830_v57 }
0x10a8   :  { %v832_v61 = vmul.f32 1.442695, %v831_v59 }
0x10aa   :  { %5336 = vpow2.f32 %v832_v61 }
0x10b4   :  { %v5337_v62 = vpop.eup %5336 }
0x10b5   :  { %v834_v2 = vsel %vm214_vm3, %v5337_v62, 0.0 }
0x10b6   :  { %835 = vadd.xlane.f32.xlu0 %v834_v2 }
0x10cc   :  { %842 = vrot.lane.b32.xlu0 %v645_v24, %s5627_s20 }
0x1143   :  { %v836_v5 = vpop.xlane.xlu0 %835 }
0x1144   :  { %5338 = vrcp.f32 %v836_v5 }
0x1147   :  { %v843_v14 = vpop.permute.xlu0 %842 }
0x114e   :  { %v5339_v9 = vpop.eup %5338 }
0x114f   :  { %v838_v11 = vmul.f32 %v5339_v9, %v5337_v62 }
0x1151   :  { %v841_v12 = vmul.f32 %v839_v6, %v838_v11 }
0x1153   :  { %v845_v18 = vsel %vm54_vm2, %v841_v12, %v843_v14 }
0x1154   :  { %4503 = vmatmul.mubr.msk.f32.vlgmr.msra.gmra.mrb[12].mxu0 %vm237_vm4, %v845_v18 }
0x1155   :  { %5017 = vmatpush3.bf16.msra.mxu0 %v5709_v8  ;;  %4532 = vmatprep.mubr.msk.f32.mxu0 %vm5623_vm0, %v5624_v1 }
0x1156   :  { %5018 = vmatprep.subr.bf16.mxu0 %v5622_v0 }
0x1159   :  { %5020 = vmatpush3.bf16.msra.mxu0 %v5718_v10 }
0x115a   :  { %5021 = vmatprep.subr.bf16.mxu0 %v5622_v0 }
0x1227   :  { %v915_v19 = vpop.f32.mrb[12].mxu0 }
0x1228   :  { %v916_v20 = vadd.f32 %v915_v19, %v5768_v41  ;;  %v4504_v22 = vpop.f32.mrb[13].mxu0 }
0x122a   :  { %5340 = vtanh.f32 %v916_v20  ;;  %v4074_v24 = vmul.f32 -1.442695, %v916_v20 }
0x122c   :  { %5342 = vpow2.f32 %v4074_v24 }
0x1234   :  { %v5341_v23 = vpop.eup %5340 }
0x1235   :  { %928 = vrot.lane.b32.xlu1 %v5341_v23, %s5625_s18 }
0x1236   :  { %v5343_v25 = vpop.eup %5342 }
0x1237   :  { %v922_v26 = vadd.f32 1.0, %v5343_v25 }
0x1239   :  { %5344 = vrcp.f32 %v922_v26 }
0x1243   :  { %v5345_v27 = vpop.eup %5344 }
0x1244   :  { %v926_v32 = vmul.f32 %v5345_v27, %v5854_v21 }
0x12a7   :  { %v929_v54 = vpop.permute.xlu1 %928 }
0x12a8   :  { %v931_v29 = vmul.f32 %v5345_v27, %v929_v54 }
0x12aa   :  { %933 = vrot.lane.b32.xlu1 %v931_v29, %s5626_s19 }
0x131c   :  { %v934_v34 = vpop.permute.xlu1 %933 }
0x131d   :  { %v5912_v35 = vadd.f32 %v934_v34, %v926_v32 }
0x131f   :  { %5346 = vtanh.f32 %v5912_v35 }
0x1329   :  { %v5347_v37 = vpop.eup %5346 }
0x132a   :  { %939 = vrot.lane.b32.xlu0 %v5347_v37, %s5625_s18 }
0x132e   :  { %947 = vrot.lane.b32.xlu0 %v5881_v50, %s5625_s18 }
0x139c   :  { %v940_v40 = vpop.permute.xlu0 %939 }
0x139d   :  { %v942_v42 = vmul.f32 %v5345_v27, %v940_v40 }
0x139f   :  { %944 = vrot.lane.b32.xlu1 %v942_v42, %s5626_s19 }
0x13a0   :  { %v948_v43 = vpop.permute.xlu0 %947 }
0x1411   :  { %v945_v44 = vpop.permute.xlu1 %944 }
0x1412   :  { %v950_v45 = vsel %vm140_vm5, %v945_v44, %v948_v43 }
0x1413   :  { %4522 = vmatmul.mubr.msk.f32.vlgmr.msra.gmra.mrb[4].mxu1 %vm355_vm6, %v950_v45 }
0x1414   :  { %5029 = vmatpush3.bf16.msra.mxu1 %v5776_v58  ;;  %4564 = vmatprep.mubr.msk.f32.mxu1 %vm5623_vm0, %v5624_v1 }
0x1415   :  { %5030 = vmatprep.subr.bf16.mxu1 %v5622_v0 }
0x1418   :  { %5032 = vmatpush3.bf16.msra.mxu1 %v5779_v60 }
0x1419   :  { %5033 = vmatprep.subr.bf16.mxu1 %v5622_v0 }
0x141c   :  { %5035 = vmatpush3.bf16.msra.mxu1 %v5783_v63 }
0x141d   :  { %5036 = vmatprep.subr.bf16.mxu1 %v5622_v0 }
0x1420   :  { %5038 = vmatpush3.bf16.msra.mxu1 %v5788_v7 }
0x1421   :  { %5045 = vmatprep.subr.bf16.mxu1 %v5622_v0 }
0x14e6   :  { %v1020_v21 = vpop.f32.mrb[4].mxu1 }
0x14e7   :  { %v1021_v46 = vadd.f32 %v1020_v21, %v5813_v17  ;;  %v4523_v48 = vpop.f32.mrb[5].mxu1 }
0x14e9   :  { %5348 = vtanh.f32 %v1021_v46  ;;  %v4076_v51 = vmul.f32 -1.442695, %v1021_v46 }
0x14eb   :  { %5350 = vpow2.f32 %v4076_v51 }
0x14f3   :  { %v5349_v49 = vpop.eup %5348 }
0x14f4   :  { %1033 = vrot.lane.b32.xlu1 %v5349_v49, %s5625_s18 }
0x14f5   :  { %v5351_v33 = vpop.eup %5350 }
0x14f6   :  { %v1027_v52 = vadd.f32 1.0, %v5351_v33 }
0x14f8   :  { %5352 = vrcp.f32 %v1027_v52 }
0x1502   :  { %v5353_v53 = vpop.eup %5352 }
0x1503   :  { %v1031_v57 = vmul.f32 %v5353_v53, %v5877_v47  ;;  %v1051_v47 = vrot.slane %v5733_v15, 6  ;;  %v1136_v15 = vrot.slane %v5689_v3, 6 }
0x1566   :  { %v1034_v55 = vpop.permute.xlu1 %1033 }
0x1567   :  { %v1036_v56 = vmul.f32 %v5353_v53, %v1034_v55 }
0x1569   :  { %1038 = vrot.lane.b32.xlu0 %v1036_v56, %s5626_s19 }
0x15db   :  { %v1039_v59 = vpop.permute.xlu0 %1038 }
0x15dc   :  { %v5935_v61 = vadd.f32 %v1039_v59, %v1031_v57 }
0x15de   :  { %5354 = vtanh.f32 %v5935_v61 }
0x15e8   :  { %v5355_v62 = vpop.eup %5354 }
0x15e9   :  { %1044 = vrot.lane.b32.xlu1 %v5355_v62, %s5625_s18 }
0x165b   :  { %v1045_v2 = vpop.permute.xlu1 %1044 }
0x165c   :  { %v5939_v5 = vmul.f32 %v5353_v53, %v1045_v2 }
0x165e   :  { %1049 = vrot.lane.b32.xlu0 %v5939_v5, %s5626_s19 }
0x16d0   :  { %v1050_v6 = vpop.permute.xlu0 %1049 }
0x16d1   :  { %4533 = vmatmul.mubr.msk.f32.vlgmr.msra.gmra.mrb[14].mxu0 %vm140_vm5, %v1050_v6 }
0x16d2   :  { %5023 = vmatpush3.bf16.msra.mxu0 %v5738_v28  ;;  %4545 = vmatprep.mubr.msk.f32.mxu0 %vm5623_vm0, %v5624_v1 }
0x16d3   :  { %5024 = vmatprep.subr.bf16.mxu0 %v5622_v0 }
0x16d6   :  { %5026 = vmatpush3.bf16.msra.mxu0 %v5741_v30 }
0x16d7   :  { %4543 = vmatprep.subr.mxu0 %v5624_v1 }
0x16da   :  { %4544 = vmatpush3.msk.msra.mxu0 %vm61_vm1, %v5746_v31 }
0x16db   :  { %5039 = vmatprep.subr.bf16.mxu0 %v5622_v0 }
0x17a4   :  { %v1121_v9 = vpop.f32.mrb[14].mxu0 }
0x17a5   :  { %v1122_v11 = vadd.f32 %v1121_v9, %v1051_v47  ;;  %v4534_v12 = vpop.f32.mrb[15].mxu0 }
0x17a7   :  { %v1125_v14 = vsel %vm214_vm3, %v1122_v11, -inf }
0x17a8   :  { %1126 = vmax.xlane.f32.xlu1 %v1125_v14 }
0x1835   :  { %v1127_v18 = vpop.xlane.xlu1 %1126 }
0x1836   :  { %v1128_v19 = vsub.f32 %v1122_v11, %v1127_v18 }
0x1838   :  { %v1129_v20 = vmul.f32 1.442695, %v1128_v19 }
0x183a   :  { %5356 = vpow2.f32 %v1129_v20 }
0x1844   :  { %v5357_v22 = vpop.eup %5356 }
0x1845   :  { %v1131_v23 = vsel %vm214_vm3, %v5357_v22, 0.0 }
0x1846   :  { %1132 = vadd.xlane.f32.xlu0 %v1131_v23 }
0x185c   :  { %1139 = vrot.lane.b32.xlu0 %v942_v42, %s5627_s20 }
0x18d3   :  { %v1133_v24 = vpop.xlane.xlu0 %1132 }
0x18d4   :  { %5358 = vrcp.f32 %v1133_v24 }
0x18d7   :  { %v1140_v54 = vpop.permute.xlu0 %1139 }
0x18de   :  { %v5359_v25 = vpop.eup %5358 }
0x18df   :  { %v1135_v26 = vmul.f32 %v5359_v25, %v5357_v22 }
0x18e1   :  { %v1138_v27 = vmul.f32 %v1136_v15, %v1135_v26 }
0x18e3   :  { %v1142_v29 = vsel %vm54_vm2, %v1138_v27, %v1140_v54 }
0x18e4   :  { %4546 = vmatmul.mubr.msk.f32.vlgmr.msra.gmra.mrb[16].mxu0 %vm237_vm4, %v1142_v29 }
0x18e5   :  { %5041 = vmatpush3.bf16.msra.mxu0 %v5709_v8  ;;  %4575 = vmatprep.mubr.msk.f32.mxu0 %vm5623_vm0, %v5624_v1 }
0x18e6   :  { %5042 = vmatprep.subr.bf16.mxu0 %v5622_v0 }
0x18e9   :  { %5044 = vmatpush3.bf16.msra.mxu0 %v5718_v10 }
0x18ea   :  { %5051 = vmatprep.subr.bf16.mxu0 %v5622_v0 }
0x19b7   :  { %v1212_v3 = vpop.f32.mrb[16].mxu0 }
0x19b8   :  { %v1213_v32 = vadd.f32 %v1212_v3, %v5768_v41  ;;  %v4547_v34 = vpop.f32.mrb[17].mxu0 }
0x19ba   :  { %5360 = vtanh.f32 %v1213_v32  ;;  %v4080_v40 = vmul.f32 -1.442695, %v1213_v32 }
0x19bc   :  { %5362 = vpow2.f32 %v4080_v40 }
0x19c4   :  { %v5361_v37 = vpop.eup %5360 }
0x19c5   :  { %1225 = vrot.lane.b32.xlu1 %v5361_v37, %s5625_s18 }
0x19c6   :  { %v5363_v42 = vpop.eup %5362 }
0x19c7   :  { %v1219_v43 = vadd.f32 1.0, %v5363_v42 }
0x19c9   :  { %5364 = vrcp.f32 %v1219_v43 }
0x19d3   :  { %v5365_v44 = vpop.eup %5364 }
0x19d4   :  { %v1223_v46 = vmul.f32 %v5365_v44, %v5912_v35 }
0x1a37   :  { %v1226_v45 = vpop.permute.xlu1 %1225 }
0x1a38   :  { %v1228_v21 = vmul.f32 %v5365_v44, %v1226_v45 }
0x1a3a   :  { %1230 = vrot.lane.b32.xlu1 %v1228_v21, %s5626_s19 }
0x1aac   :  { %v1231_v48 = vpop.permute.xlu1 %1230 }
0x1aad   :  { %v5970_v49 = vadd.f32 %v1231_v48, %v1223_v46 }
0x1aaf   :  { %5366 = vtanh.f32 %v5970_v49 }
0x1ab9   :  { %v5367_v51 = vpop.eup %5366 }
0x1aba   :  { %1236 = vrot.lane.b32.xlu0 %v5367_v51, %s5625_s18 }
0x1abe   :  { %1244 = vrot.lane.b32.xlu0 %v5939_v5, %s5625_s18 }
0x1b2c   :  { %v1237_v33 = vpop.permute.xlu0 %1236 }
0x1b2d   :  { %v1239_v52 = vmul.f32 %v5365_v44, %v1237_v33 }
0x1b2f   :  { %1241 = vrot.lane.b32.xlu1 %v1239_v52, %s5626_s19 }
0x1b30   :  { %v1245_v53 = vpop.permute.xlu0 %1244 }
0x1ba1   :  { %v1242_v55 = vpop.permute.xlu1 %1241 }
0x1ba2   :  { %v1247_v56 = vsel %vm140_vm5, %v1242_v55, %v1245_v53 }
0x1ba3   :  { %4565 = vmatmul.mubr.msk.f32.vlgmr.msra.gmra.mrb[6].mxu1 %vm355_vm6, %v1247_v56 }
0x1ba4   :  { %5047 = vmatpush3.bf16.msra.mxu1 %v5738_v28  ;;  %4588 = vmatprep.mubr.msk.f32.mxu1 %vm5623_vm0, %v5624_v1 }
0x1ba5   :  { %5048 = vmatprep.subr.bf16.mxu1 %v5622_v0 }
0x1ba8   :  { %5050 = vmatpush3.bf16.msra.mxu1 %v5741_v30 }
0x1ba9   :  { %4586 = vmatprep.subr.mxu1 %v5624_v1 }
0x1bac   :  { %4587 = vmatpush3.msk.msra.mxu1 %vm61_vm1, %v5746_v31 }
0x1bad   :  { %5063 = vmatprep.subr.bf16.mxu1 %v5622_v0 }
0x1c76   :  { %v1317_v35 = vpop.f32.mrb[6].mxu1 }
0x1c77   :  { %v1318_v57 = vadd.f32 %v1317_v35, %v5813_v17  ;;  %v4566_v59 = vpop.f32.mrb[7].mxu1 }
0x1c79   :  { %5368 = vtanh.f32 %v1318_v57  ;;  %v4082_v2 = vmul.f32 -1.442695, %v1318_v57 }
0x1c7b   :  { %5370 = vpow2.f32 %v4082_v2 }
0x1c83   :  { %v5369_v62 = vpop.eup %5368 }
0x1c84   :  { %1330 = vrot.lane.b32.xlu1 %v5369_v62, %s5625_s18 }
0x1c85   :  { %v5371_v6 = vpop.eup %5370 }
0x1c86   :  { %v1324_v47 = vadd.f32 1.0, %v5371_v6 }
0x1c88   :  { %5372 = vrcp.f32 %v1324_v47 }
0x1c92   :  { %v5373_v9 = vpop.eup %5372 }
0x1c93   :  { %v1328_v14 = vmul.f32 %v5373_v9, %v5935_v61 }
0x1cf6   :  { %v1331_v11 = vpop.permute.xlu1 %1330 }
0x1cf7   :  { %v1333_v12 = vmul.f32 %v5373_v9, %v1331_v11 }
0x1cf9   :  { %1335 = vrot.lane.b32.xlu0 %v1333_v12, %s5626_s19 }
0x1d6b   :  { %v1336_v18 = vpop.permute.xlu0 %1335 }
0x1d6c   :  { %v5992_v19 = vadd.f32 %v1336_v18, %v1328_v14 }
0x1d6e   :  { %5374 = vtanh.f32 %v5992_v19 }
0x1d78   :  { %v5375_v20 = vpop.eup %5374 }
0x1d79   :  { %1341 = vrot.lane.b32.xlu1 %v5375_v20, %s5625_s18 }
0x1deb   :  { %v1342_v22 = vpop.permute.xlu1 %1341 }
0x1dec   :  { %v5996_v23 = vmul.f32 %v5373_v9, %v1342_v22 }
0x1dee   :  { %1346 = vrot.lane.b32.xlu0 %v5996_v23, %s5626_s19 }
0x1e60   :  { %v1347_v24 = vpop.permute.xlu0 %1346 }
0x1e61   :  { %4576 = vmatmul.mubr.msk.f32.vlgmr.msra.gmra.mrb[18].mxu0 %vm140_vm5, %v1347_v24 }
0x1e62   :  { %5053 = vmatpush3.bf16.msra.mxu0 %v5776_v58  ;;  %4607 = vmatprep.mubr.msk.f32.mxu0 %vm5623_vm0, %v5624_v1 }
0x1e63   :  { %5054 = vmatprep.subr.bf16.mxu0 %v5622_v0 }
0x1e66   :  { %5056 = vmatpush3.bf16.msra.mxu0 %v5779_v60 }
0x1e67   :  { %5057 = vmatprep.subr.bf16.mxu0 %v5622_v0 }
0x1e6a   :  { %5059 = vmatpush3.bf16.msra.mxu0 %v5783_v63 }
0x1e6b   :  { %5060 = vmatprep.subr.bf16.mxu0 %v5622_v0 }
0x1e6e   :  { %5062 = vmatpush3.bf16.msra.mxu0 %v5788_v7 }
0x1e6f   :  { %5069 = vmatprep.subr.bf16.mxu0 %v5622_v0 }
0x1f34   :  { %v1416_v61 = vpop.f32.mrb[18].mxu0 }
0x1f35   :  { %v1417_v15 = vadd.f32 %v1416_v61, %v5731_v13  ;;  %v4577_v25 = vpop.f32.mrb[19].mxu0 }
0x1f37   :  { %v1420_v26 = vsel %vm214_vm3, %v1417_v15, -inf }
0x1f38   :  { %1421 = vmax.xlane.f32.xlu1 %v1420_v26 }
0x1fc5   :  { %v1422_v27 = vpop.xlane.xlu1 %1421 }
0x1fc6   :  { %v1423_v54 = vsub.f32 %v1417_v15, %v1422_v27 }
0x1fc8   :  { %v1424_v29 = vmul.f32 1.442695, %v1423_v54 }
0x1fca   :  { %5376 = vpow2.f32 %v1424_v29 }
0x1fd4   :  { %v5377_v3 = vpop.eup %5376 }
0x1fd5   :  { %v1426_v32 = vsel %vm214_vm3, %v5377_v3, 0.0 }
0x1fd6   :  { %1427 = vadd.xlane.f32.xlu0 %v1426_v32 }
0x1fec   :  { %1432 = vrot.lane.b32.xlu0 %v1239_v52, %s5627_s20 }
0x2063   :  { %v1428_v34 = vpop.xlane.xlu0 %1427 }
0x2064   :  { %5378 = vrcp.f32 %v1428_v34 }
0x2067   :  { %v1433_v43 = vpop.permute.xlu0 %1432 }
0x206e   :  { %v5379_v37 = vpop.eup %5378 }
0x206f   :  { %v1430_v40 = vmul.f32 %v5379_v37, %v5377_v3 }
0x2071   :  { %v1431_v42 = vmul.f32 %v1430_v40, %v5694_v4 }
0x2073   :  { %v1435_v44 = vsel %vm54_vm2, %v1431_v42, %v1433_v43 }
0x2074   :  { %4589 = vmatmul.mubr.msk.f32.vlgmr.msra.gmra.mrb[8].mxu1 %vm237_vm4, %v1435_v44 }
0x2075   :  { %5065 = vmatpush3.bf16.msra.mxu1 %v5709_v8  ;;  %4618 = vmatprep.mubr.msk.f32.mxu1 %vm5623_vm0, %v5624_v1 }
0x2076   :  { %5066 = vmatprep.subr.bf16.mxu1 %v5622_v0 }
0x2079   :  { %5068 = vmatpush3.bf16.msra.mxu1 %v5718_v10 }
0x207a   :  { %5075 = vmatprep.subr.bf16.mxu1 %v5622_v0 }
0x2147   :  { %v1505_v45 = vpop.f32.mrb[8].mxu1 }
0x2148   :  { %v1506_v21 = vadd.f32 %v1505_v45, %v5768_v41  ;;  %v4590_v4 = vpop.f32.mrb[9].mxu1 }
0x214a   :  { %5380 = vtanh.f32 %v1506_v21  ;;  %v4086_v48 = vmul.f32 -1.442695, %v1506_v21 }
0x214c   :  { %5382 = vpow2.f32 %v4086_v48 }
0x2154   :  { %v5381_v46 = vpop.eup %5380 }
0x2155   :  { %1518 = vrot.lane.b32.xlu1 %v5381_v46, %s5625_s18  ;;  %v6076_v46 = vld [vmem:[%s6638_s0 + $0x8] sm:$0xff] }
0x2156   :  { %v5383_v51 = vpop.eup %5382  ;;  %v1727_v48 = vrot.slane %v6076_v46, 2 }
0x2157   :  { %v1512_v33 = vadd.f32 1.0, %v5383_v51 }
0x2159   :  { %5384 = vrcp.f32 %v1512_v33 }
0x2163   :  { %v5385_v52 = vpop.eup %5384 }
0x2164   :  { %v1516_v56 = vmul.f32 %v5385_v52, %v5970_v49 }
0x21c7   :  { %v1519_v53 = vpop.permute.xlu1 %1518 }
0x21c8   :  { %v1521_v55 = vmul.f32 %v5385_v52, %v1519_v53 }
0x21ca   :  { %1523 = vrot.lane.b32.xlu1 %v1521_v55, %s5626_s19 }
0x223c   :  { %v1524_v35 = vpop.permute.xlu1 %1523 }
0x223d   :  { %v6028_v57 = vadd.f32 %v1524_v35, %v1516_v56 }
0x223f   :  { %5386 = vtanh.f32 %v6028_v57 }
0x2249   :  { %v5387_v59 = vpop.eup %5386 }
0x224a   :  { %1529 = vrot.lane.b32.xlu0 %v5387_v59, %s5625_s18 }
0x224e   :  { %1537 = vrot.lane.b32.xlu0 %v5996_v23, %s5625_s18 }
0x22bc   :  { %v1530_v62 = vpop.permute.xlu0 %1529 }
0x22bd   :  { %v1532_v2 = vmul.f32 %v5385_v52, %v1530_v62 }
0x22bf   :  { %1534 = vrot.lane.b32.xlu1 %v1532_v2, %s5626_s19 }
0x22c0   :  { %v1538_v6 = vpop.permute.xlu0 %1537 }
0x2331   :  { %v1535_v47 = vpop.permute.xlu1 %1534 }
0x2332   :  { %v1540_v9 = vsel %vm140_vm5, %v1535_v47, %v1538_v6 }
0x2333   :  { %4608 = vmatmul.mubr.msk.f32.vlgmr.msra.gmra.mrb[20].mxu0 %vm355_vm6, %v1540_v9 }
0x2334   :  { %5071 = vmatpush3.bf16.msra.mxu0 %v5738_v28  ;;  %4631 = vmatprep.mubr.msk.f32.mxu0 %vm5623_vm0, %v5624_v1 }
0x2335   :  { %5072 = vmatprep.subr.bf16.mxu0 %v5622_v0 }
0x2338   :  { %5074 = vmatpush3.bf16.msra.mxu0 %v5741_v30 }
0x2339   :  { %4629 = vmatprep.subr.mxu0 %v5624_v1 }
0x233c   :  { %4630 = vmatpush3.msk.msra.mxu0 %vm61_vm1, %v5746_v31 }
0x233d   :  { %5087 = vmatprep.subr.bf16.mxu0 %v5622_v0 }
0x2406   :  { %v1610_v49 = vpop.f32.mrb[20].mxu0 }
0x2407   :  { %v1611_v11 = vadd.f32 %v1610_v49, %v5813_v17  ;;  %v4609_v12 = vpop.f32.mrb[21].mxu0 }
0x2409   :  { %5388 = vtanh.f32 %v1611_v11  ;;  %v4088_v18 = vmul.f32 -1.442695, %v1611_v11 }
0x240b   :  { %5390 = vpow2.f32 %v4088_v18 }
0x2413   :  { %v5389_v14 = vpop.eup %5388 }
0x2414   :  { %1623 = vrot.lane.b32.xlu1 %v5389_v14, %s5625_s18 }
0x2415   :  { %v5391_v20 = vpop.eup %5390 }
0x2416   :  { %v1617_v22 = vadd.f32 1.0, %v5391_v20 }
0x2418   :  { %5392 = vrcp.f32 %v1617_v22 }
0x2422   :  { %v5393_v24 = vpop.eup %5392 }
0x2423   :  { %v1621_v31 = vmul.f32 %v5393_v24, %v5992_v19  ;;  %v1642_v19 = vrot.slane %v5731_v13, 2 }
0x2486   :  { %v1624_v61 = vpop.permute.xlu1 %1623 }
0x2487   :  { %v1626_v15 = vmul.f32 %v5393_v24, %v1624_v61 }
0x2489   :  { %1628 = vrot.lane.b32.xlu0 %v1626_v15, %s5626_s19 }
0x24fb   :  { %v1629_v25 = vpop.permute.xlu0 %1628 }
0x24fc   :  { %v6050_v26 = vadd.f32 %v1629_v25, %v1621_v31 }
0x24fe   :  { %5394 = vtanh.f32 %v6050_v26 }
0x2508   :  { %v5395_v27 = vpop.eup %5394 }
0x2509   :  { %1634 = vrot.lane.b32.xlu1 %v5395_v27, %s5625_s18 }
0x257b   :  { %v1635_v54 = vpop.permute.xlu1 %1634 }
0x257c   :  { %v6054_v29 = vmul.f32 %v5393_v24, %v1635_v54 }
0x257e   :  { %1639 = vrot.lane.b32.xlu0 %v6054_v29, %s5626_s19 }
0x25f0   :  { %v1640_v3 = vpop.permute.xlu0 %1639 }
0x25f1   :  { %4619 = vmatmul.mubr.msk.f32.vlgmr.msra.gmra.mrb[10].mxu1 %vm140_vm5, %v1640_v3 }
0x25f2   :  { %5077 = vmatpush3.bf16.msra.mxu1 %v5776_v58  ;;  %4650 = vmatprep.mubr.msk.f32.mxu1 %vm5623_vm0, %v5624_v1 }
0x25f3   :  { %5078 = vmatprep.subr.bf16.mxu1 %v5622_v0 }
0x25f6   :  { %5080 = vmatpush3.bf16.msra.mxu1 %v5779_v60 }
0x25f7   :  { %5081 = vmatprep.subr.bf16.mxu1 %v5622_v0 }
0x25fa   :  { %5083 = vmatpush3.bf16.msra.mxu1 %v5783_v63 }
0x25fb   :  { %5084 = vmatprep.subr.bf16.mxu1 %v5622_v0 }
0x25fe   :  { %5086 = vmatpush3.bf16.msra.mxu1 %v5788_v7 }
0x25ff   :  { %5093 = vmatprep.subr.bf16.mxu1 %v5622_v0 }
0x26c4   :  { %v1712_v32 = vpop.f32.mrb[10].mxu1 }
0x26c5   :  { %v1713_v34 = vadd.f32 %v1712_v32, %v1642_v19  ;;  %v4620_v37 = vpop.f32.mrb[11].mxu1 }
0x26c7   :  { %v1716_v40 = vsel %vm214_vm3, %v1713_v34, -inf }
0x26c8   :  { %1717 = vmax.xlane.f32.xlu1 %v1716_v40 }
0x2755   :  { %v1718_v42 = vpop.xlane.xlu1 %1717 }
0x2756   :  { %v1719_v43 = vsub.f32 %v1713_v34, %v1718_v42 }
0x2758   :  { %v1720_v44 = vmul.f32 1.442695, %v1719_v43 }
0x275a   :  { %5396 = vpow2.f32 %v1720_v44 }
0x2764   :  { %v5397_v45 = vpop.eup %5396 }
0x2765   :  { %v1722_v21 = vsel %vm214_vm3, %v5397_v45, 0.0 }
0x2766   :  { %1723 = vadd.xlane.f32.xlu0 %v1722_v21 }
0x277c   :  { %1730 = vrot.lane.b32.xlu0 %v1532_v2, %s5627_s20 }
0x27f3   :  { %v1724_v4 = vpop.xlane.xlu0 %1723 }
0x27f4   :  { %5398 = vrcp.f32 %v1724_v4 }
0x27f7   :  { %v1731_v53 = vpop.permute.xlu0 %1730 }
0x27fe   :  { %v5399_v51 = vpop.eup %5398 }
0x27ff   :  { %v1726_v33 = vmul.f32 %v5399_v51, %v5397_v45 }
0x2801   :  { %v1729_v52 = vmul.f32 %v1727_v48, %v1726_v33 }
0x2803   :  { %v1733_v55 = vsel %vm54_vm2, %v1729_v52, %v1731_v53 }
0x2804   :  { %4632 = vmatmul.mubr.msk.f32.vlgmr.msra.gmra.mrb[22].mxu0 %vm237_vm4, %v1733_v55 }
0x2805   :  { %5089 = vmatpush3.bf16.msra.mxu0 %v5709_v8  ;;  %4661 = vmatprep.mubr.msk.f32.mxu0 %vm5623_vm0, %v5624_v1 }
0x2806   :  { %5090 = vmatprep.subr.bf16.mxu0 %v5622_v0 }
0x2809   :  { %5092 = vmatpush3.bf16.msra.mxu0 %v5718_v10 }
0x280a   :  { %5099 = vmatprep.subr.bf16.mxu0 %v5622_v0 }
0x28d7   :  { %v1803_v56 = vpop.f32.mrb[22].mxu0 }
0x28d8   :  { %v1804_v35 = vadd.f32 %v1803_v56, %v5768_v41  ;;  %v4633_v59 = vpop.f32.mrb[23].mxu0 }
0x28da   :  { %5400 = vtanh.f32 %v1804_v35  ;;  %v4092_v2 = vmul.f32 -1.442695, %v1804_v35 }
0x28dc   :  { %5402 = vpow2.f32 %v4092_v2 }
0x28e4   :  { %v5401_v62 = vpop.eup %5400 }
0x28e5   :  { %1816 = vrot.lane.b32.xlu1 %v5401_v62, %s5625_s18 }
0x28e6   :  { %v5403_v6 = vpop.eup %5402 }
0x28e7   :  { %v1810_v47 = vadd.f32 1.0, %v5403_v6 }
0x28e9   :  { %5404 = vrcp.f32 %v1810_v47  ;;  %v2024_v47 = vrot.slane %v6076_v46, 4 }
0x28f3   :  { %v5405_v9 = vpop.eup %5404 }
0x28f4   :  { %v1814_v12 = vmul.f32 %v5405_v9, %v6028_v57  ;;  %v6106_v57 = vld [vmem:[#allocation2 + $0x20] sm:$0xf] }
0x2957   :  { %v1817_v49 = vpop.permute.xlu1 %1816 }
0x2958   :  { %v1819_v11 = vmul.f32 %v5405_v9, %v1817_v49 }
0x295a   :  { %1821 = vrot.lane.b32.xlu1 %v1819_v11, %s5626_s19 }
0x29cc   :  { %v1822_v14 = vpop.permute.xlu1 %1821 }
0x29cd   :  { %v6091_v18 = vadd.f32 %v1822_v14, %v1814_v12 }
0x29cf   :  { %5406 = vtanh.f32 %v6091_v18 }
0x29d9   :  { %v5407_v20 = vpop.eup %5406 }
0x29da   :  { %1827 = vrot.lane.b32.xlu0 %v5407_v20, %s5625_s18 }
0x29de   :  { %1835 = vrot.lane.b32.xlu0 %v6054_v29, %s5625_s18 }
0x2a4c   :  { %v1828_v22 = vpop.permute.xlu0 %1827 }
0x2a4d   :  { %v1830_v24 = vmul.f32 %v5405_v9, %v1828_v22 }
0x2a4f   :  { %1832 = vrot.lane.b32.xlu1 %v1830_v24, %s5626_s19 }
0x2a50   :  { %v1836_v61 = vpop.permute.xlu0 %1835 }
0x2ac1   :  { %v1833_v15 = vpop.permute.xlu1 %1832 }
0x2ac2   :  { %v1838_v31 = vsel %vm140_vm5, %v1833_v15, %v1836_v61 }
0x2ac3   :  { %4651 = vmatmul.mubr.msk.f32.vlgmr.msra.gmra.mrb[12].mxu1 %vm355_vm6, %v1838_v31 }
0x2ac4   :  { %5095 = vmatpush3.bf16.msra.mxu1 %v5738_v28  ;;  %4674 = vmatprep.mubr.msk.f32.mxu1 %vm5623_vm0, %v5624_v1 }
0x2ac5   :  { %5096 = vmatprep.subr.bf16.mxu1 %v5622_v0 }
0x2ac8   :  { %5098 = vmatpush3.bf16.msra.mxu1 %v5741_v30 }
0x2ac9   :  { %4672 = vmatprep.subr.mxu1 %v5624_v1 }
0x2acc   :  { %4673 = vmatpush3.msk.msra.mxu1 %vm61_vm1, %v6106_v57 }
0x2acd   :  { %5111 = vmatprep.subr.bf16.mxu1 %v5622_v0 }
0x2b96   :  { %v1908_v25 = vpop.f32.mrb[12].mxu1 }
0x2b97   :  { %v1909_v27 = vadd.f32 %v1908_v25, %v5813_v17  ;;  %v4652_v54 = vpop.f32.mrb[13].mxu1 }
0x2b99   :  { %5408 = vtanh.f32 %v1909_v27  ;;  %v4094_v19 = vmul.f32 -1.442695, %v1909_v27 }
0x2b9b   :  { %5410 = vpow2.f32 %v4094_v19 }
0x2ba3   :  { %v5409_v3 = vpop.eup %5408 }
0x2ba4   :  { %1921 = vrot.lane.b32.xlu1 %v5409_v3, %s5625_s18 }
0x2ba5   :  { %v5411_v32 = vpop.eup %5410 }
0x2ba6   :  { %v1915_v34 = vadd.f32 1.0, %v5411_v32 }
0x2ba8   :  { %5412 = vrcp.f32 %v1915_v34 }
0x2bb2   :  { %v5413_v37 = vpop.eup %5412 }
0x2bb3   :  { %v1919_v43 = vmul.f32 %v5413_v37, %v6050_v26  ;;  %v1939_v26 = vrot.slane %v5731_v13, 4 }
0x2c16   :  { %v1922_v40 = vpop.permute.xlu1 %1921 }
0x2c17   :  { %v1924_v42 = vmul.f32 %v5413_v37, %v1922_v40 }
0x2c19   :  { %1926 = vrot.lane.b32.xlu0 %v1924_v42, %s5626_s19 }
0x2c8b   :  { %v1927_v44 = vpop.permute.xlu0 %1926 }
0x2c8c   :  { %v6115_v45 = vadd.f32 %v1927_v44, %v1919_v43 }
0x2c8e   :  { %5414 = vtanh.f32 %v6115_v45 }
0x2c98   :  { %v5415_v21 = vpop.eup %5414 }
0x2c99   :  { %1932 = vrot.lane.b32.xlu1 %v5415_v21, %s5625_s18 }
0x2d0b   :  { %v1933_v4 = vpop.permute.xlu1 %1932 }
0x2d0c   :  { %v6119_v48 = vmul.f32 %v5413_v37, %v1933_v4 }
0x2d0e   :  { %1937 = vrot.lane.b32.xlu0 %v6119_v48, %s5626_s19 }
0x2d80   :  { %v1938_v51 = vpop.permute.xlu0 %1937 }
0x2d81   :  { %4662 = vmatmul.mubr.msk.f32.vlgmr.msra.gmra.mrb[24].mxu0 %vm140_vm5, %v1938_v51 }
0x2d82   :  { %5101 = vmatpush3.bf16.msra.mxu0 %v5776_v58  ;;  %4693 = vmatprep.mubr.msk.f32.mxu0 %vm5623_vm0, %v5624_v1 }
0x2d83   :  { %5102 = vmatprep.subr.bf16.mxu0 %v5622_v0 }
0x2d86   :  { %5104 = vmatpush3.bf16.msra.mxu0 %v5779_v60 }
0x2d87   :  { %5105 = vmatprep.subr.bf16.mxu0 %v5622_v0 }
0x2d8a   :  { %5107 = vmatpush3.bf16.msra.mxu0 %v5783_v63 }
0x2d8b   :  { %5108 = vmatprep.subr.bf16.mxu0 %v5622_v0 }
0x2d8e   :  { %5110 = vmatpush3.bf16.msra.mxu0 %v5788_v7 }
0x2d8f   :  { %5117 = vmatprep.subr.bf16.mxu0 %v5622_v0 }
0x2e54   :  { %v2009_v33 = vpop.f32.mrb[24].mxu0 }
0x2e55   :  { %v2010_v52 = vadd.f32 %v2009_v33, %v1939_v26  ;;  %v4663_v53 = vpop.f32.mrb[25].mxu0 }
0x2e57   :  { %v2013_v55 = vsel %vm214_vm3, %v2010_v52, -inf }
0x2e58   :  { %2014 = vmax.xlane.f32.xlu1 %v2013_v55 }
0x2ee5   :  { %v2015_v56 = vpop.xlane.xlu1 %2014 }
0x2ee6   :  { %v2016_v35 = vsub.f32 %v2010_v52, %v2015_v56 }
0x2ee8   :  { %v2017_v59 = vmul.f32 1.442695, %v2016_v35 }
0x2eea   :  { %5416 = vpow2.f32 %v2017_v59 }
0x2ef4   :  { %v5417_v62 = vpop.eup %5416 }
0x2ef5   :  { %v2019_v2 = vsel %vm214_vm3, %v5417_v62, 0.0 }
0x2ef6   :  { %2020 = vadd.xlane.f32.xlu0 %v2019_v2 }
0x2f0c   :  { %2027 = vrot.lane.b32.xlu0 %v1830_v24, %s5627_s20 }
0x2f83   :  { %v2021_v6 = vpop.xlane.xlu0 %2020 }
0x2f84   :  { %5418 = vrcp.f32 %v2021_v6 }
0x2f87   :  { %v2028_v12 = vpop.permute.xlu0 %2027 }
0x2f8e   :  { %v5419_v9 = vpop.eup %5418 }
0x2f8f   :  { %v2023_v49 = vmul.f32 %v5419_v9, %v5417_v62 }
0x2f91   :  { %v2026_v11 = vmul.f32 %v2024_v47, %v2023_v49 }
0x2f93   :  { %v2030_v14 = vsel %vm54_vm2, %v2026_v11, %v2028_v12 }
0x2f94   :  { %4675 = vmatmul.mubr.msk.f32.vlgmr.msra.gmra.mrb[14].mxu1 %vm237_vm4, %v2030_v14 }
0x2f95   :  { %5113 = vmatpush3.bf16.msra.mxu1 %v5709_v8  ;;  %4704 = vmatprep.mubr.msk.f32.mxu1 %vm5623_vm0, %v5624_v1 }
0x2f96   :  { %5114 = vmatprep.subr.bf16.mxu1 %v5622_v0 }
0x2f99   :  { %5116 = vmatpush3.bf16.msra.mxu1 %v5718_v10 }
0x2f9a   :  { %5123 = vmatprep.subr.bf16.mxu1 %v5622_v0 }
0x3067   :  { %v2100_v20 = vpop.f32.mrb[14].mxu1 }
0x3068   :  { %v2101_v22 = vadd.f32 %v2100_v20, %v5768_v41  ;;  %v4676_v24 = vpop.f32.mrb[15].mxu1 }
0x306a   :  { %5420 = vtanh.f32 %v2101_v22  ;;  %v4098_v15 = vmul.f32 -1.442695, %v2101_v22 }
0x306c   :  { %5422 = vpow2.f32 %v4098_v15 }
0x3074   :  { %v5421_v61 = vpop.eup %5420 }
0x3075   :  { %2113 = vrot.lane.b32.xlu1 %v5421_v61, %s5625_s18 }
0x3076   :  { %v5423_v8 = vpop.eup %5422 }
0x3077   :  { %v2107_v31 = vadd.f32 1.0, %v5423_v8 }
0x3079   :  { %5424 = vrcp.f32 %v2107_v31 }
0x3083   :  { %v5425_v25 = vpop.eup %5424 }
0x3084   :  { %v2111_v10 = vmul.f32 %v5425_v25, %v6091_v18 }
0x30e7   :  { %v2114_v27 = vpop.permute.xlu1 %2113 }
0x30e8   :  { %v2116_v54 = vmul.f32 %v5425_v25, %v2114_v27 }
0x30ea   :  { %2118 = vrot.lane.b32.xlu1 %v2116_v54, %s5626_s19 }
0x315c   :  { %v2119_v3 = vpop.permute.xlu1 %2118 }
0x315d   :  { %v6151_v19 = vadd.f32 %v2119_v3, %v2111_v10 }
0x315f   :  { %5426 = vtanh.f32 %v6151_v19 }
0x3169   :  { %v5427_v32 = vpop.eup %5426 }
0x316a   :  { %2124 = vrot.lane.b32.xlu0 %v5427_v32, %s5625_s18 }
0x316e   :  { %2132 = vrot.lane.b32.xlu0 %v6119_v48, %s5625_s18 }
0x31dc   :  { %v2125_v34 = vpop.permute.xlu0 %2124 }
0x31dd   :  { %v2127_v37 = vmul.f32 %v5425_v25, %v2125_v34 }
0x31df   :  { %2129 = vrot.lane.b32.xlu1 %v2127_v37, %s5626_s19 }
0x31e0   :  { %v2133_v40 = vpop.permute.xlu0 %2132 }
0x3251   :  { %v2130_v42 = vpop.permute.xlu1 %2129 }
0x3252   :  { %v2135_v43 = vsel %vm140_vm5, %v2130_v42, %v2133_v40 }
0x3253   :  { %4694 = vmatmul.mubr.msk.f32.vlgmr.msra.gmra.mrb[26].mxu0 %vm355_vm6, %v2135_v43 }
0x3254   :  { %5119 = vmatpush3.bf16.msra.mxu0 %v5738_v28  ;;  %4717 = vmatprep.mubr.msk.f32.mxu0 %vm5623_vm0, %v5624_v1 }
0x3255   :  { %5120 = vmatprep.subr.bf16.mxu0 %v5622_v0 }
0x3258   :  { %5122 = vmatpush3.bf16.msra.mxu0 %v5741_v30 }
0x3259   :  { %4715 = vmatprep.subr.mxu0 %v5624_v1 }
0x325c   :  { %4716 = vmatpush3.msk.msra.mxu0 %vm61_vm1, %v6106_v57 }
0x325d   :  { %5135 = vmatprep.subr.bf16.mxu0 %v5622_v0 }
0x3326   :  { %v2205_v18 = vpop.f32.mrb[26].mxu0 }
0x3327   :  { %v2206_v44 = vadd.f32 %v2205_v18, %v5813_v17  ;;  %v4695_v21 = vpop.f32.mrb[27].mxu0 }
0x3329   :  { %5428 = vtanh.f32 %v2206_v44  ;;  %v4100_v4 = vmul.f32 -1.442695, %v2206_v44 }
0x332b   :  { %5430 = vpow2.f32 %v4100_v4 }
0x3333   :  { %v5429_v28 = vpop.eup %5428 }
0x3334   :  { %2218 = vrot.lane.b32.xlu1 %v5429_v28, %s5625_s18 }
0x3335   :  { %v5431_v51 = vpop.eup %5430 }
0x3336   :  { %v2212_v26 = vadd.f32 1.0, %v5431_v51 }
0x3338   :  { %5432 = vrcp.f32 %v2212_v26 }
0x3342   :  { %v5433_v30 = vpop.eup %5432 }
0x3343   :  { %v2216_v57 = vmul.f32 %v5433_v30, %v6115_v45  ;;  %v2236_v45 = vrot.slane %v5731_v13, 6  ;;  %v2321_v13 = vrot.slane %v6076_v46, 6 }
0x33a6   :  { %v2219_v33 = vpop.permute.xlu1 %2218 }
0x33a7   :  { %v2221_v52 = vmul.f32 %v5433_v30, %v2219_v33 }
0x33a9   :  { %2223 = vrot.lane.b32.xlu0 %v2221_v52, %s5626_s19 }
0x341b   :  { %v2224_v53 = vpop.permute.xlu0 %2223 }
0x341c   :  { %v6173_v55 = vadd.f32 %v2224_v53, %v2216_v57 }
0x341e   :  { %5434 = vtanh.f32 %v6173_v55 }
0x3428   :  { %v5435_v56 = vpop.eup %5434 }
0x3429   :  { %2229 = vrot.lane.b32.xlu1 %v5435_v56, %s5625_s18 }
0x349b   :  { %v2230_v35 = vpop.permute.xlu1 %2229 }
0x349c   :  { %v6177_v59 = vmul.f32 %v5433_v30, %v2230_v35 }
0x349e   :  { %2234 = vrot.lane.b32.xlu0 %v6177_v59, %s5626_s19 }
0x3510   :  { %v2235_v62 = vpop.permute.xlu0 %2234 }
0x3511   :  { %4705 = vmatmul.mubr.msk.f32.vlgmr.msra.gmra.mrb[16].mxu1 %vm140_vm5, %v2235_v62 }
0x3512   :  { %5125 = vmatpush3.bf16.msra.mxu1 %v5776_v58  ;;  %4736 = vmatprep.mubr.msk.f32.mxu1 %vm5623_vm0, %v5624_v1 }
0x3513   :  { %5126 = vmatprep.subr.bf16.mxu1 %v5622_v0 }
0x3516   :  { %5128 = vmatpush3.bf16.msra.mxu1 %v5779_v60 }
0x3517   :  { %5129 = vmatprep.subr.bf16.mxu1 %v5622_v0 }
0x351a   :  { %5131 = vmatpush3.bf16.msra.mxu1 %v5783_v63 }
0x351b   :  { %5132 = vmatprep.subr.bf16.mxu1 %v5622_v0 }
0x351e   :  { %5134 = vmatpush3.bf16.msra.mxu1 %v5788_v7 }
0x35e4   :  { %v2306_v2 = vpop.f32.mrb[16].mxu1 }
0x35e5   :  { %v2307_v6 = vadd.f32 %v2306_v2, %v2236_v45  ;;  %v4706_v58 = vpop.f32.mrb[17].mxu1  ;;  %v38_v45 = vld [vmem:[%s6640_s2 + $0x28] sm:$0xff]  ;;  %v39_v2 = vld [vmem:[%s6640_s2 + $0x30] sm:$0xff] }
0x35e7   :  { %v2310_v47 = vsel %vm214_vm3, %v2307_v6, -inf }
0x35e8   :  { %2311 = vmax.xlane.f32.xlu1 %v2310_v47 }
0x3675   :  { %v2312_v9 = vpop.xlane.xlu1 %2311 }
0x3676   :  { %v2313_v49 = vsub.f32 %v2307_v6, %v2312_v9  ;;  %v5628_v9 = vmov 0  }
0x3677   :  { %5287 = vset.pattern.permute.xlu1 %v5628_v9 }
0x3678   :  { %v2314_v11 = vmul.f32 1.442695, %v2313_v49 }
0x367a   :  { %5436 = vpow2.f32 %v2314_v11 }
0x3684   :  { %v5437_v60 = vpop.eup %5436 }
0x3685   :  { %v2316_v12 = vsel %vm214_vm3, %v5437_v60, 0.0  ;;  %vm2789_vm3 = vcmask 56320  }
0x3686   :  { %2317 = vadd.xlane.f32.xlu0 %v2316_v12  ;;  %v2872_v12 = vld [vmem:[#allocation2 + $0x90] sm:$0xff] }
0x369c   :  { %2324 = vrot.lane.b32.xlu0 %v2127_v37, %s5627_s20 }
0x3713   :  { %v2318_v63 = vpop.xlane.xlu0 %2317 }
0x3714   :  { %5438 = vrcp.f32 %v2318_v63 }
0x3717   :  { %v2325_v22 = vpop.permute.xlu0 %2324 }
0x371e   :  { %v5439_v7 = vpop.eup %5438 }
0x371f   :  { %v2320_v14 = vmul.f32 %v5439_v7, %v5437_v60  ;;  %v2871_v60 = vld [vmem:[#allocation2 + $0x88] sm:$0xff]  ;;  %v2874_v7 = vld [vmem:[#allocation2 + $0xa0] sm:$0xff] }
0x3720   :  { %v6241_v63 = vpack.c.bf16 %v2872_v12, %v2871_v60 }
0x3721   :  { %v2323_v20 = vmul.f32 %v2321_v13, %v2320_v14  ;;  %v2873_v13 = vld [vmem:[#allocation2 + $0x98] sm:$0xff] }
0x3723   :  { %v2327_v24 = vsel %vm54_vm2, %v2323_v20, %v2325_v22  ;;  %v6245_v20 = vpack.c.bf16 %v2874_v7, %v2873_v13  ;;  %v6256_v22 = vld [vmem:[#allocation2 + $0xe8] sm:$0xff] }
0x3724   :  { %4718 = vmatmul.mubr.msk.f32.vlgmr.msra.gmra.mrb[28].mxu0 %vm237_vm4, %v2327_v24  ;;  %v2986_v7 = vld [vmem:[#allocation2 + $0xa8] sm:$0xff]  ;;  %vm2791_vm4 = vcmask 58368  }
0x3725   :  { %4747 = vmatprep.mubr.msk.f32.mxu0 %vm5623_vm0, %v5624_v1 }
0x37f7   :  { %v2397_v61 = vpop.f32.mrb[28].mxu0 }
0x37f8   :  { %v2398_v15 = vadd.f32 %v2397_v61, %v5768_v41  ;;  %v4719_v8 = vpop.f32.mrb[29].mxu0  ;;  %v2868_v61 = vsub.s32 3, %v5760_v38 }
0x37fa   :  { %5440 = vtanh.f32 %v2398_v15  ;;  %v4104_v25 = vmul.f32 -1.442695, %v2398_v15 }
0x37fc   :  { %5442 = vpow2.f32 %v4104_v25  ;;  %v2869_v25 = vrot.slane %v6256_v22, %v2868_v61 }
0x3804   :  { %v5441_v31 = vpop.eup %5440 }
0x3805   :  { %2410 = vrot.lane.b32.xlu1 %v5441_v31, %s5625_s18 }
0x3806   :  { %v5443_v27 = vpop.eup %5442 }
0x3807   :  { %v2404_v54 = vadd.f32 1.0, %v5443_v27 }
0x3809   :  { %5444 = vrcp.f32 %v2404_v54 }
0x3813   :  { %v5445_v10 = vpop.eup %5444 }
0x3814   :  { %v2408_v34 = vmul.f32 %v5445_v10, %v6151_v19 }
0x3877   :  { %v2411_v3 = vpop.permute.xlu1 %2410 }
0x3878   :  { %v2413_v32 = vmul.f32 %v5445_v10, %v2411_v3 }
0x387a   :  { %2415 = vrot.lane.b32.xlu1 %v2413_v32, %s5626_s19 }
0x38ec   :  { %v2416_v37 = vpop.permute.xlu1 %2415 }
0x38ed   :  { %v6204_v40 = vadd.f32 %v2416_v37, %v2408_v34 }
0x38ef   :  { %5446 = vtanh.f32 %v6204_v40 }
0x38f9   :  { %v5447_v41 = vpop.eup %5446 }
0x38fa   :  { %2421 = vrot.lane.b32.xlu0 %v5447_v41, %s5625_s18 }
0x38fe   :  { %2429 = vrot.lane.b32.xlu0 %v6177_v59, %s5625_s18 }
0x396c   :  { %v2422_v42 = vpop.permute.xlu0 %2421 }
0x396d   :  { %v2424_v43 = vmul.f32 %v5445_v10, %v2422_v42 }
0x396f   :  { %2426 = vrot.lane.b32.xlu1 %v2424_v43, %s5626_s19 }
0x3970   :  { %v2430_v18 = vpop.permute.xlu0 %2429 }
0x39e1   :  { %v2427_v44 = vpop.permute.xlu1 %2426 }
0x39e2   :  { %v2432_v21 = vsel %vm140_vm5, %v2427_v44, %v2430_v18 }
0x39e3   :  { %4737 = vmatmul.mubr.msk.f32.vlgmr.msra.gmra.mrb[18].mxu1 %vm355_vm6, %v2432_v21 }
0x3ab6   :  { %v2502_v19 = vpop.f32.mrb[18].mxu1 }
0x3ab7   :  { %v2503_v28 = vadd.f32 %v2502_v19, %v5813_v17  ;;  %v4738_v4 = vpop.f32.mrb[19].mxu1  ;;  %v37_v17 = vld [vmem:[%s6640_s2 + $0x20] sm:$0xff]  ;;  %v2532_v19 = vrot.slane %v5939_v5, 4 }
0x3ab8   :  { %v5136_v6 = vpack.c.bf16 %v38_v45, %v37_v17  ;;  %v2534_v4 = vrot.slane %v5996_v23, 2 }
0x3ab9   :  { %5448 = vtanh.f32 %v2503_v28  ;;  %v4106_v26 = vmul.f32 -1.442695, %v2503_v28 }
0x3aba   :  { %5137 = vmatpush3.bf16.msra.mxu0 %v5136_v6 }
0x3abb   :  { %5450 = vpow2.f32 %v4106_v26  ;;  %5138 = vmatprep.subr.bf16.mxu0 %v5622_v0 }
0x3ac3   :  { %v5449_v51 = vpop.eup %5448 }
0x3ac4   :  { %2515 = vrot.lane.b32.xlu1 %v5449_v51, %s5625_s18 }
0x3ac5   :  { %v5451_v30 = vpop.eup %5450 }
0x3ac6   :  { %v2509_v33 = vadd.f32 1.0, %v5451_v30 }
0x3ac8   :  { %5452 = vrcp.f32 %v2509_v33  ;;  %v33_v33 = vld [vmem:[%s6640_s2] sm:$0xff] }
0x3ad2   :  { %v5453_v52 = vpop.eup %5452 }
0x3ad3   :  { %v2513_v56 = vmul.f32 %v5453_v52, %v6173_v55  ;;  %v40_v55 = vld [vmem:[%s6640_s2 + $0x38] sm:$0xff] }
0x3ad4   :  { %v5139_v58 = vpack.c.bf16 %v40_v55, %v39_v2  ;;  %v2536_v55 = vrot.slane %v6119_v48, 6 }
0x3ad6   :  { %5140 = vmatpush3.bf16.msra.mxu0 %v5139_v58  ;;  %v2538_v58 = vrot.slane %v6177_v59, 4  ;;  %v2548_v60 = vsel %vm2543_vm7, %v6054_v29, %v2536_v55 }
0x3ad7   :  { %5149 = vmatprep.subr.bf16.mxu0 %v5622_v0 }
0x3ad8   :  { %v2549_v12 = vsel %vm61_vm1, %v2548_v60, %v2538_v58 }
0x3b36   :  { %v2516_v57 = vpop.permute.xlu1 %2515 }
0x3b37   :  { %v2518_v53 = vmul.f32 %v5453_v52, %v2516_v57 }
0x3b39   :  { %2520 = vrot.lane.b32.xlu0 %v2518_v53, %s5626_s19  ;;  %v2959_v53 = vrot.slane %v6204_v40, 2 }
0x3bab   :  { %v2521_v35 = vpop.permute.xlu0 %2520 }
0x3bac   :  { %v6217_v62 = vadd.f32 %v2521_v35, %v2513_v56  ;;  %v35_v56 = vld [vmem:[%s6640_s2 + $0x10] sm:$0xff]  ;;  %v36_v35 = vld [vmem:[%s6640_s2 + $0x18] sm:$0xff] }
0x3bad   :  { %v5145_v45 = vpack.c.bf16 %v36_v35, %v35_v56 }
0x3bae   :  { %5454 = vtanh.f32 %v6217_v62 }
0x3bb8   :  { %v5455_v47 = vpop.eup %5454 }
0x3bb9   :  { %2526 = vrot.lane.b32.xlu1 %v5455_v47, %s5625_s18 }
0x3bbd   :  { %2858 = vperm.xlu1 %5287, %v6076_v46   ;;  %v2553_v46 = vsub.s32 0, %v5760_v38 }
0x3bbf   :  { %v2864_v24 = vrot.slane %v6256_v22, %v2553_v46 }
0x3c2b   :  { %v2527_v49 = vpop.permute.xlu1 %2526 }
0x3c2c   :  { %v6237_v11 = vmul.f32 %v5453_v52, %v2527_v49  ;;  %v34_v52 = vld [vmem:[%s6640_s2 + $0x8] sm:$0xff] }
0x3c2d   :  { %v5141_v57 = vpack.c.bf16 %v34_v52, %v33_v33 }
0x3c2e   :  { %2555 = vrot.lane.b32.xlu0 %v6237_v11, %s5626_s19  ;;  %v2541_v49 = vrot.slane %v6237_v11, 2 }
0x3c2f   :  { %5142 = vmatprep.subr.bf16.mxu1 %v5141_v57 }
0x3c30   :  { %5144 = vmatpush3.bf16.msra.mxu1 %v5141_v57  ;;  %v2550_v13 = vsel %vm2546_vm8, %v2549_v12, %v2541_v49 }
0x3c31   :  { %5146 = vmatprep.subr.bf16.mxu1 %v5145_v45 }
0x3c34   :  { %5148 = vmatpush3.bf16.msra.mxu1 %v5145_v45 }
0x3c35   :  { %5155 = vmatprep.subr.bf16.mxu1 %v5622_v0 }
0x3c3c   :  { %v2859_v8 = vpop.permute.xlu1 %2858 }
0x3c3d   :  { %v2865_v27 = vmul.f32 %v2864_v24, %v2859_v8 }
0x3c3f   :  { %v2870_v54 = vadd.f32 %v2869_v25, %v2865_v27  ;;  %v2988_v25 = vld [vmem:[#allocation2 + $0xb8] sm:$0xff]  ;;  %v2989_v27 = vld [vmem:[#allocation2 + $0xc0] sm:$0xff] }
0x3ca0   :  { %v2556_v14 = vpop.permute.xlu0 %2555 }
0x3ca1   :  { %4748 = vmatmul.mubr.msk.f32.vlgmr.msra.gmra.mrb[30].mxu0 %vm140_vm5, %v2556_v14  ;;  %v2987_v14 = vld [vmem:[#allocation2 + $0xb0] sm:$0xff] }
0x3ca2   :  { %5151 = vmatpush3.bf16.msra.mxu0 %v6241_v63  ;;  %4769 = vmatprep.mubr.msk.f32.mxu0 %vm5623_vm0, %v5624_v1 }
0x3ca3   :  { %5152 = vmatprep.subr.bf16.mxu0 %v5622_v0 }
0x3ca6   :  { %5154 = vmatpush3.bf16.msra.mxu0 %v6245_v20 }
0x3ca7   :  { %5167 = vmatprep.subr.bf16.mxu0 %v5622_v0 }
0x3ca9   :  { %4770 = vmatmul.mubr.msk.f32.vlgmr.msra.gmra.mrb[32].mxu0 %vm140_vm5, %v2427_v44  ;;  %v2530_v44 = vrot.slane %v5881_v50, 6 }
0x3caa   :  { %4807 = vmatprep.mubr.msk.f32.mxu0 %vm5623_vm0, %v5624_v1 }
0x3cab   :  { %v2544_v51 = vsel %vm2543_vm7, %v5822_v36, %v2530_v44 }
0x3cac   :  { %v2545_v26 = vsel %vm61_vm1, %v2544_v51, %v2532_v19  ;;  %v6343_v19 = vld [vmem:[%s6640_s2 + $0x60] sm:$0xff]  ;;  %s5629_s2 = smov 96  }
0x3cad   :  { %v2547_v30 = vsel %vm2546_vm8, %v2545_v26, %v2534_v4 }
0x3d74   :  { %v6262_v15 = vpop.f32.mrb[30].mxu0 }
0x3d75   :  { %v4749_v31 = vpop.f32.mrb[31].mxu0 }
0x3d76   :  { %v6307_v31 = vpack.c.bf16 %v2987_v14, %v2986_v7 }
0x3d7c   :  { %v2943_v10 = vpop.f32.mrb[32].mxu0 }
0x3d7d   :  { %v2948_v3 = vrot.slane %v2943_v10, 2  ;;  %v4771_v32 = vpop.f32.mrb[33].mxu0  ;;  %v6313_v10 = vpack.c.bf16 %v2989_v27, %v2988_v25 }
0x3d7e   :  { %v2991_v32 = vld [vmem:[#allocation2 + $0xd0] sm:$0xff] }
0x3d7f   :  { %v2950_v34 = vadd.f32 %v2948_v3, %v2870_v54  ;;  %v2990_v3 = vld [vmem:[#allocation2 + $0xc8] sm:$0xff] }
0x3d81   :  { %5456 = vtanh.f32 %v2950_v34  ;;  %v4111_v41 = vmul.f32 -1.442695, %v2950_v34  ;;  %v6319_v34 = vpack.c.bf16 %v2991_v32, %v2990_v3  ;;  %v3126_v3 = vld [vmem:[#allocation2 + $0x68] sm:$0xff]  ;;  %v3127_v32 = vld [vmem:[#allocation2 + $0x70] sm:$0xff] }
0x3d83   :  { %5458 = vpow2.f32 %v4111_v41  ;;  %v2993_v41 = vld [vmem:[#allocation2 + $0xe0] sm:$0xff] }
0x3d8b   :  { %v5457_v37 = vpop.eup %5456 }
0x3d8c   :  { %2963 = vrot.lane.b32.xlu0 %v5457_v37, %s5625_s18  ;;  %v2992_v37 = vld [vmem:[#allocation2 + $0xd8] sm:$0xff] }
0x3d8d   :  { %v5459_v42 = vpop.eup %5458 }
0x3d8e   :  { %v2954_v43 = vadd.f32 1.0, %v5459_v42  ;;  %v6323_v42 = vpack.c.bf16 %v2993_v41, %v2992_v37  ;;  %v3128_v37 = vld [vmem:[#allocation2 + $0x78] sm:$0xff]  ;;  %v6377_v41 = vpack.c.bf16 %v3127_v32, %v3126_v3 }
0x3d90   :  { %5460 = vrcp.f32 %v2954_v43  ;;  %5169 = vmatpush3.bf16.msra.mxu0 %v6377_v41 }
0x3d91   :  { %5170 = vmatprep.subr.bf16.mxu0 %v5622_v0 }
0x3d9a   :  { %v5461_v18 = vpop.eup %5460 }
0x3d9b   :  { %v2961_v17 = vmul.f32 %v5461_v18, %v2959_v53 }
0x3dfe   :  { %v2964_v21 = vpop.permute.xlu0 %2963 }
0x3dff   :  { %v2966_v28 = vmul.f32 %v5461_v18, %v2964_v21 }
0x3e01   :  { %2968 = vrot.lane.b32.xlu1 %v2966_v28, %s5626_s19  ;;  %v2554_v28 = vrot.slane %v6343_v19, %v2553_v46  ;;  %v6357_v46 = vrot.slane %v6343_v19, %v235_v39 }
0x3e03   :  { %v2626_v4 = vadd.f32 %v6262_v15, %v2554_v28 }
0x3e05   :  { %2641 = vrot.lane.b32.xlu1 %v2547_v30, %s5626_s19  ;;  %v2630_v51 = vrot.slane %v2626_v4, 6  ;;  %v2632_v26 = vrot.slane %v2626_v4, 4  ;;  %v2634_v52 = vrot.slane %v2626_v4, 2 }
0x3e07   :  { %v2636_v30 = vsel %vm2543_vm7, %v2626_v4, %v2630_v51 }
0x3e08   :  { %v2637_v33 = vsel %vm61_vm1, %v2636_v30, %v2632_v26  ;;  %vm2787_vm1 = vcmask 48128  }
0x3e09   :  { %v2638_v57 = vsel %vm2546_vm8, %v2637_v33, %v2634_v52 }
0x3e73   :  { %v2969_v2 = vpop.permute.xlu1 %2968 }
0x3e74   :  { %v6290_v6 = vadd.f32 %v2969_v2, %v2961_v17 }
0x3e76   :  { %5462 = vtanh.f32 %v6290_v6 }
0x3e77   :  { %v2642_v40 = vpop.permute.xlu1 %2641 }
0x3e78   :  { %4758 = vmatprep.mubr.msk.f32.mxu1 %vm140_vm5, %v2642_v40  ;;  %v2996_v40 = vsub.s32 5, %v5760_v38 }
0x3e7a   :  { %v6368_v55 = vrot.slane %v6256_v22, %v2996_v40 }
0x3e80   :  { %v5463_v47 = vpop.eup %5462 }
0x3e81   :  { %2974 = vrot.lane.b32.xlu0 %v5463_v47, %s5625_s18 }
0x3e85   :  { %2643 = vrot.lane.b32.xlu0 %v2550_v13, %s5626_s19 }
0x3e89   :  { %2982 = vrot.lane.b32.xlu0 %v2541_v49, %s5625_s18 }
0x3ef3   :  { %v2975_v24 = vpop.permute.xlu0 %2974 }
0x3ef4   :  { %v6305_v8 = vmul.f32 %v5461_v18, %v2975_v24 }
0x3ef6   :  { %2979 = vrot.lane.b32.xlu1 %v6305_v8, %s5626_s19 }
0x3ef7   :  { %v2644_v54 = vpop.permute.xlu0 %2643 }
0x3ef8   :  { %4759 = vmatmul.mubr.msk.f32.vlgmr.msra.gmra.mrb[20].mxu1 %vm140_vm5, %v2644_v54 }
0x3ef9   :  { %5157 = vmatpush3.bf16.msra.mxu1 %v6307_v31  ;;  %4788 = vmatprep.mubr.msk.f32.mxu1 %vm5623_vm0, %v5624_v1 }
0x3efa   :  { %5158 = vmatprep.subr.bf16.mxu1 %v5622_v0 }
0x3efb   :  { %v2983_v43 = vpop.permute.xlu0 %2982 }
0x3efd   :  { %5160 = vmatpush3.bf16.msra.mxu1 %v6313_v10 }
0x3efe   :  { %5161 = vmatprep.subr.bf16.mxu1 %v5622_v0 }
0x3f01   :  { %5163 = vmatpush3.bf16.msra.mxu1 %v6319_v34 }
0x3f02   :  { %5164 = vmatprep.subr.bf16.mxu1 %v5622_v0 }
0x3f05   :  { %5166 = vmatpush3.bf16.msra.mxu1 %v6323_v42 }
0x3f06   :  { %5179 = vmatprep.subr.bf16.mxu1 %v5622_v0 }
0x3f68   :  { %v2980_v18 = vpop.permute.xlu1 %2979 }
0x3f69   :  { %v2985_v44 = vsel %vm140_vm5, %v2980_v18, %v2983_v43  ;;  %v3129_v43 = vld [vmem:[#allocation2 + $0x80] sm:$0xff] }
0x3f6a   :  { %v2999_v21 = vrot.slane %v2985_v44, 6  ;;  %v6380_v18 = vpack.c.bf16 %v3129_v43, %v3128_v37  ;;  %v3121_v44 = vrot.slane %v6305_v8, 6  ;;  %v3132_v8 = vsub.s32 4, %v5760_v38 }
0x3f6c   :  { %4789 = vmatmul.mubr.msk.f32.vlgmr.msra.gmra.mrb[22].mxu1 %vm355_vm6, %v2999_v21  ;;  %5172 = vmatpush3.bf16.msra.mxu0 %v6380_v18  ;;  %v6410_v30 = vrot.slane %v6256_v22, %v3132_v8  ;;  %v3215_v22 = vrot.slane %v6290_v6, 6 }
0x3f6d   :  { %5181 = vmatpush3.bf16.msra.mxu1 %v6307_v31  ;;  %4826 = vmatprep.mubr.msk.f32.mxu1 %vm5623_vm0, %v5624_v1 }
0x3f6e   :  { %5182 = vmatprep.subr.bf16.mxu1 %v5622_v0  ;;  %5173 = vmatprep.subr.bf16.mxu0 %v5622_v0 }
0x3f70   :  { %5175 = vmatpush3.bf16.msra.mxu0 %v6241_v63 }
0x3f71   :  { %5184 = vmatpush3.bf16.msra.mxu1 %v6313_v10  ;;  %5176 = vmatprep.subr.bf16.mxu0 %v5622_v0 }
0x3f72   :  { %5185 = vmatprep.subr.bf16.mxu1 %v5622_v0 }
0x3f74   :  { %5178 = vmatpush3.bf16.msra.mxu0 %v6245_v20 }
0x3f75   :  { %5187 = vmatpush3.bf16.msra.mxu1 %v6319_v34  ;;  %5191 = vmatprep.subr.bf16.mxu0 %v5622_v0 }
0x3f76   :  { %5188 = vmatprep.subr.bf16.mxu1 %v5622_v0 }
0x3f79   :  { %5190 = vmatpush3.bf16.msra.mxu1 %v6323_v42 }
0x3f7a   :  { %5203 = vmatprep.subr.bf16.mxu1 %v5622_v0 }
0x3fcb   :  { %v4760_v53 = vpop.f32.mrb[20].mxu1 }
0x3fcc   :  { %v6352_v56 = vadd.f32 %v4760_v53, %v2638_v57  ;;  %v2715_v35 = vpop.f32.mrb[21].mxu1 }
0x3fcd   :  { %v2716_v17 = vadd.f32 %v2715_v35, %v2638_v57 }
0x3fcf   :  { %5464 = vtanh.f32 %v2716_v17 }
0x3fd9   :  { %v5465_v15 = vpop.eup %5464 }
0x3fda   :  { %v6360_v45 = vmul.f32 %v5465_v15, %v6357_v46 }
0x3fdc   :  { %v6364_v2 = vsel %vm2735_vm9, %v6360_v45, 0.0 }
0x403f   :  { %v3068_v58 = vpop.f32.mrb[22].mxu1 }
0x4040   :  { %v3069_v47 = vadd.f32 %v3068_v58, %v6368_v55  ;;  %v4790_v49 = vpop.f32.mrb[23].mxu1 }
0x4042   :  { %5466 = vtanh.f32 %v3069_v47  ;;  %v4113_v60 = vmul.f32 -1.442695, %v3069_v47 }
0x4044   :  { %5468 = vpow2.f32 %v4113_v60 }
0x404c   :  { %v5467_v39 = vpop.eup %5466 }
0x404d   :  { %3081 = vrot.lane.b32.xlu1 %v5467_v39, %s5625_s18 }
0x404e   :  { %v5469_v12 = vpop.eup %5468 }
0x404f   :  { %v3075_v13 = vadd.f32 1.0, %v5469_v12 }
0x4051   :  { %5470 = vrcp.f32 %v3075_v13 }
0x405b   :  { %v5471_v7 = vpop.eup %5470 }
0x405c   :  { %v3079_v25 = vmul.f32 %v5471_v7, %v6217_v62 }
0x40bf   :  { %v3082_v14 = vpop.permute.xlu1 %3081 }
0x40c0   :  { %v3084_v24 = vmul.f32 %v5471_v7, %v3082_v14 }
0x40c2   :  { %3086 = vrot.lane.b32.xlu0 %v3084_v24, %s5626_s19 }
0x4134   :  { %v3087_v27 = vpop.permute.xlu0 %3086 }
0x4135   :  { %v6374_v54 = vadd.f32 %v3087_v27, %v3079_v25 }
0x4137   :  { %5472 = vtanh.f32 %v6374_v54 }
0x4141   :  { %v5473_v62 = vpop.eup %5472 }
0x4142   :  { %3092 = vrot.lane.b32.xlu1 %v5473_v62, %s5625_s18 }
0x4146   :  { %3122 = vrot.lane.b32.xlu1 %v3121_v44, %s5625_s18 }
0x41b4   :  { %v3093_v21 = vpop.permute.xlu1 %3092 }
0x41b5   :  { %v6392_v28 = vmul.f32 %v5471_v7, %v3093_v21 }
0x41b7   :  { %3118 = vrot.lane.b32.xlu0 %v6392_v28, %s5626_s19 }
0x41b8   :  { %v3123_v4 = vpop.permute.xlu1 %3122 }
0x4229   :  { %v3119_v51 = vpop.permute.xlu0 %3118 }
0x422a   :  { %v3125_v26 = vsel %vm140_vm5, %v3119_v51, %v3123_v4 }
0x422b   :  { %4808 = vmatmul.mubr.msk.f32.vlgmr.msra.gmra.mrb[34].mxu0 %vm355_vm6, %v3125_v26 }
0x422c   :  { %5193 = vmatpush3.bf16.msra.mxu0 %v6377_v41  ;;  %4845 = vmatprep.mubr.msk.f32.mxu0 %vm5623_vm0, %v5624_v1 }
0x422d   :  { %5194 = vmatprep.subr.bf16.mxu0 %v5622_v0 }
0x4230   :  { %5196 = vmatpush3.bf16.msra.mxu0 %v6380_v18 }
0x4231   :  { %5197 = vmatprep.subr.bf16.mxu0 %v5622_v0 }
0x4234   :  { %5199 = vmatpush3.bf16.msra.mxu0 %v6241_v63 }
0x4235   :  { %5200 = vmatprep.subr.bf16.mxu0 %v5622_v0 }
0x4238   :  { %5202 = vmatpush3.bf16.msra.mxu0 %v6245_v20 }
0x4239   :  { %5215 = vmatprep.subr.bf16.mxu0 %v5622_v0 }
0x42fe   :  { %v3203_v33 = vpop.f32.mrb[34].mxu0 }
0x42ff   :  { %v3204_v52 = vadd.f32 %v3203_v33, %v6410_v30  ;;  %v4809_v57 = vpop.f32.mrb[35].mxu0 }
0x4301   :  { %5474 = vtanh.f32 %v3204_v52  ;;  %v4115_v35 = vmul.f32 -1.442695, %v3204_v52 }
0x4303   :  { %5476 = vpow2.f32 %v4115_v35 }
0x430b   :  { %v5475_v53 = vpop.eup %5474 }
0x430c   :  { %3219 = vrot.lane.b32.xlu0 %v5475_v53, %s5625_s18 }
0x430d   :  { %v5477_v17 = vpop.eup %5476 }
0x430e   :  { %v3210_v15 = vadd.f32 1.0, %v5477_v17 }
0x4310   :  { %5478 = vrcp.f32 %v3210_v15 }
0x431a   :  { %v5479_v40 = vpop.eup %5478 }
0x431b   :  { %v3217_v49 = vmul.f32 %v5479_v40, %v3215_v22 }
0x437e   :  { %v3220_v58 = vpop.permute.xlu0 %3219 }
0x437f   :  { %v3222_v47 = vmul.f32 %v5479_v40, %v3220_v58 }
0x4381   :  { %3224 = vrot.lane.b32.xlu1 %v3222_v47, %s5626_s19 }
0x43f3   :  { %v3225_v39 = vpop.permute.xlu1 %3224 }
0x43f4   :  { %v6416_v60 = vadd.f32 %v3225_v39, %v3217_v49 }
0x43f6   :  { %5480 = vtanh.f32 %v6416_v60 }
0x4400   :  { %v5481_v12 = vpop.eup %5480 }
0x4401   :  { %3230 = vrot.lane.b32.xlu0 %v5481_v12, %s5625_s18 }
0x4405   :  { %3238 = vrot.lane.b32.xlu0 %v6392_v28, %s5625_s18 }
0x4473   :  { %v3231_v13 = vpop.permute.xlu0 %3230 }
0x4474   :  { %v3233_v7 = vmul.f32 %v5479_v40, %v3231_v13 }
0x4476   :  { %3235 = vrot.lane.b32.xlu1 %v3233_v7, %s5626_s19 }
0x4477   :  { %v3239_v14 = vpop.permute.xlu0 %3238 }
0x44e8   :  { %v3236_v24 = vpop.permute.xlu1 %3235 }
0x44e9   :  { %v3241_v6 = vsel %vm140_vm5, %v3236_v24, %v3239_v14 }
0x44ea   :  { %4827 = vmatmul.mubr.msk.f32.vlgmr.msra.gmra.mrb[24].mxu1 %vm355_vm6, %v3241_v6 }
0x44eb   :  { %5205 = vmatpush3.bf16.msra.mxu1 %v6307_v31  ;;  %4864 = vmatprep.mubr.msk.f32.mxu1 %vm5623_vm0, %v5624_v1 }
0x44ec   :  { %5206 = vmatprep.subr.bf16.mxu1 %v5622_v0 }
0x44ef   :  { %5208 = vmatpush3.bf16.msra.mxu1 %v6313_v10 }
0x44f0   :  { %5209 = vmatprep.subr.bf16.mxu1 %v5622_v0 }
0x44f3   :  { %5211 = vmatpush3.bf16.msra.mxu1 %v6319_v34 }
0x44f4   :  { %5212 = vmatprep.subr.bf16.mxu1 %v5622_v0 }
0x44f7   :  { %5214 = vmatpush3.bf16.msra.mxu1 %v6323_v42 }
0x44f8   :  { %5227 = vmatprep.subr.bf16.mxu1 %v5622_v0 }
0x45bd   :  { %v3311_v25 = vpop.f32.mrb[24].mxu1 }
0x45be   :  { %v3312_v27 = vadd.f32 %v3311_v25, %v6368_v55  ;;  %v4828_v3 = vpop.f32.mrb[25].mxu1 }
0x45c0   :  { %5482 = vtanh.f32 %v3312_v27  ;;  %v4117_v37 = vmul.f32 -1.442695, %v3312_v27 }
0x45c2   :  { %5484 = vpow2.f32 %v4117_v37 }
0x45ca   :  { %v5483_v32 = vpop.eup %5482 }
0x45cb   :  { %3324 = vrot.lane.b32.xlu1 %v5483_v32, %s5625_s18 }
0x45cc   :  { %v5485_v43 = vpop.eup %5484 }
0x45cd   :  { %v3318_v62 = vadd.f32 1.0, %v5485_v43 }
0x45cf   :  { %5486 = vrcp.f32 %v3318_v62 }
0x45d9   :  { %v5487_v44 = vpop.eup %5486 }
0x45da   :  { %v3322_v51 = vmul.f32 %v5487_v44, %v6374_v54 }
0x463d   :  { %v3325_v21 = vpop.permute.xlu1 %3324 }
0x463e   :  { %v3327_v4 = vmul.f32 %v5487_v44, %v3325_v21 }
0x4640   :  { %3329 = vrot.lane.b32.xlu0 %v3327_v4, %s5626_s19 }
0x46b2   :  { %v3330_v26 = vpop.permute.xlu0 %3329 }
0x46b3   :  { %v6439_v8 = vadd.f32 %v3330_v26, %v3322_v51 }
0x46b5   :  { %5488 = vtanh.f32 %v6439_v8 }
0x46bf   :  { %v5489_v33 = vpop.eup %5488 }
0x46c0   :  { %3335 = vrot.lane.b32.xlu1 %v5489_v33, %s5625_s18 }
0x46c4   :  { %3352 = vrot.lane.b32.xlu1 %v3233_v7, %s5625_s18 }
0x4732   :  { %v3336_v52 = vpop.permute.xlu1 %3335 }
0x4733   :  { %v6444_v57 = vmul.f32 %v5487_v44, %v3336_v52 }
0x4735   :  { %3349 = vrot.lane.b32.xlu0 %v6444_v57, %s5626_s19 }
0x4736   :  { %v3353_v53 = vpop.permute.xlu1 %3352 }
0x47a7   :  { %v3350_v35 = vpop.permute.xlu0 %3349 }
0x47a8   :  { %v3355_v54 = vsel %vm140_vm5, %v3350_v35, %v3353_v53 }
0x47a9   :  { %4846 = vmatmul.mubr.msk.f32.vlgmr.msra.gmra.mrb[36].mxu0 %vm355_vm6, %v3355_v54 }
0x47aa   :  { %5217 = vmatpush3.bf16.msra.mxu0 %v6377_v41  ;;  %4883 = vmatprep.mubr.msk.f32.mxu0 %vm5623_vm0, %v5624_v1 }
0x47ab   :  { %5218 = vmatprep.subr.bf16.mxu0 %v5622_v0 }
0x47ae   :  { %5220 = vmatpush3.bf16.msra.mxu0 %v6380_v18 }
0x47af   :  { %5221 = vmatprep.subr.bf16.mxu0 %v5622_v0 }
0x47b2   :  { %5223 = vmatpush3.bf16.msra.mxu0 %v6241_v63 }
0x47b3   :  { %5224 = vmatprep.subr.bf16.mxu0 %v5622_v0 }
0x47b6   :  { %5226 = vmatpush3.bf16.msra.mxu0 %v6245_v20 }
0x47b7   :  { %5239 = vmatprep.subr.bf16.mxu0 %v5622_v0 }
0x487c   :  { %v3425_v17 = vpop.f32.mrb[36].mxu0 }
0x487d   :  { %v3426_v15 = vadd.f32 %v3425_v17, %v6410_v30  ;;  %v4847_v40 = vpop.f32.mrb[37].mxu0 }
0x487f   :  { %5490 = vtanh.f32 %v3426_v15  ;;  %v4119_v47 = vmul.f32 -1.442695, %v3426_v15 }
0x4881   :  { %5492 = vpow2.f32 %v4119_v47 }
0x4889   :  { %v5491_v58 = vpop.eup %5490 }
0x488a   :  { %3438 = vrot.lane.b32.xlu0 %v5491_v58, %s5625_s18 }
0x488b   :  { %v5493_v22 = vpop.eup %5492 }
0x488c   :  { %v3432_v49 = vadd.f32 1.0, %v5493_v22 }
0x488e   :  { %5494 = vrcp.f32 %v3432_v49 }
0x4898   :  { %v5495_v39 = vpop.eup %5494 }
0x4899   :  { %v3436_v7 = vmul.f32 %v5495_v39, %v6416_v60 }
0x48fc   :  { %v3439_v12 = vpop.permute.xlu0 %3438 }
0x48fd   :  { %v3441_v13 = vmul.f32 %v5495_v39, %v3439_v12 }
0x48ff   :  { %3443 = vrot.lane.b32.xlu1 %v3441_v13, %s5626_s19 }
0x4971   :  { %v3444_v14 = vpop.permute.xlu1 %3443 }
0x4972   :  { %v6464_v24 = vadd.f32 %v3444_v14, %v3436_v7 }
0x4974   :  { %5496 = vtanh.f32 %v6464_v24 }
0x497e   :  { %v5497_v6 = vpop.eup %5496 }
0x497f   :  { %3449 = vrot.lane.b32.xlu0 %v5497_v6, %s5625_s18 }
0x4983   :  { %3457 = vrot.lane.b32.xlu0 %v6444_v57, %s5625_s18 }
0x49f1   :  { %v3450_v25 = vpop.permute.xlu0 %3449 }
0x49f2   :  { %v3452_v27 = vmul.f32 %v5495_v39, %v3450_v25 }
0x49f4   :  { %3454 = vrot.lane.b32.xlu1 %v3452_v27, %s5626_s19 }
0x49f5   :  { %v3458_v3 = vpop.permute.xlu0 %3457 }
0x4a66   :  { %v3455_v32 = vpop.permute.xlu1 %3454 }
0x4a67   :  { %v3460_v37 = vsel %vm140_vm5, %v3455_v32, %v3458_v3 }
0x4a68   :  { %4865 = vmatmul.mubr.msk.f32.vlgmr.msra.gmra.mrb[26].mxu1 %vm355_vm6, %v3460_v37 }
0x4a69   :  { %5229 = vmatpush3.bf16.msra.mxu1 %v6307_v31  ;;  %4902 = vmatprep.mubr.msk.f32.mxu1 %vm5623_vm0, %v5624_v1 }
0x4a6a   :  { %5230 = vmatprep.subr.bf16.mxu1 %v5622_v0 }
0x4a6d   :  { %5232 = vmatpush3.bf16.msra.mxu1 %v6313_v10 }
0x4a6e   :  { %5233 = vmatprep.subr.bf16.mxu1 %v5622_v0 }
0x4a71   :  { %5235 = vmatpush3.bf16.msra.mxu1 %v6319_v34 }
0x4a72   :  { %5236 = vmatprep.subr.bf16.mxu1 %v5622_v0 }
0x4a75   :  { %5238 = vmatpush3.bf16.msra.mxu1 %v6323_v42 }
0x4a76   :  { %5251 = vmatprep.subr.bf16.mxu1 %v5622_v0 }
0x4b3b   :  { %v3530_v60 = vpop.f32.mrb[26].mxu1 }
0x4b3c   :  { %v3531_v43 = vadd.f32 %v3530_v60, %v6368_v55  ;;  %v4866_v62 = vpop.f32.mrb[27].mxu1 }
0x4b3e   :  { %5498 = vtanh.f32 %v3531_v43  ;;  %v4121_v21 = vmul.f32 -1.442695, %v3531_v43 }
0x4b40   :  { %5500 = vpow2.f32 %v4121_v21 }
0x4b48   :  { %v5499_v44 = vpop.eup %5498 }
0x4b49   :  { %3543 = vrot.lane.b32.xlu1 %v5499_v44, %s5625_s18 }
0x4b4a   :  { %v5501_v4 = vpop.eup %5500 }
0x4b4b   :  { %v3537_v51 = vadd.f32 1.0, %v5501_v4 }
0x4b4d   :  { %5502 = vrcp.f32 %v3537_v51 }
0x4b57   :  { %v5503_v26 = vpop.eup %5502 }
0x4b58   :  { %v3541_v53 = vmul.f32 %v5503_v26, %v6439_v8 }
0x4bbb   :  { %v3544_v33 = vpop.permute.xlu1 %3543 }
0x4bbc   :  { %v3546_v52 = vmul.f32 %v5503_v26, %v3544_v33 }
0x4bbe   :  { %3548 = vrot.lane.b32.xlu0 %v3546_v52, %s5626_s19 }
0x4c30   :  { %v3549_v35 = vpop.permute.xlu0 %3548 }
0x4c31   :  { %v6487_v54 = vadd.f32 %v3549_v35, %v3541_v53 }
0x4c33   :  { %5504 = vtanh.f32 %v6487_v54 }
0x4c3d   :  { %v5505_v17 = vpop.eup %5504 }
0x4c3e   :  { %3554 = vrot.lane.b32.xlu1 %v5505_v17, %s5625_s18 }
0x4c42   :  { %3571 = vrot.lane.b32.xlu1 %v3452_v27, %s5625_s18 }
0x4cb0   :  { %v3555_v15 = vpop.permute.xlu1 %3554 }
0x4cb1   :  { %v6492_v40 = vmul.f32 %v5503_v26, %v3555_v15 }
0x4cb3   :  { %3568 = vrot.lane.b32.xlu0 %v6492_v40, %s5626_s19 }
0x4cb4   :  { %v3572_v58 = vpop.permute.xlu1 %3571 }
0x4d25   :  { %v3569_v47 = vpop.permute.xlu0 %3568 }
0x4d26   :  { %v3574_v8 = vsel %vm140_vm5, %v3569_v47, %v3572_v58 }
0x4d27   :  { %4884 = vmatmul.mubr.msk.f32.vlgmr.msra.gmra.mrb[38].mxu0 %vm355_vm6, %v3574_v8 }
0x4d28   :  { %5241 = vmatpush3.bf16.msra.mxu0 %v6377_v41  ;;  %4921 = vmatprep.mubr.msk.f32.mxu0 %vm5623_vm0, %v5624_v1 }
0x4d29   :  { %5242 = vmatprep.subr.bf16.mxu0 %v5622_v0 }
0x4d2c   :  { %5244 = vmatpush3.bf16.msra.mxu0 %v6380_v18 }
0x4d2d   :  { %5245 = vmatprep.subr.bf16.mxu0 %v5622_v0 }
0x4d30   :  { %5247 = vmatpush3.bf16.msra.mxu0 %v6241_v63 }
0x4d31   :  { %5248 = vmatprep.subr.bf16.mxu0 %v5622_v0 }
0x4d34   :  { %5250 = vmatpush3.bf16.msra.mxu0 %v6245_v20 }
0x4dfa   :  { %v3644_v22 = vpop.f32.mrb[38].mxu0 }
0x4dfb   :  { %v3645_v49 = vadd.f32 %v3644_v22, %v6410_v30  ;;  %v4885_v39 = vpop.f32.mrb[39].mxu0 }
0x4dfd   :  { %5506 = vtanh.f32 %v3645_v49  ;;  %v4123_v12 = vmul.f32 -1.442695, %v3645_v49 }
0x4dff   :  { %5508 = vpow2.f32 %v4123_v12 }
0x4e07   :  { %v5507_v41 = vpop.eup %5506 }
0x4e08   :  { %3657 = vrot.lane.b32.xlu0 %v5507_v41, %s5625_s18 }
0x4e09   :  { %v5509_v13 = vpop.eup %5508 }
0x4e0a   :  { %v3651_v18 = vadd.f32 1.0, %v5509_v13 }
0x4e0c   :  { %5510 = vrcp.f32 %v3651_v18 }
0x4e16   :  { %v5511_v7 = vpop.eup %5510 }
0x4e17   :  { %v3655_v20 = vmul.f32 %v5511_v7, %v6464_v24 }
0x4e7a   :  { %v3658_v14 = vpop.permute.xlu0 %3657 }
0x4e7b   :  { %v3660_v63 = vmul.f32 %v5511_v7, %v3658_v14 }
0x4e7d   :  { %3662 = vrot.lane.b32.xlu1 %v3660_v63, %s5626_s19  ;;  %v2740_v63 = vsel %vm2739_vm10, %v6360_v45, 0.0 }
0x4eef   :  { %v3663_v6 = vpop.permute.xlu1 %3662 }
0x4ef0   :  { %v6511_v25 = vadd.f32 %v3663_v6, %v3655_v20  ;;  %v2732_v6 = vsel %vm2731_vm11, %v6360_v45, 0.0 }
0x4ef2   :  { %5512 = vtanh.f32 %v6511_v25 }
0x4efc   :  { %v5513_v27 = vpop.eup %5512 }
0x4efd   :  { %3668 = vrot.lane.b32.xlu0 %v5513_v27, %s5625_s18 }
0x4f01   :  { %3676 = vrot.lane.b32.xlu0 %v6492_v40, %s5625_s18 }
0x4f6f   :  { %v3669_v3 = vpop.permute.xlu0 %3668 }
0x4f70   :  { %v3671_v32 = vmul.f32 %v5511_v7, %v3669_v3 }
0x4f72   :  { %3673 = vrot.lane.b32.xlu1 %v3671_v32, %s5626_s19 }
0x4f73   :  { %v3677_v37 = vpop.permute.xlu0 %3676 }
0x4fe4   :  { %v3674_v60 = vpop.permute.xlu1 %3673 }
0x4fe5   :  { %v3679_v43 = vsel %vm140_vm5, %v3674_v60, %v3677_v37 }
0x4fe6   :  { %4903 = vmatmul.mubr.msk.f32.vlgmr.msra.gmra.mrb[28].mxu1 %vm355_vm6, %v3679_v43 }
0x4fe7   :  { %5253 = vmatpush3.bf16.msra.mxu1 %v6307_v31  ;;  %4940 = vmatprep.mubr.msk.f32.mxu1 %vm5623_vm0, %v5624_v1  ;;  %vm2785_vm0 = vcmask 39936  }
0x4fe8   :  { %5254 = vmatprep.subr.bf16.mxu1 %v5622_v0 }
0x4feb   :  { %5256 = vmatpush3.bf16.msra.mxu1 %v6313_v10 }
0x4fec   :  { %5257 = vmatprep.subr.bf16.mxu1 %v5622_v0 }
0x4fef   :  { %5259 = vmatpush3.bf16.msra.mxu1 %v6319_v34 }
0x4ff0   :  { %5260 = vmatprep.subr.bf16.mxu1 %v5622_v0 }
0x4ff3   :  { %5262 = vmatpush3.bf16.msra.mxu1 %v6323_v42 }
0x50b9   :  { %v3749_v24 = vpop.f32.mrb[28].mxu1 }
0x50ba   :  { %v3750_v62 = vadd.f32 %v3749_v24, %v6368_v55  ;;  %v4904_v44 = vpop.f32.mrb[29].mxu1 }
0x50bc   :  { %5514 = vtanh.f32 %v3750_v62  ;;  %v4125_v1 = vmul.f32 -1.442695, %v3750_v62 }
0x50be   :  { %5516 = vpow2.f32 %v4125_v1 }
0x50c6   :  { %v5515_v31 = vpop.eup %5514 }
0x50c7   :  { %3762 = vrot.lane.b32.xlu1 %v5515_v31, %s5625_s18 }
0x50c8   :  { %v5517_v21 = vpop.eup %5516 }
0x50c9   :  { %v3756_v10 = vadd.f32 1.0, %v5517_v21 }
0x50cb   :  { %5518 = vrcp.f32 %v3756_v10 }
0x50d5   :  { %v5519_v4 = vpop.eup %5518 }
0x50d6   :  { %v3760_v0 = vmul.f32 %v5519_v4, %v6487_v54 }
0x5139   :  { %v3763_v51 = vpop.permute.xlu1 %3762 }
0x513a   :  { %v3765_v34 = vmul.f32 %v5519_v4, %v3763_v51 }
0x513c   :  { %3767 = vrot.lane.b32.xlu0 %v3765_v34, %s5626_s19 }
0x51ae   :  { %v3768_v42 = vpop.permute.xlu0 %3767 }
0x51af   :  { %v6533_v26 = vadd.f32 %v3768_v42, %v3760_v0 }
0x51b1   :  { %5520 = vtanh.f32 %v6533_v26 }
0x51bb   :  { %v5521_v33 = vpop.eup %5520 }
0x51bc   :  { %3773 = vrot.lane.b32.xlu1 %v5521_v33, %s5625_s18 }
0x51c0   :  { %3790 = vrot.lane.b32.xlu1 %v3671_v32, %s5625_s18 }
0x522e   :  { %v3774_v52 = vpop.permute.xlu1 %3773 }
0x522f   :  { %v6538_v53 = vmul.f32 %v5519_v4, %v3774_v52 }
0x5231   :  { %3787 = vrot.lane.b32.xlu0 %v6538_v53, %s5626_s19 }
0x5232   :  { %v3791_v35 = vpop.permute.xlu1 %3790 }
0x52a3   :  { %v3788_v17 = vpop.permute.xlu0 %3787 }
0x52a4   :  { %v3793_v54 = vsel %vm140_vm5, %v3788_v17, %v3791_v35 }
0x52a5   :  { %4922 = vmatmul.mubr.msk.f32.vlgmr.msra.gmra.mrb[40].mxu0 %vm355_vm6, %v3793_v54 }
0x5378   :  { %v3863_v15 = vpop.f32.mrb[40].mxu0 }
0x5379   :  { %v3864_v58 = vadd.f32 %v3863_v15, %v6410_v30  ;;  %v4923_v47 = vpop.f32.mrb[41].mxu0 }
0x537b   :  { %5522 = vtanh.f32 %v3864_v58  ;;  %v4127_v22 = vmul.f32 -1.442695, %v3864_v58 }
0x537d   :  { %5524 = vpow2.f32 %v4127_v22 }
0x5385   :  { %v5523_v8 = vpop.eup %5522 }
0x5386   :  { %3876 = vrot.lane.b32.xlu0 %v5523_v8, %s5625_s18 }
0x5387   :  { %v5525_v49 = vpop.eup %5524 }
0x5388   :  { %v3870_v39 = vadd.f32 1.0, %v5525_v49 }
0x538a   :  { %5526 = vrcp.f32 %v3870_v39 }
0x5394   :  { %v5527_v41 = vpop.eup %5526 }
0x5395   :  { %v3874_v18 = vmul.f32 %v5527_v41, %v6511_v25 }
0x53f8   :  { %v3877_v12 = vpop.permute.xlu0 %3876 }
0x53f9   :  { %v3879_v13 = vmul.f32 %v5527_v41, %v3877_v12 }
0x53fb   :  { %3881 = vrot.lane.b32.xlu1 %v3879_v13, %s5626_s19 }
0x546d   :  { %v3882_v7 = vpop.permute.xlu1 %3881 }
0x546e   :  { %v3884_v14 = vadd.f32 %v3882_v7, %v3874_v18 }
0x5470   :  { %5528 = vtanh.f32 %v3884_v14 }
0x5471   :  { %5530 = vtanh.f32 %v6352_v56  ;;  %v2744_v56 = vsel %vm2743_vm12, %v6360_v45, 0.0  ;;  %v3099_v45 = vrot.slane %v6343_v19, %v353_v16 }
0x547a   :  { %v5529_v30 = vpop.eup %5528 }
0x547b   :  { %3887 = vrot.lane.b32.xlu0 %v5529_v30, %s5625_s18  ;;  %v5531_v20 = vpop.eup %5530 }
0x547c   :  { %v2747_v25 = vmul.f32 %v5531_v20, %v6357_v46 }
0x547e   :  { %v2751_v27 = vsel %vm2735_vm9, %v2747_v25, 0.0  ;;  %v2754_v3 = vsel %vm2739_vm10, %v2747_v25, 0.0  ;;  %v2748_v60 = vsel %vm2731_vm11, %v2747_v25, 0.0  ;;  %v2757_v46 = vsel %vm2743_vm12, %v2747_v25, 0.0 }
0x547f   :  { %3895 = vrot.lane.b32.xlu0 %v6538_v53, %s5625_s18 }
0x549e   :  { %2741 = vadd.xlane.f32.xlu0 %v2740_v63 }
0x54a2   :  { %2733 = vadd.xlane.f32.xlu0 %v2732_v6 }
0x54a6   :  { %2752 = vadd.xlane.f32.xlu0 %v2751_v27 }
0x54aa   :  { %2755 = vadd.xlane.f32.xlu0 %v2754_v3 }
0x54ed   :  { %v3888_v32 = vpop.permute.xlu0 %3887 }
0x54ee   :  { %v3890_v37 = vmul.f32 %v5527_v41, %v3888_v32 }
0x54f0   :  { %3892 = vrot.lane.b32.xlu1 %v3890_v37, %s5626_s19 }
0x54f1   :  { %v3896_v43 = vpop.permute.xlu0 %3895 }
0x5514   :  { %2737 = vadd.xlane.f32.xlu1 %v6364_v2 }
0x5518   :  { %2745 = vadd.xlane.f32.xlu1 %v2744_v56 }
0x551c   :  { %2749 = vadd.xlane.f32.xlu1 %v2748_v60 }
0x5520   :  { %2758 = vadd.xlane.f32.xlu1 %v2757_v46 }
0x552b   :  { %v2742_v10 = vpop.xlane.xlu0 %2741 }
0x552c   :  { %v2764_v58 = vrot.slane %v2742_v10, 4  ;;  %v5634_v10 = vmov 5  }
0x552f   :  { %v2734_v51 = vpop.xlane.xlu0 %2733 }
0x5533   :  { %v2753_v0 = vpop.xlane.xlu0 %2752 }
0x5534   :  { %v2770_v41 = vrot.slane %v2753_v0, 2 }
0x5562   :  { %v3893_v24 = vpop.permute.xlu1 %3892 }
0x5563   :  { %v3898_v62 = vsel %vm140_vm5, %v3893_v24, %v3896_v43  ;;  %v5630_v43 = vmov 1   ;;  %vm4025_vm5 = vcmask 33792  }
0x5564   :  { %4941 = vmatmul.mubr.msk.f32.vlgmr.msra.gmra.mrb[30].mxu1 %vm355_vm6, %v3898_v62  ;;  %5288 = vset.pattern.permute.xlu0 %v5630_v43 }
0x55a1   :  { %v2738_v35 = vpop.xlane.xlu1 %2737 }
0x55a2   :  { %v2761_v17 = vrot.slane %v2738_v35, 2 }
0x55a4   :  { %v2779_v54 = vsel %vm2778_vm13, %v2734_v51, %v2761_v17 }
0x55a5   :  { %v2746_v16 = vpop.xlane.xlu1 %2745  ;;  %v2781_v8 = vsel %vm2780_vm14, %v2779_v54, %v2764_v58 }
0x55a6   :  { %v2767_v15 = vrot.slane %v2746_v16, 6 }
0x55a8   :  { %v2783_v22 = vsel %vm2782_vm15, %v2781_v8, %v2767_v15 }
0x55a9   :  { %v2750_v47 = vpop.xlane.xlu1 %2749 }
0x55aa   :  { %v2784_v49 = vsel %vm54_vm2, %v2783_v22, %v2750_v47 }
0x55ab   :  { %v2786_v12 = vsel %vm2785_vm0, %v2784_v49, %v2770_v41 }
0x55ad   :  { %v2759_v39 = vpop.xlane.xlu1 %2758 }
0x55ae   :  { %v2776_v13 = vrot.slane %v2759_v39, 6 }
0x5637   :  { %v3968_v44 = vpop.f32.mrb[30].mxu1 }
0x5638   :  { %v3969_v31 = vadd.f32 %v3968_v44, %v6368_v55  ;;  %v4942_v1 = vpop.f32.mrb[31].mxu1  ;;  %v2756_v55 = vpop.xlane.xlu0 %2755 }
0x5639   :  { %v2773_v18 = vrot.slane %v2756_v55, 4  ;;  %v5632_v1 = vmov 4  }
0x563a   :  { %5532 = vtanh.f32 %v3969_v31  ;;  %v4129_v21 = vmul.f32 -1.442695, %v3969_v31  ;;  %v5631_v31 = vmov 2  }
0x563b   :  { %v2788_v7 = vsel %vm2787_vm1, %v2786_v12, %v2773_v18 }
0x563c   :  { %5534 = vpow2.f32 %v4129_v21  ;;  %v2790_v14 = vsel %vm2789_vm3, %v2788_v7, %v2776_v13 }
0x563d   :  { %v2792_v30 = vsel %vm2791_vm4, %v2790_v14, -inf }
0x5644   :  { %v5533_v2 = vpop.eup %5532 }
0x5645   :  { %3981 = vrot.lane.b32.xlu0 %v5533_v2, %s5625_s18 }
0x5646   :  { %v5535_v4 = vpop.eup %5534 }
0x5647   :  { %v3975_v34 = vadd.f32 1.0, %v5535_v4 }
0x5649   :  { %3101 = vrot.lane.b32.xlu0 %v3099_v45, %s5629_s2  ;;  %5536 = vrcp.f32 %v3975_v34 }
0x5653   :  { %v6568_v42 = vpop.eup %5536 }
0x5654   :  { %v3979_v25 = vmul.f32 %v6568_v42, %v6533_v26 }
0x56b7   :  { %v3982_v33 = vpop.permute.xlu0 %3981 }
0x56b8   :  { %v3984_v52 = vmul.f32 %v6568_v42, %v3982_v33  ;;  %v5636_v33 = vmov 7  }
0x56ba   :  { %3986 = vrot.lane.b32.xlu1 %v3984_v52, %s5626_s19 }
0x56bb   :  { %v3102_v63 = vpop.permute.xlu0 %3101 }
0x56bc   :  { %v3339_v20 = vmul.f32 %v6444_v57, %v3102_v63  ;;  %v3777_v6 = vmul.f32 %v6538_v53, %v3102_v63  ;;  %v3558_v53 = vmul.f32 %v6492_v40, %v3102_v63  ;;  %v3104_v2 = vmul.f32 %v3102_v63, %v6392_v28 }
0x56bd   :  { %v5633_v40 = vmov 3  }
0x56de   :  { %2793 = vmax.xlane.f32.xlu1 %v2792_v30 }
0x56ef   :  { %3341 = vrot.lane.b32.xlu1 %v3339_v20, %s5626_s19 }
0x56f3   :  { %3779 = vrot.lane.b32.xlu1 %v3777_v6, %s5626_s19 }
0x572c   :  { %v3987_v27 = vpop.permute.xlu1 %3986 }
0x572d   :  { %v3989_v3 = vadd.f32 %v3987_v27, %v3979_v25 }
0x572f   :  { %5538 = vtanh.f32 %v3989_v3 }
0x5739   :  { %v5539_v32 = vpop.eup %5538 }
0x573a   :  { %3992 = vrot.lane.b32.xlu0 %v5539_v32, %s5625_s18  ;;  %s4033_s18 = sshll.u32 %s5641_s17, 4  ;;  %s4034_s18 = int_to_ptr.vmem [resolvable:$true] %s4033_s18 }
0x573b   :  { %s5569_s21 = scalar_lea.vmem %s4034_s18, 32  ;;  %p5574_p9 = scmp.lt.s32.totalorder %s4034_s18, %s4034_s18 }
0x573c   :  { %p5570_p8 = scmp.ne.s32.totalorder %s4034_s18, %s5569_s21  ;;  %p5575_p10 = scmp.lt.s32.totalorder %s5569_s21, %s5569_s21 }
0x573e   :  { %p5576_p11 = por %p5575_p10, %p5574_p9 }
0x5740   :  { %p5577_p12 = pnand %p5576_p11, %p5570_p8 }
0x576b   :  { %v2794_v37 = vpop.xlane.xlu1 %2793 }
0x576c   :  { %v2795_v56 = vsub.f32 %v2790_v14, %v2794_v37 }
0x576e   :  { %v2796_v60 = vmul.f32 1.442695, %v2795_v56 }
0x576f   :  { %v3342_v4 = vpop.permute.xlu1 %3341 }
0x5770   :  { %5540 = vpow2.f32 %v2796_v60  ;;  %v3344_v51 = vsel %vm2731_vm11, %v3342_v4, 0.0 }
0x5773   :  { %v3780_v34 = vpop.permute.xlu1 %3779 }
0x5774   :  { %v3782_v0 = vsel %vm2731_vm11, %v3780_v34, 0.0 }
0x577a   :  { %v5541_v57 = vpop.eup %5540 }
0x577b   :  { %v2798_v46 = vsel %vm2791_vm4, %v5541_v57, 0.0 }
0x577c   :  { %2799 = vadd.xlane.f32.xlu0 %v2798_v46 }
0x5792   :  { %3560 = vrot.lane.b32.xlu0 %v3558_v53, %s5626_s19 }
0x57ac   :  { %v3993_v26 = vpop.permute.xlu0 %3992 }
0x57ad   :  { %v3995_v45 = vmul.f32 %v6568_v42, %v3993_v26  ;;  %v5635_v42 = vmov 6  }
0x57af   :  { %v3996_v21 = vmul.f32 %v3995_v45, %v3102_v63 }
0x5809   :  { %v2800_v24 = vpop.xlane.xlu0 %2799 }
0x580a   :  { %5542 = vrcp.f32 %v2800_v24 }
0x580d   :  { %v3561_v28 = vpop.permute.xlu0 %3560 }
0x580e   :  { %v3563_v55 = vsel %vm2731_vm11, %v3561_v28, 0.0 }
0x5814   :  { %v5543_v62 = vpop.eup %5542 }
0x5815   :  { %v2802_v44 = vmul.f32 %v5543_v62, %v5541_v57 }
0x5817   :  { %2811 = vperm.xlu0 %5288, %v2802_v44   ;;  %2805 = vperm.xlu1 %5287, %v2802_v44  }
0x581b   :  { %5289 = vset.pattern.permute.xlu1 %v5631_v31  ;;  %5291 = vset.pattern.permute.xlu0 %v5632_v1 }
0x581c   :  { %2817 = vperm.xlu1 %5289, %v2802_v44  }
0x5820   :  { %3106 = vrot.lane.b32.xlu1 %v3104_v2, %s5626_s19 }
0x5821   :  { %5290 = vset.pattern.permute.xlu1 %v5633_v40 }
0x5824   :  { %2823 = vperm.xlu1 %5290, %v2802_v44  }
0x5828   :  { %3998 = vrot.lane.b32.xlu1 %v3996_v21, %s5626_s19 }
0x5829   :  { %5292 = vset.pattern.permute.xlu1 %v5634_v10 }
0x5836   :  { %3345 = vadd.xlane.f32.xlu0 %v3344_v51 }
0x583a   :  { %3783 = vadd.xlane.f32.xlu0 %v3782_v0 }
0x584c   :  { %3564 = vadd.xlane.f32.xlu1 %v3563_v55 }
0x5850   :  { %2829 = vperm.xlu0 %5291, %v2802_v44  }
0x5854   :  { %5295 = vset.pattern.permute.xlu0 %v5628_v9 }
0x585d   :  { %2835 = vperm.xlu1 %5292, %v2802_v44  }
0x5861   :  { %5293 = vset.pattern.permute.xlu1 %v5635_v42 }
0x5862   :  { %2841 = vperm.xlu1 %5293, %v2802_v44  }
0x5866   :  { %5294 = vset.pattern.permute.xlu1 %v5636_v33 }
0x5896   :  { %v2806_v52 = vpop.permute.xlu1 %2805  ;;  %v2812_v35 = vpop.permute.xlu0 %2811 }
0x5897   :  { %v2808_v16 = vmul.f32 %v2806_v52, %v5822_v36  ;;  %v2814_v17 = vmul.f32 %v2812_v35, %v5881_v50  ;;  %v3115_v36 = vrot.slane %v6343_v19, %v2868_v61 }
0x5899   :  { %v2815_v54 = vadd.f32 %v2814_v17, %v2808_v16 }
0x589b   :  { %v2818_v15 = vpop.permute.xlu1 %2817 }
0x589c   :  { %v2820_v58 = vmul.f32 %v2818_v15, %v5939_v5 }
0x589e   :  { %v2821_v47 = vadd.f32 %v2820_v58, %v2815_v54 }
0x589f   :  { %v3107_v8 = vpop.permute.xlu1 %3106 }
0x58a3   :  { %v2824_v22 = vpop.permute.xlu1 %2823 }
0x58a4   :  { %v2826_v9 = vmul.f32 %v2824_v22, %v5996_v23  ;;  %v3109_v23 = vsel %vm2731_vm11, %v3107_v8, 0.0 }
0x58a6   :  { %v2827_v49 = vadd.f32 %v2826_v9, %v2821_v47 }
0x58a7   :  { %v3999_v39 = vpop.permute.xlu1 %3998 }
0x58a8   :  { %v4001_v41 = vsel %vm2731_vm11, %v3999_v39, 0.0 }
0x58a9   :  { %4002 = vadd.xlane.f32.xlu1 %v4001_v41 }
0x58ba   :  { %2847 = vperm.xlu1 %5294, %v2802_v44  }
0x58c3   :  { %v3346_v50 = vpop.xlane.xlu0 %3345 }
0x58c4   :  { %v3347_v12 = vadd.f32 %v3346_v50, %v3115_v36 }
0x58c6   :  { %4006 = vrot.lane.b32.xlu0 %v3347_v12, %s5637_s13 }
0x58c7   :  { %v3784_v18 = vpop.xlane.xlu0 %3783 }
0x58c8   :  { %v3785_v7 = vadd.f32 %v3784_v18, %v3115_v36 }
0x58cf   :  { %v2830_v30 = vpop.permute.xlu0 %2829 }
0x58d0   :  { %v2832_v61 = vmul.f32 %v2830_v30, %v6054_v29 }
0x58d2   :  { %v2833_v20 = vadd.f32 %v2832_v61, %v2827_v49 }
0x58d9   :  { %v3565_v5 = vpop.xlane.xlu1 %3564 }
0x58da   :  { %v3566_v13 = vadd.f32 %v3565_v5, %v3115_v36 }
0x58dc   :  { %4010 = vrot.lane.b32.xlu0 %v3566_v13, %s5638_s14 }
0x58dd   :  { %v2836_v14 = vpop.permute.xlu1 %2835 }
0x58de   :  { %3110 = vadd.xlane.f32.xlu1 %v3109_v23  ;;  %v2838_v19 = vmul.f32 %v2836_v14, %v6119_v48 }
0x58e0   :  { %4014 = vrot.lane.b32.xlu0 %v3785_v7, %s5639_s15  ;;  %v2839_v27 = vadd.f32 %v2838_v19, %v2833_v20 }
0x58e1   :  { %v2842_v38 = vpop.permute.xlu1 %2841 }
0x58e2   :  { %v2844_v6 = vmul.f32 %v2842_v38, %v6177_v59 }
0x58e4   :  { %v2845_v32 = vadd.f32 %v2844_v6, %v2839_v27 }
0x5936   :  { %v4003_v63 = vpop.xlane.xlu1 %4002 }
0x5937   :  { %v4004_v25 = vadd.f32 %v4003_v63, %v3115_v36 }
0x5938   :  { %v4007_v60 = vpop.permute.xlu0 %4006 }
0x5939   :  { %4018 = vrot.lane.b32.xlu0 %v4004_v25, %s5640_s16 }
0x593a   :  { %v2848_v3 = vpop.permute.xlu1 %2847 }
0x593b   :  { %v2850_v37 = vmul.f32 %v2848_v3, %v6237_v11 }
0x593d   :  { %v2851_v56 = vadd.f32 %v2850_v37, %v2845_v32 }
0x593f   :  { %2853 = vrot.lane.b32.xlu0 %v2851_v56, %s5626_s19  ;;  %s5642_s19 = smov [#allocation6]  }
0x5940   :  { %s4043_s20 = sshll.u32 %s5642_s19, 4  ;;  %s4044_s20 = int_to_ptr.vmem [resolvable:$true] %s4043_s20 }
0x594e   :  { %v4011_v29 = vpop.permute.xlu0 %4010 }
0x5952   :  { %v4015_v53 = vpop.permute.xlu0 %4014 }
0x596b   :  { %v3111_v57 = vpop.xlane.xlu1 %3110 }
0x596c   :  { %v3116_v46 = vadd.f32 %v3115_v36, %v3111_v57 }
0x596e   :  { %v4021_v48 = vsel %vm2778_vm13, %v3116_v46, %v4007_v60 }
0x596f   :  { %v4022_v59 = vsel %vm2780_vm14, %v4021_v48, %v4011_v29 }
0x5970   :  { %v4023_v43 = vsel %vm2782_vm15, %v4022_v59, %v4015_v53 }
0x59ab   :  { %v4019_v26 = vpop.permute.xlu0 %4018 }
0x59ac   :  { %v4024_v11 = vsel %vm54_vm2, %v4023_v43, %v4019_v26 }
0x59ad   :  { %4026 = vst.msk [vmem:[#allocation5] sm:$0x3] %vm4025_vm5, %v4024_v11 }
0x59ae   :  { %5580 = shalt.err (!%p5577_p12)
}
0x59af   :  { %s5581_s23 = scalar_lea.hbm %s6641_s3, 32 }
0x59b0   :  { %p5582_p13 = scmp.ne.s32.totalorder %s6641_s3, %s5581_s23  ;;  %p5585_p0 = scmp.lt.u32.totalorder %s5581_s23, %s6641_s3 }
0x59b2   :  { %p5587_p1 = pnand %p5585_p0, %p5582_p13 }
0x59b4   :  { %5590 = shalt.err (!%p5587_p1)
}
0x59b5   :  { %4036 = dma.vmem_to_hbm [thread:$0]  %s4034_s18, 32, %s6641_s3, [#allocation4]   ;;  %v2854_v24 = vpop.permute.xlu0 %2853 }
0x59b6   :  { %2856 = vst.msk [vmem:[#allocation6] sm:$0x3] %vm2731_vm11, %v2854_v24  ;;  %s5591_s30 = scalar_lea.vmem %s4044_s20, 32  ;;  %p5596_p3 = scmp.lt.s32.totalorder %s4044_s20, %s4044_s20 }
0x59b7   :  { %p5592_p2 = scmp.ne.s32.totalorder %s4044_s20, %s5591_s30  ;;  %p5597_p4 = scmp.lt.s32.totalorder %s5591_s30, %s5591_s30 }
0x59b9   :  { %p5598_p5 = por %p5597_p4, %p5596_p3 }
0x59bb   :  { %p5599_p6 = pnand %p5598_p5, %p5592_p2 }
0x59bd   :  { %5602 = shalt.err (!%p5599_p6)
}
0x59be   :  { %s5603_s1 = scalar_lea.hbm %s6642_s4, 32 }
0x59bf   :  { %p5604_p7 = scmp.ne.s32.totalorder %s6642_s4, %s5603_s1  ;;  %p5607_p8 = scmp.lt.u32.totalorder %s5603_s1, %s6642_s4 }
0x59c1   :  { %p5609_p9 = pnand %p5607_p8, %p5604_p7 }
0x59c3   :  { %5612 = shalt.err (!%p5609_p9)
}
0x59c4   :  { %4046 = dma.vmem_to_hbm [thread:$0]  %s4044_s20, 32, %s6642_s4, [#allocation7]  }
0x59c5   :  { %5615 = dma.done.wait [#allocation4], 32  }
0x59c6   :  { %5616 = vsyncadd [#allocation4], 4294967264 }
0x59c7   :  { %5617 = dma.done.wait [#allocation7], 32  }
0x59c8   :  { %5618 = vsyncadd [#allocation7], 4294967264 }
0x59c9   :  { %4053 = vsyncpa [#allocation3], 1 }
0x59ca   :  { %4054 = vsyncpa [#allocation4], 1 }
0x59cb   :  { %4055 = vsyncpa [#allocation7], 1 }

</bundles_post_ra>
